<compile_context>
chip_gen: v7x
topology: tpu7x:2x2x1
jax: 0.10.0
libtpu: 0.0.40
codegen_flags: <defaults>
</compile_context>

<pallas_src>
import math

import jax
import jax.numpy as jnp
from jax.experimental import pallas as pl
from jax.experimental.pallas import tpu as pltpu

# ---------------- config (small, synthetic) ----------------
VOCAB = 64
VOCAB_PAD = 128          # lane-dense logits slab (padding masked in-kernel)
HIDDEN = 32
N_LAYERS = 2
N_HEADS = 4
HEAD_DIM = HIDDEN // N_HEADS
INTERMEDIATE = 64
LORA_R = 4
LORA_ALPHA = 8
EOS_ID = 2
EPS = 1e-6               # python float (never a captured jnp constant)
NEG_BIG = -1e30          # python float
IGNORE_INDEX = -100
MXU_DTYPE = jnp.bfloat16  # matmul operand dtype; accumulation stays f32


# ---------------- in-kernel helpers (pure, no traced captures) ----------------
def _rms(x, w):
    # x: (M, H) f32, w: (1, H) f32
    var = jnp.mean(x * x, axis=-1, keepdims=True)
    return x * jax.lax.rsqrt(var + EPS) * w


# ---------------- single fused decoder-network kernel ----------------
def _fused_net_kernel(x_ref, ln1_ref, ln2_ref, wqkv_ref, wo_ref, wgu_ref,
                      wd_ref, cos_ref, sin_ref, bias_ref, lnf_ref, wlm_ref,
                      tgt_ref, logits_ref, stats_ref, attn_scr):
    H, D, NH, I, L = HIDDEN, HEAD_DIM, N_HEADS, INTERMEDIATE, N_LAYERS
    x = x_ref[...].astype(jnp.float32)                     # (M, H) residual
    cos = cos_ref[...]                                     # (M, H) f32
    sin = sin_ref[...]
    bias = bias_ref[...]                                   # (M, M) f32 additive
    scale = 1.0 / math.sqrt(D)

    for layer in range(L):                                 # static unroll (2)
        # ---- attention sub-block ----
        h = _rms(x, ln1_ref[layer])                        # (M, H) f32
        # fused projection: [q | k | v | q@R | k@R]  (rotate-half pre-folded)
        proj = jnp.dot(h.astype(MXU_DTYPE), wqkv_ref[layer],
                       preferred_element_type=jnp.float32)  # (M, 5H)
        q = proj[:, 0 * H:1 * H]
        k = proj[:, 1 * H:2 * H]
        v = proj[:, 2 * H:3 * H]
        qr = proj[:, 3 * H:4 * H]
        kr = proj[:, 4 * H:5 * H]
        # RoPE is now purely elementwise (VPU)
        q = q * cos + qr * sin
        k = k * cos + kr * sin

        for hh in range(NH):                               # static unroll (4)
            lo, hi = hh * D, (hh + 1) * D
            qh = q[:, lo:hi].astype(MXU_DTYPE)             # (M, D)
            kh = k[:, lo:hi].astype(MXU_DTYPE)
            vh = v[:, lo:hi].astype(MXU_DTYPE)
            s = jax.lax.dot_general(qh, kh, (((1,), (1,)), ((), ())),
                                    preferred_element_type=jnp.float32)
            s = s * scale + bias                           # block-diag causal
            m = jnp.max(s, axis=-1, keepdims=True)
            p = jnp.exp(s - m)
            l = jnp.sum(p, axis=-1, keepdims=True)
            p = p * pl.reciprocal(l, approx=True)          # EUP, free slot
            # write PV result into the scratch slab (no lane-axis concat)
            attn_scr[:, lo:hi] = jnp.dot(p.astype(MXU_DTYPE), vh,
                                         preferred_element_type=jnp.float32)

        x = x + jnp.dot(attn_scr[...].astype(MXU_DTYPE), wo_ref[layer],
                        preferred_element_type=jnp.float32)

        # ---- MLP sub-block (gate/up fused: 2*I = 128 lanes, lane-dense) ----
        h2 = _rms(x, ln2_ref[layer])
        gu = jnp.dot(h2.astype(MXU_DTYPE), wgu_ref[layer],
                     preferred_element_type=jnp.float32)   # (M, 2I)
        g, u = gu[:, :I], gu[:, I:]
        act = g * (1.0 / (1.0 + jnp.exp(-g))) * u          # SiLU(g) * u, f32
        x = x + jnp.dot(act.astype(MXU_DTYPE), wd_ref[layer],
                        preferred_element_type=jnp.float32)

    # ---- final norm + lm_head + shifted cross-entropy ----
    hf = _rms(x, lnf_ref[...])
    logits = jnp.dot(hf.astype(MXU_DTYPE), wlm_ref[...],
                     preferred_element_type=jnp.float32)   # (M, VOCAB_PAD)
    # TODO(synk): make this HBM writeback optional when the caller only needs
    # the loss (dominant traffic at real vocab sizes).
    logits_ref[...] = logits.astype(logits_ref.dtype)

    vocab_ids = jax.lax.broadcasted_iota(jnp.int32, logits.shape, 1)
    real_col = vocab_ids < VOCAB                           # mask the pad lanes
    ml = jnp.where(real_col, logits, NEG_BIG)
    mmax = jnp.max(ml, axis=-1, keepdims=True)
    lse = jnp.log(jnp.sum(jnp.exp(ml - mmax), axis=-1, keepdims=True)) + mmax

    tgt = tgt_ref[...]                                     # (M, 1) int32, -100 = ignore
    picked = jnp.sum(jnp.where(vocab_ids == tgt, logits, 0.0),
                     axis=-1, keepdims=True)               # (M, 1)
    nll = lse - picked
    valid = (tgt != IGNORE_INDEX).astype(jnp.float32)      # (M, 1)
    sum_nll = jnp.sum(nll * valid, axis=0, keepdims=True)  # (1, 1)
    count = jnp.sum(valid, axis=0, keepdims=True)          # (1, 1)

    # emit sum + count (lanes 0 / 1); the mean is taken outside the kernel so
    # a future M-tiled version of this head stays correct.
    lane = jax.lax.broadcasted_iota(jnp.int32, (1, VOCAB_PAD), 1)
    stats_ref[...] = (jnp.where(lane == 0, sum_nll, 0.0)
                      + jnp.where(lane == 1, count, 0.0))


def fused_decoder_net(x2d, ln1, ln2, wqkv, wo, wgu, wd, cos, sin, bias,
                      lnf, wlm, tgt):
    M, H = x2d.shape
    L, I = N_LAYERS, INTERMEDIATE
    logits, stats = pl.pallas_call(
        _fused_net_kernel,
        out_shape=(jax.ShapeDtypeStruct((M, VOCAB_PAD), jnp.float32),
                   jax.ShapeDtypeStruct((1, VOCAB_PAD), jnp.float32)),
        grid=(1,),
        in_specs=[
            pl.BlockSpec((M, H), lambda i: (0, 0)),              # x (B*T folded)
            pl.BlockSpec((L, 1, H), lambda i: (0, 0, 0)),        # ln1 (stacked)
            pl.BlockSpec((L, 1, H), lambda i: (0, 0, 0)),        # ln2
            pl.BlockSpec((L, H, 5 * H), lambda i: (0, 0, 0)),    # [q|k|v|qR|kR]
            pl.BlockSpec((L, H, H), lambda i: (0, 0, 0)),        # wo
            pl.BlockSpec((L, H, 2 * I), lambda i: (0, 0, 0)),    # w_gate|w_up
            pl.BlockSpec((L, I, H), lambda i: (0, 0, 0)),        # w_down
            pl.BlockSpec((M, H), lambda i: (0, 0)),              # rope cos (tiled)
            pl.BlockSpec((M, H), lambda i: (0, 0)),              # rope sin (tiled)
            pl.BlockSpec((M, M), lambda i: (0, 0)),              # block-diag causal bias
            pl.BlockSpec((1, H), lambda i: (0, 0)),              # ln_f
            pl.BlockSpec((H, VOCAB_PAD), lambda i: (0, 0)),      # lm_head (padded)
            pl.BlockSpec((M, 1), lambda i: (0, 0)),              # shifted targets
        ],
        out_specs=(pl.BlockSpec((M, VOCAB_PAD), lambda i: (0, 0)),
                   pl.BlockSpec((1, VOCAB_PAD), lambda i: (0, 0))),
        scratch_shapes=[pltpu.VMEM((M, H), jnp.float32)],        # attn slab
        compiler_params=pltpu.CompilerParams(
            dimension_semantics=("arbitrary",)),                 # single step, no megacore split
    )(x2d, ln1, ln2, wqkv, wo, wgu, wd, cos, sin, bias, lnf, wlm, tgt)
    return logits, stats


# ---------------- host-side tables & one-time weight fusion ----------------
def _rope_tables(T, base=10000.0):
    D = HEAD_DIM
    inv_freq = 1.0 / (base ** (jnp.arange(0, D, 2, dtype=jnp.float32) / D))
    pos = jnp.arange(T, dtype=jnp.float32)
    freqs = pos[:, None] * inv_freq[None, :]            # (T, D/2)
    emb = jnp.concatenate([freqs, freqs], axis=-1)      # (T, D)
    cos = jnp.tile(jnp.cos(emb), (1, N_HEADS))          # (T, H) per-head identical
    sin = jnp.tile(jnp.sin(emb), (1, N_HEADS))
    return cos, sin


def _rot_half_matrix():
    # (H, H) block-diagonal signed permutation: (q @ R) == rotate_half per head.
    D, H = HEAD_DIM, HIDDEN
    idx = jnp.arange(H)
    jj = idx % D
    src = jnp.where(jj < D // 2, idx + D // 2, idx - D // 2)
    val = jnp.where(jj < D // 2, -1.0, 1.0).astype(jnp.float32)
    return jnp.zeros((H, H), jnp.float32).at[src, idx].set(val)


def init_params(key):
    keys = iter(jax.random.split(key, 64))

    def nrm(shape, scale=0.02):
        return jax.random.normal(next(keys), shape, jnp.float32) * scale

    params = {"embed": nrm((VOCAB, HIDDEN))}
    # repeat_token := eos_token_embed.clone()[None, None, :]
    params["repeat_token"] = params["embed"][EOS_ID][None, None, :]
    layers = []
    for _ in range(N_LAYERS):
        layers.append({
            "ln1": jnp.ones((HIDDEN,), jnp.float32),
            "ln2": jnp.ones((HIDDEN,), jnp.float32),
            "wq": nrm((HIDDEN, HIDDEN)),
            "wk": nrm((HIDDEN, HIDDEN)),
            "wv": nrm((HIDDEN, HIDDEN)),
            "wo": nrm((HIDDEN, HIDDEN)),
            # PEFT LoRA weights stored pre-transposed as (in, r) / (r, out);
            # random B so the LoRA path is exercised.
            "k_lora_a": nrm((HIDDEN, LORA_R)),
            "k_lora_b": nrm((LORA_R, HIDDEN)),
            "v_lora_a": nrm((HIDDEN, LORA_R)),
            "v_lora_b": nrm((LORA_R, HIDDEN)),
            "wg": nrm((HIDDEN, INTERMEDIATE)),
            "wu": nrm((HIDDEN, INTERMEDIATE)),
            "wd": nrm((INTERMEDIATE, HIDDEN)),
        })
    params["layers"] = layers
    params["ln_f"] = jnp.ones((HIDDEN,), jnp.float32)
    params["lm_head"] = nrm((HIDDEN, VOCAB))
    return params


def fuse_params(params):
    """One-time hoist: merge LoRA, fold rotate-half into q/k, stack layers,
    pad lm_head to 128 lanes, cast matmul weights to bf16."""
    R = _rot_half_matrix()
    scaling = LORA_ALPHA / LORA_R
    ln1, ln2, wqkv, wo, wgu, wd = [], [], [], [], [], []
    for layer in params["layers"]:
        wk_eff = layer["wk"] + scaling * (layer["k_lora_a"] @ layer["k_lora_b"])
        wv_eff = layer["wv"] + scaling * (layer["v_lora_a"] @ layer["v_lora_b"])
        wq = layer["wq"]
        ln1.append(layer["ln1"])
        ln2.append(layer["ln2"])
        wqkv.append(jnp.concatenate(
            [wq, wk_eff, wv_eff, wq @ R, wk_eff @ R], axis=1))   # (H, 5H)
        wo.append(layer["wo"])
        wgu.append(jnp.concatenate([layer["wg"], layer["wu"]], axis=1))
        wd.append(layer["wd"])
    wlm_pad = jnp.pad(params["lm_head"], ((0, 0), (0, VOCAB_PAD - VOCAB)))
    return {
        "embed": params["embed"],
        "repeat_token": params["repeat_token"],
        "ln1": jnp.stack(ln1)[:, None, :],                       # (L, 1, H)
        "ln2": jnp.stack(ln2)[:, None, :],
        "wqkv": jnp.stack(wqkv).astype(MXU_DTYPE),               # (L, H, 5H)
        "wo": jnp.stack(wo).astype(MXU_DTYPE),                   # (L, H, H)
        "wgu": jnp.stack(wgu).astype(MXU_DTYPE),                 # (L, H, 2I)
        "wd": jnp.stack(wd).astype(MXU_DTYPE),                   # (L, I, H)
        "ln_f": params["ln_f"].reshape(1, HIDDEN),
        "lm_head": wlm_pad.astype(MXU_DTYPE),                    # (H, 128)
    }


# ---------------- forward (outside-kernel glue is shape-only / tiny) ----------------
def decoder_forward(fused, input_ids, labels=None, cat_repeat_token=False):
    B, T = input_ids.shape
    x = jnp.take(fused["embed"], input_ids, axis=0)              # (B, T, H)
    if cat_repeat_token:
        # torch.cat([(1,1,H), (B,T,H)], dim=1); tiled over batch so B > 1 works.
        rt = jnp.broadcast_to(fused["repeat_token"], (B, 1, HIDDEN))
        x = jnp.concatenate([rt, x], axis=1)

    B, T2, H = x.shape
    M = B * T2

    # RoPE tables tiled over batch (rows are [b0 t0..t_{T2-1}, b1 t0.., ...]).
    cos_t, sin_t = _rope_tables(T2)
    cos = jnp.tile(cos_t, (B, 1))                                # (M, H)
    sin = jnp.tile(sin_t, (B, 1))

    # Block-diagonal causal additive bias for the batch-folded layout.
    row = jnp.arange(M, dtype=jnp.int32)
    col = jnp.arange(M, dtype=jnp.int32)
    same_b = (row[:, None] // T2) == (col[None, :] // T2)
    causal = (col[None, :] % T2) <= (row[:, None] % T2)
    bias = jnp.where(same_b & causal, 0.0, NEG_BIG).astype(jnp.float32)

    # HF causal-LM shifted loss: target[b, t] = labels[b, t+1], last pos ignored.
    if labels is not None:
        tgt = jnp.concatenate(
            [labels[:, 1:], jnp.full((B, 1), IGNORE_INDEX, labels.dtype)], axis=1)
    else:
        tgt = jnp.full((B, T2), IGNORE_INDEX, jnp.int32)

    logits_pad, stats = fused_decoder_net(
        x.reshape(M, H).astype(jnp.float32),
        fused["ln1"], fused["ln2"], fused["wqkv"], fused["wo"],
        fused["wgu"], fused["wd"], cos, sin, bias,
        fused["ln_f"], fused["lm_head"],
        tgt.reshape(M, 1).astype(jnp.int32))

    logits = logits_pad[:, :VOCAB].reshape(B, T2, VOCAB)
    # Note: returns 0 (not NaN) when every target is IGNORE_INDEX, unlike torch CE.
    loss = stats[0, 0] / jnp.maximum(stats[0, 1], 1.0)
    return (loss if labels is not None else None), logits


if __name__ == "__main__":
    key = jax.random.PRNGKey(0)
    pkey, dkey = jax.random.split(key)
    params = init_params(pkey)
    fused = fuse_params(params)       # one-time weight fusion, outside hot path

    B, T = 2, 8
    input_ids = jax.random.randint(dkey, (B, T), 0, VOCAB, dtype=jnp.int32)
    # labels aligned with the repeat-token-prepended sequence (first pos ignored)
    labels = jnp.concatenate(
        [jnp.full((B, 1), IGNORE_INDEX, jnp.int32), input_ids], axis=1)

    forward = jax.jit(decoder_forward, static_argnames=("cat_repeat_token",))
    loss, logits = forward(fused, input_ids, labels=labels,
                           cat_repeat_token=True)
    loss = jax.block_until_ready(loss)
    logits = jax.block_until_ready(logits)

    assert logits.shape == (B, T + 1, VOCAB)
    assert bool(jnp.isfinite(loss))
    print("KERNEL_OK")
</pallas_src>

<mosaic_0001>
module attributes {stable_mosaic.version = 11 : i64} {
  func.func @_fused_net_kernel(%arg0: i32, %arg1: memref<18x32xf32, #tpu.memory_space<vmem>>, %arg2: memref<2x1x32xf32, #tpu.memory_space<vmem>>, %arg3: memref<2x1x32xf32, #tpu.memory_space<vmem>>, %arg4: memref<2x32x160xbf16, #tpu.memory_space<vmem>>, %arg5: memref<2x32x32xbf16, #tpu.memory_space<vmem>>, %arg6: memref<2x32x128xbf16, #tpu.memory_space<vmem>>, %arg7: memref<2x64x32xbf16, #tpu.memory_space<vmem>>, %arg8: memref<18x32xf32, #tpu.memory_space<vmem>>, %arg9: memref<18x32xf32, #tpu.memory_space<vmem>>, %arg10: memref<18x18xf32, #tpu.memory_space<vmem>>, %arg11: memref<1x32xf32, #tpu.memory_space<vmem>>, %arg12: memref<32x128xbf16, #tpu.memory_space<vmem>>, %arg13: memref<18x1xi32, #tpu.memory_space<vmem>>, %arg14: memref<18x128xf32, #tpu.memory_space<vmem>>, %arg15: memref<1x128xf32, #tpu.memory_space<vmem>>, %arg16: memref<18x32xf32, #tpu.memory_space<vmem>>) attributes {dimension_semantics = [#tpu.dimension_semantics<arbitrary>], iteration_bounds = array<i64: 1>, scalar_prefetch = 0 : i64, scratch_operands = 1 : i64, tpu.core_type = #tpu.core_type<tc>, window_params = [{pipeline_mode = #tpu.pipeline_mode<synchronous>, transform_indices = @transform_0, window_bounds = array<i64: 18, 32>}, {pipeline_mode = #tpu.pipeline_mode<synchronous>, transform_indices = @transform_1, window_bounds = array<i64: 2, 1, 32>}, {pipeline_mode = #tpu.pipeline_mode<synchronous>, transform_indices = @transform_2, window_bounds = array<i64: 2, 1, 32>}, {pipeline_mode = #tpu.pipeline_mode<synchronous>, transform_indices = @transform_3, window_bounds = array<i64: 2, 32, 160>}, {pipeline_mode = #tpu.pipeline_mode<synchronous>, transform_indices = @transform_4, window_bounds = array<i64: 2, 32, 32>}, {pipeline_mode = #tpu.pipeline_mode<synchronous>, transform_indices = @transform_5, window_bounds = array<i64: 2, 32, 128>}, {pipeline_mode = #tpu.pipeline_mode<synchronous>, transform_indices = @transform_6, window_bounds = array<i64: 2, 64, 32>}, {pipeline_mode = #tpu.pipeline_mode<synchronous>, transform_indices = @transform_7, window_bounds = array<i64: 18, 32>}, {pipeline_mode = #tpu.pipeline_mode<synchronous>, transform_indices = @transform_8, window_bounds = array<i64: 18, 32>}, {pipeline_mode = #tpu.pipeline_mode<synchronous>, transform_indices = @transform_9, window_bounds = array<i64: 18, 18>}, {pipeline_mode = #tpu.pipeline_mode<synchronous>, transform_indices = @transform_10, window_bounds = array<i64: 1, 32>}, {pipeline_mode = #tpu.pipeline_mode<synchronous>, transform_indices = @transform_11, window_bounds = array<i64: 32, 128>}, {pipeline_mode = #tpu.pipeline_mode<synchronous>, transform_indices = @transform_12, window_bounds = array<i64: 18, 1>}, {pipeline_mode = #tpu.pipeline_mode<synchronous>, transform_indices = @transform_13, window_bounds = array<i64: 18, 128>}, {pipeline_mode = #tpu.pipeline_mode<synchronous>, transform_indices = @transform_14, window_bounds = array<i64: 1, 128>}]} {
    %c0 = arith.constant 0 : index
    %c0_0 = arith.constant 0 : index
    %0 = vector.load %arg1[%c0, %c0_0] : memref<18x32xf32, #tpu.memory_space<vmem>>, vector<18x32xf32>
    %c0_1 = arith.constant 0 : index
    %c0_2 = arith.constant 0 : index
    %1 = vector.load %arg8[%c0_1, %c0_2] : memref<18x32xf32, #tpu.memory_space<vmem>>, vector<18x32xf32>
    %c0_3 = arith.constant 0 : index
    %c0_4 = arith.constant 0 : index
    %2 = vector.load %arg9[%c0_3, %c0_4] : memref<18x32xf32, #tpu.memory_space<vmem>>, vector<18x32xf32>
    %c0_5 = arith.constant 0 : index
    %c0_6 = arith.constant 0 : index
    %3 = vector.load %arg10[%c0_5, %c0_6] : memref<18x18xf32, #tpu.memory_space<vmem>>, vector<18x18xf32>
    %c0_7 = arith.constant 0 : index
    %c0_8 = arith.constant 0 : index
    %c0_9 = arith.constant 0 : index
    %4 = vector.load %arg2[%c0_7, %c0_8, %c0_9] : memref<2x1x32xf32, #tpu.memory_space<vmem>>, vector<1x1x32xf32>
    %5 = vector.shape_cast %4 : vector<1x1x32xf32> to vector<1x32xf32>
    %6 = arith.mulf %0, %0 : vector<18x32xf32>
    %cst = arith.constant dense<0.000000e+00> : vector<18xf32>
    %7 = vector.multi_reduction <add>, %6, %cst [1] : vector<18x32xf32> to vector<18xf32>
    %8 = vector.shape_cast %7 : vector<18xf32> to vector<18x1xf32>
    %cst_10 = arith.constant 3.200000e+01 : f32
    %9 = vector.broadcast %cst_10 : f32 to vector<18x1xf32>
    %10 = arith.divf %8, %9 : vector<18x1xf32>
    %cst_11 = arith.constant 9.99999997E-7 : f32
    %11 = vector.broadcast %cst_11 : f32 to vector<18x1xf32>
    %12 = arith.addf %10, %11 : vector<18x1xf32>
    %13 = math.rsqrt %12 : vector<18x1xf32>
    %14 = vector.broadcast %13 : vector<18x1xf32> to vector<18x32xf32>
    %15 = arith.mulf %0, %14 : vector<18x32xf32>
    %16 = vector.broadcast %5 : vector<1x32xf32> to vector<18x32xf32>
    %17 = arith.mulf %15, %16 : vector<18x32xf32>
    %18 = arith.truncf %17 : vector<18x32xf32> to vector<18x32xbf16>
    %c0_12 = arith.constant 0 : index
    %c0_13 = arith.constant 0 : index
    %c0_14 = arith.constant 0 : index
    %19 = vector.load %arg4[%c0_12, %c0_13, %c0_14] : memref<2x32x160xbf16, #tpu.memory_space<vmem>>, vector<1x32x160xbf16>
    %20 = vector.shape_cast %19 : vector<1x32x160xbf16> to vector<32x160xbf16>
    %cst_15 = arith.constant dense<0.000000e+00> : vector<18x160xf32>
    %21 = tpu.matmul %18, %20, %cst_15 {dimension_numbers = #tpu.dot_dimension_numbers<[1], [0], [0], [1], [0, 0, 1, 1], [], []>} : vector<18x32xbf16>, vector<32x160xbf16>, vector<18x160xf32> -> vector<18x160xf32>
    %22 = vector.extract_strided_slice %21 {offsets = [0, 0], sizes = [18, 32], strides = [1, 1]} : vector<18x160xf32> to vector<18x32xf32>
    %23 = vector.extract_strided_slice %21 {offsets = [0, 32], sizes = [18, 32], strides = [1, 1]} : vector<18x160xf32> to vector<18x32xf32>
    %24 = vector.extract_strided_slice %21 {offsets = [0, 64], sizes = [18, 32], strides = [1, 1]} : vector<18x160xf32> to vector<18x32xf32>
    %25 = vector.extract_strided_slice %21 {offsets = [0, 96], sizes = [18, 32], strides = [1, 1]} : vector<18x160xf32> to vector<18x32xf32>
    %26 = vector.extract_strided_slice %21 {offsets = [0, 128], sizes = [18, 32], strides = [1, 1]} : vector<18x160xf32> to vector<18x32xf32>
    %27 = arith.mulf %22, %1 : vector<18x32xf32>
    %28 = arith.mulf %25, %2 : vector<18x32xf32>
    %29 = arith.addf %27, %28 : vector<18x32xf32>
    %30 = arith.mulf %23, %1 : vector<18x32xf32>
    %31 = arith.mulf %26, %2 : vector<18x32xf32>
    %32 = arith.addf %30, %31 : vector<18x32xf32>
    %33 = vector.extract_strided_slice %29 {offsets = [0, 0], sizes = [18, 8], strides = [1, 1]} : vector<18x32xf32> to vector<18x8xf32>
    %34 = arith.truncf %33 : vector<18x8xf32> to vector<18x8xbf16>
    %35 = vector.extract_strided_slice %32 {offsets = [0, 0], sizes = [18, 8], strides = [1, 1]} : vector<18x32xf32> to vector<18x8xf32>
    %36 = arith.truncf %35 : vector<18x8xf32> to vector<18x8xbf16>
    %37 = vector.extract_strided_slice %24 {offsets = [0, 0], sizes = [18, 8], strides = [1, 1]} : vector<18x32xf32> to vector<18x8xf32>
    %38 = arith.truncf %37 : vector<18x8xf32> to vector<18x8xbf16>
    %cst_16 = arith.constant dense<0.000000e+00> : vector<18x18xf32>
    %39 = tpu.matmul %34, %36, %cst_16 {dimension_numbers = #tpu.dot_dimension_numbers<[1], [1], [0], [0], [0, 0, 1, 0], [], []>} : vector<18x8xbf16>, vector<18x8xbf16>, vector<18x18xf32> -> vector<18x18xf32>
    %cst_17 = arith.constant 0.353553385 : f32
    %40 = vector.broadcast %cst_17 : f32 to vector<18x18xf32>
    %41 = arith.mulf %39, %40 : vector<18x18xf32>
    %42 = arith.addf %41, %3 : vector<18x18xf32>
    %cst_18 = arith.constant dense<0xFF800000> : vector<18xf32>
    %43 = vector.multi_reduction <maximumf>, %42, %cst_18 [1] : vector<18x18xf32> to vector<18xf32>
    %44 = vector.shape_cast %43 : vector<18xf32> to vector<18x1xf32>
    %45 = vector.broadcast %44 : vector<18x1xf32> to vector<18x18xf32>
    %46 = arith.subf %42, %45 : vector<18x18xf32>
    %47 = math.exp %46 : vector<18x18xf32>
    %cst_19 = arith.constant dense<0.000000e+00> : vector<18xf32>
    %48 = vector.multi_reduction <add>, %47, %cst_19 [1] : vector<18x18xf32> to vector<18xf32>
    %49 = vector.shape_cast %48 : vector<18xf32> to vector<18x1xf32>
    %50 = tpu.reciprocal %49 {approx = true} : vector<18x1xf32> -> vector<18x1xf32>
    %51 = vector.broadcast %50 : vector<18x1xf32> to vector<18x18xf32>
    %52 = arith.mulf %47, %51 : vector<18x18xf32>
    %53 = arith.truncf %52 : vector<18x18xf32> to vector<18x18xbf16>
    %cst_20 = arith.constant dense<0.000000e+00> : vector<18x8xf32>
    %54 = tpu.matmul %53, %38, %cst_20 {dimension_numbers = #tpu.dot_dimension_numbers<[1], [0], [0], [1], [0, 0, 1, 1], [], []>} : vector<18x18xbf16>, vector<18x8xbf16>, vector<18x8xf32> -> vector<18x8xf32>
    %c0_21 = arith.constant 0 : index
    %c0_22 = arith.constant 0 : index
    %55 = vector.load %arg16[%c0_21, %c0_22] : memref<18x32xf32, #tpu.memory_space<vmem>>, vector<18x8xf32>
    tpu.vector_store %arg16[%c0_21, %c0_22], %54 {strides = array<i32>} : memref<18x32xf32, #tpu.memory_space<vmem>>, vector<18x8xf32>,
    %56 = vector.extract_strided_slice %29 {offsets = [0, 8], sizes = [18, 8], strides = [1, 1]} : vector<18x32xf32> to vector<18x8xf32>
    %57 = arith.truncf %56 : vector<18x8xf32> to vector<18x8xbf16>
    %58 = vector.extract_strided_slice %32 {offsets = [0, 8], sizes = [18, 8], strides = [1, 1]} : vector<18x32xf32> to vector<18x8xf32>
    %59 = arith.truncf %58 : vector<18x8xf32> to vector<18x8xbf16>
    %60 = vector.extract_strided_slice %24 {offsets = [0, 8], sizes = [18, 8], strides = [1, 1]} : vector<18x32xf32> to vector<18x8xf32>
    %61 = arith.truncf %60 : vector<18x8xf32> to vector<18x8xbf16>
    %cst_23 = arith.constant dense<0.000000e+00> : vector<18x18xf32>
    %62 = tpu.matmul %57, %59, %cst_23 {dimension_numbers = #tpu.dot_dimension_numbers<[1], [1], [0], [0], [0, 0, 1, 0], [], []>} : vector<18x8xbf16>, vector<18x8xbf16>, vector<18x18xf32> -> vector<18x18xf32>
    %cst_24 = arith.constant 0.353553385 : f32
    %63 = vector.broadcast %cst_24 : f32 to vector<18x18xf32>
    %64 = arith.mulf %62, %63 : vector<18x18xf32>
    %65 = arith.addf %64, %3 : vector<18x18xf32>
    %cst_25 = arith.constant dense<0xFF800000> : vector<18xf32>
    %66 = vector.multi_reduction <maximumf>, %65, %cst_25 [1] : vector<18x18xf32> to vector<18xf32>
    %67 = vector.shape_cast %66 : vector<18xf32> to vector<18x1xf32>
    %68 = vector.broadcast %67 : vector<18x1xf32> to vector<18x18xf32>
    %69 = arith.subf %65, %68 : vector<18x18xf32>
    %70 = math.exp %69 : vector<18x18xf32>
    %cst_26 = arith.constant dense<0.000000e+00> : vector<18xf32>
    %71 = vector.multi_reduction <add>, %70, %cst_26 [1] : vector<18x18xf32> to vector<18xf32>
    %72 = vector.shape_cast %71 : vector<18xf32> to vector<18x1xf32>
    %73 = tpu.reciprocal %72 {approx = true} : vector<18x1xf32> -> vector<18x1xf32>
    %74 = vector.broadcast %73 : vector<18x1xf32> to vector<18x18xf32>
    %75 = arith.mulf %70, %74 : vector<18x18xf32>
    %76 = arith.truncf %75 : vector<18x18xf32> to vector<18x18xbf16>
    %cst_27 = arith.constant dense<0.000000e+00> : vector<18x8xf32>
    %77 = tpu.matmul %76, %61, %cst_27 {dimension_numbers = #tpu.dot_dimension_numbers<[1], [0], [0], [1], [0, 0, 1, 1], [], []>} : vector<18x18xbf16>, vector<18x8xbf16>, vector<18x8xf32> -> vector<18x8xf32>
    %c0_28 = arith.constant 0 : index
    %c8 = arith.constant 8 : index
    %78 = vector.load %arg16[%c0_28, %c8] : memref<18x32xf32, #tpu.memory_space<vmem>>, vector<18x8xf32>
    tpu.vector_store %arg16[%c0_28, %c8], %77 {strides = array<i32>} : memref<18x32xf32, #tpu.memory_space<vmem>>, vector<18x8xf32>,
    %79 = vector.extract_strided_slice %29 {offsets = [0, 16], sizes = [18, 8], strides = [1, 1]} : vector<18x32xf32> to vector<18x8xf32>
    %80 = arith.truncf %79 : vector<18x8xf32> to vector<18x8xbf16>
    %81 = vector.extract_strided_slice %32 {offsets = [0, 16], sizes = [18, 8], strides = [1, 1]} : vector<18x32xf32> to vector<18x8xf32>
    %82 = arith.truncf %81 : vector<18x8xf32> to vector<18x8xbf16>
    %83 = vector.extract_strided_slice %24 {offsets = [0, 16], sizes = [18, 8], strides = [1, 1]} : vector<18x32xf32> to vector<18x8xf32>
    %84 = arith.truncf %83 : vector<18x8xf32> to vector<18x8xbf16>
    %cst_29 = arith.constant dense<0.000000e+00> : vector<18x18xf32>
    %85 = tpu.matmul %80, %82, %cst_29 {dimension_numbers = #tpu.dot_dimension_numbers<[1], [1], [0], [0], [0, 0, 1, 0], [], []>} : vector<18x8xbf16>, vector<18x8xbf16>, vector<18x18xf32> -> vector<18x18xf32>
    %cst_30 = arith.constant 0.353553385 : f32
    %86 = vector.broadcast %cst_30 : f32 to vector<18x18xf32>
    %87 = arith.mulf %85, %86 : vector<18x18xf32>
    %88 = arith.addf %87, %3 : vector<18x18xf32>
    %cst_31 = arith.constant dense<0xFF800000> : vector<18xf32>
    %89 = vector.multi_reduction <maximumf>, %88, %cst_31 [1] : vector<18x18xf32> to vector<18xf32>
    %90 = vector.shape_cast %89 : vector<18xf32> to vector<18x1xf32>
    %91 = vector.broadcast %90 : vector<18x1xf32> to vector<18x18xf32>
    %92 = arith.subf %88, %91 : vector<18x18xf32>
    %93 = math.exp %92 : vector<18x18xf32>
    %cst_32 = arith.constant dense<0.000000e+00> : vector<18xf32>
    %94 = vector.multi_reduction <add>, %93, %cst_32 [1] : vector<18x18xf32> to vector<18xf32>
    %95 = vector.shape_cast %94 : vector<18xf32> to vector<18x1xf32>
    %96 = tpu.reciprocal %95 {approx = true} : vector<18x1xf32> -> vector<18x1xf32>
    %97 = vector.broadcast %96 : vector<18x1xf32> to vector<18x18xf32>
    %98 = arith.mulf %93, %97 : vector<18x18xf32>
    %99 = arith.truncf %98 : vector<18x18xf32> to vector<18x18xbf16>
    %cst_33 = arith.constant dense<0.000000e+00> : vector<18x8xf32>
    %100 = tpu.matmul %99, %84, %cst_33 {dimension_numbers = #tpu.dot_dimension_numbers<[1], [0], [0], [1], [0, 0, 1, 1], [], []>} : vector<18x18xbf16>, vector<18x8xbf16>, vector<18x8xf32> -> vector<18x8xf32>
    %c0_34 = arith.constant 0 : index
    %c16 = arith.constant 16 : index
    %101 = vector.load %arg16[%c0_34, %c16] : memref<18x32xf32, #tpu.memory_space<vmem>>, vector<18x8xf32>
    tpu.vector_store %arg16[%c0_34, %c16], %100 {strides = array<i32>} : memref<18x32xf32, #tpu.memory_space<vmem>>, vector<18x8xf32>,
    %102 = vector.extract_strided_slice %29 {offsets = [0, 24], sizes = [18, 8], strides = [1, 1]} : vector<18x32xf32> to vector<18x8xf32>
    %103 = arith.truncf %102 : vector<18x8xf32> to vector<18x8xbf16>
    %104 = vector.extract_strided_slice %32 {offsets = [0, 24], sizes = [18, 8], strides = [1, 1]} : vector<18x32xf32> to vector<18x8xf32>
    %105 = arith.truncf %104 : vector<18x8xf32> to vector<18x8xbf16>
    %106 = vector.extract_strided_slice %24 {offsets = [0, 24], sizes = [18, 8], strides = [1, 1]} : vector<18x32xf32> to vector<18x8xf32>
    %107 = arith.truncf %106 : vector<18x8xf32> to vector<18x8xbf16>
    %cst_35 = arith.constant dense<0.000000e+00> : vector<18x18xf32>
    %108 = tpu.matmul %103, %105, %cst_35 {dimension_numbers = #tpu.dot_dimension_numbers<[1], [1], [0], [0], [0, 0, 1, 0], [], []>} : vector<18x8xbf16>, vector<18x8xbf16>, vector<18x18xf32> -> vector<18x18xf32>
    %cst_36 = arith.constant 0.353553385 : f32
    %109 = vector.broadcast %cst_36 : f32 to vector<18x18xf32>
    %110 = arith.mulf %108, %109 : vector<18x18xf32>
    %111 = arith.addf %110, %3 : vector<18x18xf32>
    %cst_37 = arith.constant dense<0xFF800000> : vector<18xf32>
    %112 = vector.multi_reduction <maximumf>, %111, %cst_37 [1] : vector<18x18xf32> to vector<18xf32>
    %113 = vector.shape_cast %112 : vector<18xf32> to vector<18x1xf32>
    %114 = vector.broadcast %113 : vector<18x1xf32> to vector<18x18xf32>
    %115 = arith.subf %111, %114 : vector<18x18xf32>
    %116 = math.exp %115 : vector<18x18xf32>
    %cst_38 = arith.constant dense<0.000000e+00> : vector<18xf32>
    %117 = vector.multi_reduction <add>, %116, %cst_38 [1] : vector<18x18xf32> to vector<18xf32>
    %118 = vector.shape_cast %117 : vector<18xf32> to vector<18x1xf32>
    %119 = tpu.reciprocal %118 {approx = true} : vector<18x1xf32> -> vector<18x1xf32>
    %120 = vector.broadcast %119 : vector<18x1xf32> to vector<18x18xf32>
    %121 = arith.mulf %116, %120 : vector<18x18xf32>
    %122 = arith.truncf %121 : vector<18x18xf32> to vector<18x18xbf16>
    %cst_39 = arith.constant dense<0.000000e+00> : vector<18x8xf32>
    %123 = tpu.matmul %122, %107, %cst_39 {dimension_numbers = #tpu.dot_dimension_numbers<[1], [0], [0], [1], [0, 0, 1, 1], [], []>} : vector<18x18xbf16>, vector<18x8xbf16>, vector<18x8xf32> -> vector<18x8xf32>
    %c0_40 = arith.constant 0 : index
    %c24 = arith.constant 24 : index
    %124 = vector.load %arg16[%c0_40, %c24] : memref<18x32xf32, #tpu.memory_space<vmem>>, vector<18x8xf32>
    tpu.vector_store %arg16[%c0_40, %c24], %123 {strides = array<i32>} : memref<18x32xf32, #tpu.memory_space<vmem>>, vector<18x8xf32>,
    %c0_41 = arith.constant 0 : index
    %c0_42 = arith.constant 0 : index
    %125 = vector.load %arg16[%c0_41, %c0_42] : memref<18x32xf32, #tpu.memory_space<vmem>>, vector<18x32xf32>
    %126 = arith.truncf %125 : vector<18x32xf32> to vector<18x32xbf16>
    %c0_43 = arith.constant 0 : index
    %c0_44 = arith.constant 0 : index
    %c0_45 = arith.constant 0 : index
    %127 = vector.load %arg5[%c0_43, %c0_44, %c0_45] : memref<2x32x32xbf16, #tpu.memory_space<vmem>>, vector<1x32x32xbf16>
    %128 = vector.shape_cast %127 : vector<1x32x32xbf16> to vector<32x32xbf16>
    %cst_46 = arith.constant dense<0.000000e+00> : vector<18x32xf32>
    %129 = tpu.matmul %126, %128, %cst_46 {dimension_numbers = #tpu.dot_dimension_numbers<[1], [0], [0], [1], [0, 0, 1, 1], [], []>} : vector<18x32xbf16>, vector<32x32xbf16>, vector<18x32xf32> -> vector<18x32xf32>
    %130 = arith.addf %0, %129 : vector<18x32xf32>
    %c0_47 = arith.constant 0 : index
    %c0_48 = arith.constant 0 : index
    %c0_49 = arith.constant 0 : index
    %131 = vector.load %arg3[%c0_47, %c0_48, %c0_49] : memref<2x1x32xf32, #tpu.memory_space<vmem>>, vector<1x1x32xf32>
    %132 = vector.shape_cast %131 : vector<1x1x32xf32> to vector<1x32xf32>
    %133 = arith.mulf %130, %130 : vector<18x32xf32>
    %cst_50 = arith.constant dense<0.000000e+00> : vector<18xf32>
    %134 = vector.multi_reduction <add>, %133, %cst_50 [1] : vector<18x32xf32> to vector<18xf32>
    %135 = vector.shape_cast %134 : vector<18xf32> to vector<18x1xf32>
    %cst_51 = arith.constant 3.200000e+01 : f32
    %136 = vector.broadcast %cst_51 : f32 to vector<18x1xf32>
    %137 = arith.divf %135, %136 : vector<18x1xf32>
    %cst_52 = arith.constant 9.99999997E-7 : f32
    %138 = vector.broadcast %cst_52 : f32 to vector<18x1xf32>
    %139 = arith.addf %137, %138 : vector<18x1xf32>
    %140 = math.rsqrt %139 : vector<18x1xf32>
    %141 = vector.broadcast %140 : vector<18x1xf32> to vector<18x32xf32>
    %142 = arith.mulf %130, %141 : vector<18x32xf32>
    %143 = vector.broadcast %132 : vector<1x32xf32> to vector<18x32xf32>
    %144 = arith.mulf %142, %143 : vector<18x32xf32>
    %145 = arith.truncf %144 : vector<18x32xf32> to vector<18x32xbf16>
    %c0_53 = arith.constant 0 : index
    %c0_54 = arith.constant 0 : index
    %c0_55 = arith.constant 0 : index
    %146 = vector.load %arg6[%c0_53, %c0_54, %c0_55] : memref<2x32x128xbf16, #tpu.memory_space<vmem>>, vector<1x32x128xbf16>
    %147 = vector.shape_cast %146 : vector<1x32x128xbf16> to vector<32x128xbf16>
    %cst_56 = arith.constant dense<0.000000e+00> : vector<18x128xf32>
    %148 = tpu.matmul %145, %147, %cst_56 {dimension_numbers = #tpu.dot_dimension_numbers<[1], [0], [0], [1], [0, 0, 1, 1], [], []>} : vector<18x32xbf16>, vector<32x128xbf16>, vector<18x128xf32> -> vector<18x128xf32>
    %149 = vector.extract_strided_slice %148 {offsets = [0, 0], sizes = [18, 64], strides = [1, 1]} : vector<18x128xf32> to vector<18x64xf32>
    %150 = vector.extract_strided_slice %148 {offsets = [0, 64], sizes = [18, 64], strides = [1, 1]} : vector<18x128xf32> to vector<18x64xf32>
    %cst_57 = arith.constant 0.000000e+00 : f32
    %151 = vector.broadcast %cst_57 : f32 to vector<18x64xf32>
    %152 = arith.subf %151, %149 : vector<18x64xf32>
    %153 = math.exp %152 : vector<18x64xf32>
    %cst_58 = arith.constant 1.000000e+00 : f32
    %154 = vector.broadcast %cst_58 : f32 to vector<18x64xf32>
    %155 = arith.addf %154, %153 : vector<18x64xf32>
    %cst_59 = arith.constant 1.000000e+00 : f32
    %156 = vector.broadcast %cst_59 : f32 to vector<18x64xf32>
    %157 = arith.divf %156, %155 : vector<18x64xf32>
    %158 = arith.mulf %149, %157 : vector<18x64xf32>
    %159 = arith.mulf %158, %150 : vector<18x64xf32>
    %160 = arith.truncf %159 : vector<18x64xf32> to vector<18x64xbf16>
    %c0_60 = arith.constant 0 : index
    %c0_61 = arith.constant 0 : index
    %c0_62 = arith.constant 0 : index
    %161 = vector.load %arg7[%c0_60, %c0_61, %c0_62] : memref<2x64x32xbf16, #tpu.memory_space<vmem>>, vector<1x64x32xbf16>
    %162 = vector.shape_cast %161 : vector<1x64x32xbf16> to vector<64x32xbf16>
    %cst_63 = arith.constant dense<0.000000e+00> : vector<18x32xf32>
    %163 = tpu.matmul %160, %162, %cst_63 {dimension_numbers = #tpu.dot_dimension_numbers<[1], [0], [0], [1], [0, 0, 1, 1], [], []>} : vector<18x64xbf16>, vector<64x32xbf16>, vector<18x32xf32> -> vector<18x32xf32>
    %164 = arith.addf %130, %163 : vector<18x32xf32>
    %c1 = arith.constant 1 : index
    %c0_64 = arith.constant 0 : index
    %c0_65 = arith.constant 0 : index
    %165 = vector.load %arg2[%c1, %c0_64, %c0_65] : memref<2x1x32xf32, #tpu.memory_space<vmem>>, vector<1x1x32xf32>
    %166 = vector.shape_cast %165 : vector<1x1x32xf32> to vector<1x32xf32>
    %167 = arith.mulf %164, %164 : vector<18x32xf32>
    %cst_66 = arith.constant dense<0.000000e+00> : vector<18xf32>
    %168 = vector.multi_reduction <add>, %167, %cst_66 [1] : vector<18x32xf32> to vector<18xf32>
    %169 = vector.shape_cast %168 : vector<18xf32> to vector<18x1xf32>
    %cst_67 = arith.constant 3.200000e+01 : f32
    %170 = vector.broadcast %cst_67 : f32 to vector<18x1xf32>
    %171 = arith.divf %169, %170 : vector<18x1xf32>
    %cst_68 = arith.constant 9.99999997E-7 : f32
    %172 = vector.broadcast %cst_68 : f32 to vector<18x1xf32>
    %173 = arith.addf %171, %172 : vector<18x1xf32>
    %174 = math.rsqrt %173 : vector<18x1xf32>
    %175 = vector.broadcast %174 : vector<18x1xf32> to vector<18x32xf32>
    %176 = arith.mulf %164, %175 : vector<18x32xf32>
    %177 = vector.broadcast %166 : vector<1x32xf32> to vector<18x32xf32>
    %178 = arith.mulf %176, %177 : vector<18x32xf32>
    %179 = arith.truncf %178 : vector<18x32xf32> to vector<18x32xbf16>
    %c1_69 = arith.constant 1 : index
    %c0_70 = arith.constant 0 : index
    %c0_71 = arith.constant 0 : index
    %180 = vector.load %arg4[%c1_69, %c0_70, %c0_71] : memref<2x32x160xbf16, #tpu.memory_space<vmem>>, vector<1x32x160xbf16>
    %181 = vector.shape_cast %180 : vector<1x32x160xbf16> to vector<32x160xbf16>
    %cst_72 = arith.constant dense<0.000000e+00> : vector<18x160xf32>
    %182 = tpu.matmul %179, %181, %cst_72 {dimension_numbers = #tpu.dot_dimension_numbers<[1], [0], [0], [1], [0, 0, 1, 1], [], []>} : vector<18x32xbf16>, vector<32x160xbf16>, vector<18x160xf32> -> vector<18x160xf32>
    %183 = vector.extract_strided_slice %182 {offsets = [0, 0], sizes = [18, 32], strides = [1, 1]} : vector<18x160xf32> to vector<18x32xf32>
    %184 = vector.extract_strided_slice %182 {offsets = [0, 32], sizes = [18, 32], strides = [1, 1]} : vector<18x160xf32> to vector<18x32xf32>
    %185 = vector.extract_strided_slice %182 {offsets = [0, 64], sizes = [18, 32], strides = [1, 1]} : vector<18x160xf32> to vector<18x32xf32>
    %186 = vector.extract_strided_slice %182 {offsets = [0, 96], sizes = [18, 32], strides = [1, 1]} : vector<18x160xf32> to vector<18x32xf32>
    %187 = vector.extract_strided_slice %182 {offsets = [0, 128], sizes = [18, 32], strides = [1, 1]} : vector<18x160xf32> to vector<18x32xf32>
    %188 = arith.mulf %183, %1 : vector<18x32xf32>
    %189 = arith.mulf %186, %2 : vector<18x32xf32>
    %190 = arith.addf %188, %189 : vector<18x32xf32>
    %191 = arith.mulf %184, %1 : vector<18x32xf32>
    %192 = arith.mulf %187, %2 : vector<18x32xf32>
    %193 = arith.addf %191, %192 : vector<18x32xf32>
    %194 = vector.extract_strided_slice %190 {offsets = [0, 0], sizes = [18, 8], strides = [1, 1]} : vector<18x32xf32> to vector<18x8xf32>
    %195 = arith.truncf %194 : vector<18x8xf32> to vector<18x8xbf16>
    %196 = vector.extract_strided_slice %193 {offsets = [0, 0], sizes = [18, 8], strides = [1, 1]} : vector<18x32xf32> to vector<18x8xf32>
    %197 = arith.truncf %196 : vector<18x8xf32> to vector<18x8xbf16>
    %198 = vector.extract_strided_slice %185 {offsets = [0, 0], sizes = [18, 8], strides = [1, 1]} : vector<18x32xf32> to vector<18x8xf32>
    %199 = arith.truncf %198 : vector<18x8xf32> to vector<18x8xbf16>
    %cst_73 = arith.constant dense<0.000000e+00> : vector<18x18xf32>
    %200 = tpu.matmul %195, %197, %cst_73 {dimension_numbers = #tpu.dot_dimension_numbers<[1], [1], [0], [0], [0, 0, 1, 0], [], []>} : vector<18x8xbf16>, vector<18x8xbf16>, vector<18x18xf32> -> vector<18x18xf32>
    %cst_74 = arith.constant 0.353553385 : f32
    %201 = vector.broadcast %cst_74 : f32 to vector<18x18xf32>
    %202 = arith.mulf %200, %201 : vector<18x18xf32>
    %203 = arith.addf %202, %3 : vector<18x18xf32>
    %cst_75 = arith.constant dense<0xFF800000> : vector<18xf32>
    %204 = vector.multi_reduction <maximumf>, %203, %cst_75 [1] : vector<18x18xf32> to vector<18xf32>
    %205 = vector.shape_cast %204 : vector<18xf32> to vector<18x1xf32>
    %206 = vector.broadcast %205 : vector<18x1xf32> to vector<18x18xf32>
    %207 = arith.subf %203, %206 : vector<18x18xf32>
    %208 = math.exp %207 : vector<18x18xf32>
    %cst_76 = arith.constant dense<0.000000e+00> : vector<18xf32>
    %209 = vector.multi_reduction <add>, %208, %cst_76 [1] : vector<18x18xf32> to vector<18xf32>
    %210 = vector.shape_cast %209 : vector<18xf32> to vector<18x1xf32>
    %211 = tpu.reciprocal %210 {approx = true} : vector<18x1xf32> -> vector<18x1xf32>
    %212 = vector.broadcast %211 : vector<18x1xf32> to vector<18x18xf32>
    %213 = arith.mulf %208, %212 : vector<18x18xf32>
    %214 = arith.truncf %213 : vector<18x18xf32> to vector<18x18xbf16>
    %cst_77 = arith.constant dense<0.000000e+00> : vector<18x8xf32>
    %215 = tpu.matmul %214, %199, %cst_77 {dimension_numbers = #tpu.dot_dimension_numbers<[1], [0], [0], [1], [0, 0, 1, 1], [], []>} : vector<18x18xbf16>, vector<18x8xbf16>, vector<18x8xf32> -> vector<18x8xf32>
    %c0_78 = arith.constant 0 : index
    %c0_79 = arith.constant 0 : index
    %216 = vector.load %arg16[%c0_78, %c0_79] : memref<18x32xf32, #tpu.memory_space<vmem>>, vector<18x8xf32>
    tpu.vector_store %arg16[%c0_78, %c0_79], %215 {strides = array<i32>} : memref<18x32xf32, #tpu.memory_space<vmem>>, vector<18x8xf32>,
    %217 = vector.extract_strided_slice %190 {offsets = [0, 8], sizes = [18, 8], strides = [1, 1]} : vector<18x32xf32> to vector<18x8xf32>
    %218 = arith.truncf %217 : vector<18x8xf32> to vector<18x8xbf16>
    %219 = vector.extract_strided_slice %193 {offsets = [0, 8], sizes = [18, 8], strides = [1, 1]} : vector<18x32xf32> to vector<18x8xf32>
    %220 = arith.truncf %219 : vector<18x8xf32> to vector<18x8xbf16>
    %221 = vector.extract_strided_slice %185 {offsets = [0, 8], sizes = [18, 8], strides = [1, 1]} : vector<18x32xf32> to vector<18x8xf32>
    %222 = arith.truncf %221 : vector<18x8xf32> to vector<18x8xbf16>
    %cst_80 = arith.constant dense<0.000000e+00> : vector<18x18xf32>
    %223 = tpu.matmul %218, %220, %cst_80 {dimension_numbers = #tpu.dot_dimension_numbers<[1], [1], [0], [0], [0, 0, 1, 0], [], []>} : vector<18x8xbf16>, vector<18x8xbf16>, vector<18x18xf32> -> vector<18x18xf32>
    %cst_81 = arith.constant 0.353553385 : f32
    %224 = vector.broadcast %cst_81 : f32 to vector<18x18xf32>
    %225 = arith.mulf %223, %224 : vector<18x18xf32>
    %226 = arith.addf %225, %3 : vector<18x18xf32>
    %cst_82 = arith.constant dense<0xFF800000> : vector<18xf32>
    %227 = vector.multi_reduction <maximumf>, %226, %cst_82 [1] : vector<18x18xf32> to vector<18xf32>
    %228 = vector.shape_cast %227 : vector<18xf32> to vector<18x1xf32>
    %229 = vector.broadcast %228 : vector<18x1xf32> to vector<18x18xf32>
    %230 = arith.subf %226, %229 : vector<18x18xf32>
    %231 = math.exp %230 : vector<18x18xf32>
    %cst_83 = arith.constant dense<0.000000e+00> : vector<18xf32>
    %232 = vector.multi_reduction <add>, %231, %cst_83 [1] : vector<18x18xf32> to vector<18xf32>
    %233 = vector.shape_cast %232 : vector<18xf32> to vector<18x1xf32>
    %234 = tpu.reciprocal %233 {approx = true} : vector<18x1xf32> -> vector<18x1xf32>
    %235 = vector.broadcast %234 : vector<18x1xf32> to vector<18x18xf32>
    %236 = arith.mulf %231, %235 : vector<18x18xf32>
    %237 = arith.truncf %236 : vector<18x18xf32> to vector<18x18xbf16>
    %cst_84 = arith.constant dense<0.000000e+00> : vector<18x8xf32>
    %238 = tpu.matmul %237, %222, %cst_84 {dimension_numbers = #tpu.dot_dimension_numbers<[1], [0], [0], [1], [0, 0, 1, 1], [], []>} : vector<18x18xbf16>, vector<18x8xbf16>, vector<18x8xf32> -> vector<18x8xf32>
    %c0_85 = arith.constant 0 : index
    %c8_86 = arith.constant 8 : index
    %239 = vector.load %arg16[%c0_85, %c8_86] : memref<18x32xf32, #tpu.memory_space<vmem>>, vector<18x8xf32>
    tpu.vector_store %arg16[%c0_85, %c8_86], %238 {strides = array<i32>} : memref<18x32xf32, #tpu.memory_space<vmem>>, vector<18x8xf32>,
    %240 = vector.extract_strided_slice %190 {offsets = [0, 16], sizes = [18, 8], strides = [1, 1]} : vector<18x32xf32> to vector<18x8xf32>
    %241 = arith.truncf %240 : vector<18x8xf32> to vector<18x8xbf16>
    %242 = vector.extract_strided_slice %193 {offsets = [0, 16], sizes = [18, 8], strides = [1, 1]} : vector<18x32xf32> to vector<18x8xf32>
    %243 = arith.truncf %242 : vector<18x8xf32> to vector<18x8xbf16>
    %244 = vector.extract_strided_slice %185 {offsets = [0, 16], sizes = [18, 8], strides = [1, 1]} : vector<18x32xf32> to vector<18x8xf32>
    %245 = arith.truncf %244 : vector<18x8xf32> to vector<18x8xbf16>
    %cst_87 = arith.constant dense<0.000000e+00> : vector<18x18xf32>
    %246 = tpu.matmul %241, %243, %cst_87 {dimension_numbers = #tpu.dot_dimension_numbers<[1], [1], [0], [0], [0, 0, 1, 0], [], []>} : vector<18x8xbf16>, vector<18x8xbf16>, vector<18x18xf32> -> vector<18x18xf32>
    %cst_88 = arith.constant 0.353553385 : f32
    %247 = vector.broadcast %cst_88 : f32 to vector<18x18xf32>
    %248 = arith.mulf %246, %247 : vector<18x18xf32>
    %249 = arith.addf %248, %3 : vector<18x18xf32>
    %cst_89 = arith.constant dense<0xFF800000> : vector<18xf32>
    %250 = vector.multi_reduction <maximumf>, %249, %cst_89 [1] : vector<18x18xf32> to vector<18xf32>
    %251 = vector.shape_cast %250 : vector<18xf32> to vector<18x1xf32>
    %252 = vector.broadcast %251 : vector<18x1xf32> to vector<18x18xf32>
    %253 = arith.subf %249, %252 : vector<18x18xf32>
    %254 = math.exp %253 : vector<18x18xf32>
    %cst_90 = arith.constant dense<0.000000e+00> : vector<18xf32>
    %255 = vector.multi_reduction <add>, %254, %cst_90 [1] : vector<18x18xf32> to vector<18xf32>
    %256 = vector.shape_cast %255 : vector<18xf32> to vector<18x1xf32>
    %257 = tpu.reciprocal %256 {approx = true} : vector<18x1xf32> -> vector<18x1xf32>
    %258 = vector.broadcast %257 : vector<18x1xf32> to vector<18x18xf32>
    %259 = arith.mulf %254, %258 : vector<18x18xf32>
    %260 = arith.truncf %259 : vector<18x18xf32> to vector<18x18xbf16>
    %cst_91 = arith.constant dense<0.000000e+00> : vector<18x8xf32>
    %261 = tpu.matmul %260, %245, %cst_91 {dimension_numbers = #tpu.dot_dimension_numbers<[1], [0], [0], [1], [0, 0, 1, 1], [], []>} : vector<18x18xbf16>, vector<18x8xbf16>, vector<18x8xf32> -> vector<18x8xf32>
    %c0_92 = arith.constant 0 : index
    %c16_93 = arith.constant 16 : index
    %262 = vector.load %arg16[%c0_92, %c16_93] : memref<18x32xf32, #tpu.memory_space<vmem>>, vector<18x8xf32>
    tpu.vector_store %arg16[%c0_92, %c16_93], %261 {strides = array<i32>} : memref<18x32xf32, #tpu.memory_space<vmem>>, vector<18x8xf32>,
    %263 = vector.extract_strided_slice %190 {offsets = [0, 24], sizes = [18, 8], strides = [1, 1]} : vector<18x32xf32> to vector<18x8xf32>
    %264 = arith.truncf %263 : vector<18x8xf32> to vector<18x8xbf16>
    %265 = vector.extract_strided_slice %193 {offsets = [0, 24], sizes = [18, 8], strides = [1, 1]} : vector<18x32xf32> to vector<18x8xf32>
    %266 = arith.truncf %265 : vector<18x8xf32> to vector<18x8xbf16>
    %267 = vector.extract_strided_slice %185 {offsets = [0, 24], sizes = [18, 8], strides = [1, 1]} : vector<18x32xf32> to vector<18x8xf32>
    %268 = arith.truncf %267 : vector<18x8xf32> to vector<18x8xbf16>
    %cst_94 = arith.constant dense<0.000000e+00> : vector<18x18xf32>
    %269 = tpu.matmul %264, %266, %cst_94 {dimension_numbers = #tpu.dot_dimension_numbers<[1], [1], [0], [0], [0, 0, 1, 0], [], []>} : vector<18x8xbf16>, vector<18x8xbf16>, vector<18x18xf32> -> vector<18x18xf32>
    %cst_95 = arith.constant 0.353553385 : f32
    %270 = vector.broadcast %cst_95 : f32 to vector<18x18xf32>
    %271 = arith.mulf %269, %270 : vector<18x18xf32>
    %272 = arith.addf %271, %3 : vector<18x18xf32>
    %cst_96 = arith.constant dense<0xFF800000> : vector<18xf32>
    %273 = vector.multi_reduction <maximumf>, %272, %cst_96 [1] : vector<18x18xf32> to vector<18xf32>
    %274 = vector.shape_cast %273 : vector<18xf32> to vector<18x1xf32>
    %275 = vector.broadcast %274 : vector<18x1xf32> to vector<18x18xf32>
    %276 = arith.subf %272, %275 : vector<18x18xf32>
    %277 = math.exp %276 : vector<18x18xf32>
    %cst_97 = arith.constant dense<0.000000e+00> : vector<18xf32>
    %278 = vector.multi_reduction <add>, %277, %cst_97 [1] : vector<18x18xf32> to vector<18xf32>
    %279 = vector.shape_cast %278 : vector<18xf32> to vector<18x1xf32>
    %280 = tpu.reciprocal %279 {approx = true} : vector<18x1xf32> -> vector<18x1xf32>
    %281 = vector.broadcast %280 : vector<18x1xf32> to vector<18x18xf32>
    %282 = arith.mulf %277, %281 : vector<18x18xf32>
    %283 = arith.truncf %282 : vector<18x18xf32> to vector<18x18xbf16>
    %cst_98 = arith.constant dense<0.000000e+00> : vector<18x8xf32>
    %284 = tpu.matmul %283, %268, %cst_98 {dimension_numbers = #tpu.dot_dimension_numbers<[1], [0], [0], [1], [0, 0, 1, 1], [], []>} : vector<18x18xbf16>, vector<18x8xbf16>, vector<18x8xf32> -> vector<18x8xf32>
    %c0_99 = arith.constant 0 : index
    %c24_100 = arith.constant 24 : index
    %285 = vector.load %arg16[%c0_99, %c24_100] : memref<18x32xf32, #tpu.memory_space<vmem>>, vector<18x8xf32>
    tpu.vector_store %arg16[%c0_99, %c24_100], %284 {strides = array<i32>} : memref<18x32xf32, #tpu.memory_space<vmem>>, vector<18x8xf32>,
    %c0_101 = arith.constant 0 : index
    %c0_102 = arith.constant 0 : index
    %286 = vector.load %arg16[%c0_101, %c0_102] : memref<18x32xf32, #tpu.memory_space<vmem>>, vector<18x32xf32>
    %287 = arith.truncf %286 : vector<18x32xf32> to vector<18x32xbf16>
    %c1_103 = arith.constant 1 : index
    %c0_104 = arith.constant 0 : index
    %c0_105 = arith.constant 0 : index
    %288 = vector.load %arg5[%c1_103, %c0_104, %c0_105] : memref<2x32x32xbf16, #tpu.memory_space<vmem>>, vector<1x32x32xbf16>
    %289 = vector.shape_cast %288 : vector<1x32x32xbf16> to vector<32x32xbf16>
    %cst_106 = arith.constant dense<0.000000e+00> : vector<18x32xf32>
    %290 = tpu.matmul %287, %289, %cst_106 {dimension_numbers = #tpu.dot_dimension_numbers<[1], [0], [0], [1], [0, 0, 1, 1], [], []>} : vector<18x32xbf16>, vector<32x32xbf16>, vector<18x32xf32> -> vector<18x32xf32>
    %291 = arith.addf %164, %290 : vector<18x32xf32>
    %c1_107 = arith.constant 1 : index
    %c0_108 = arith.constant 0 : index
    %c0_109 = arith.constant 0 : index
    %292 = vector.load %arg3[%c1_107, %c0_108, %c0_109] : memref<2x1x32xf32, #tpu.memory_space<vmem>>, vector<1x1x32xf32>
    %293 = vector.shape_cast %292 : vector<1x1x32xf32> to vector<1x32xf32>
    %294 = arith.mulf %291, %291 : vector<18x32xf32>
    %cst_110 = arith.constant dense<0.000000e+00> : vector<18xf32>
    %295 = vector.multi_reduction <add>, %294, %cst_110 [1] : vector<18x32xf32> to vector<18xf32>
    %296 = vector.shape_cast %295 : vector<18xf32> to vector<18x1xf32>
    %cst_111 = arith.constant 3.200000e+01 : f32
    %297 = vector.broadcast %cst_111 : f32 to vector<18x1xf32>
    %298 = arith.divf %296, %297 : vector<18x1xf32>
    %cst_112 = arith.constant 9.99999997E-7 : f32
    %299 = vector.broadcast %cst_112 : f32 to vector<18x1xf32>
    %300 = arith.addf %298, %299 : vector<18x1xf32>
    %301 = math.rsqrt %300 : vector<18x1xf32>
    %302 = vector.broadcast %301 : vector<18x1xf32> to vector<18x32xf32>
    %303 = arith.mulf %291, %302 : vector<18x32xf32>
    %304 = vector.broadcast %293 : vector<1x32xf32> to vector<18x32xf32>
    %305 = arith.mulf %303, %304 : vector<18x32xf32>
    %306 = arith.truncf %305 : vector<18x32xf32> to vector<18x32xbf16>
    %c1_113 = arith.constant 1 : index
    %c0_114 = arith.constant 0 : index
    %c0_115 = arith.constant 0 : index
    %307 = vector.load %arg6[%c1_113, %c0_114, %c0_115] : memref<2x32x128xbf16, #tpu.memory_space<vmem>>, vector<1x32x128xbf16>
    %308 = vector.shape_cast %307 : vector<1x32x128xbf16> to vector<32x128xbf16>
    %cst_116 = arith.constant dense<0.000000e+00> : vector<18x128xf32>
    %309 = tpu.matmul %306, %308, %cst_116 {dimension_numbers = #tpu.dot_dimension_numbers<[1], [0], [0], [1], [0, 0, 1, 1], [], []>} : vector<18x32xbf16>, vector<32x128xbf16>, vector<18x128xf32> -> vector<18x128xf32>
    %310 = vector.extract_strided_slice %309 {offsets = [0, 0], sizes = [18, 64], strides = [1, 1]} : vector<18x128xf32> to vector<18x64xf32>
    %311 = vector.extract_strided_slice %309 {offsets = [0, 64], sizes = [18, 64], strides = [1, 1]} : vector<18x128xf32> to vector<18x64xf32>
    %cst_117 = arith.constant 0.000000e+00 : f32
    %312 = vector.broadcast %cst_117 : f32 to vector<18x64xf32>
    %313 = arith.subf %312, %310 : vector<18x64xf32>
    %314 = math.exp %313 : vector<18x64xf32>
    %cst_118 = arith.constant 1.000000e+00 : f32
    %315 = vector.broadcast %cst_118 : f32 to vector<18x64xf32>
    %316 = arith.addf %315, %314 : vector<18x64xf32>
    %cst_119 = arith.constant 1.000000e+00 : f32
    %317 = vector.broadcast %cst_119 : f32 to vector<18x64xf32>
    %318 = arith.divf %317, %316 : vector<18x64xf32>
    %319 = arith.mulf %310, %318 : vector<18x64xf32>
    %320 = arith.mulf %319, %311 : vector<18x64xf32>
    %321 = arith.truncf %320 : vector<18x64xf32> to vector<18x64xbf16>
    %c1_120 = arith.constant 1 : index
    %c0_121 = arith.constant 0 : index
    %c0_122 = arith.constant 0 : index
    %322 = vector.load %arg7[%c1_120, %c0_121, %c0_122] : memref<2x64x32xbf16, #tpu.memory_space<vmem>>, vector<1x64x32xbf16>
    %323 = vector.shape_cast %322 : vector<1x64x32xbf16> to vector<64x32xbf16>
    %cst_123 = arith.constant dense<0.000000e+00> : vector<18x32xf32>
    %324 = tpu.matmul %321, %323, %cst_123 {dimension_numbers = #tpu.dot_dimension_numbers<[1], [0], [0], [1], [0, 0, 1, 1], [], []>} : vector<18x64xbf16>, vector<64x32xbf16>, vector<18x32xf32> -> vector<18x32xf32>
    %325 = arith.addf %291, %324 : vector<18x32xf32>
    %c0_124 = arith.constant 0 : index
    %c0_125 = arith.constant 0 : index
    %326 = vector.load %arg11[%c0_124, %c0_125] : memref<1x32xf32, #tpu.memory_space<vmem>>, vector<1x32xf32>
    %327 = arith.mulf %325, %325 : vector<18x32xf32>
    %cst_126 = arith.constant dense<0.000000e+00> : vector<18xf32>
    %328 = vector.multi_reduction <add>, %327, %cst_126 [1] : vector<18x32xf32> to vector<18xf32>
    %329 = vector.shape_cast %328 : vector<18xf32> to vector<18x1xf32>
    %cst_127 = arith.constant 3.200000e+01 : f32
    %330 = vector.broadcast %cst_127 : f32 to vector<18x1xf32>
    %331 = arith.divf %329, %330 : vector<18x1xf32>
    %cst_128 = arith.constant 9.99999997E-7 : f32
    %332 = vector.broadcast %cst_128 : f32 to vector<18x1xf32>
    %333 = arith.addf %331, %332 : vector<18x1xf32>
    %334 = math.rsqrt %333 : vector<18x1xf32>
    %335 = vector.broadcast %334 : vector<18x1xf32> to vector<18x32xf32>
    %336 = arith.mulf %325, %335 : vector<18x32xf32>
    %337 = vector.broadcast %326 : vector<1x32xf32> to vector<18x32xf32>
    %338 = arith.mulf %336, %337 : vector<18x32xf32>
    %339 = arith.truncf %338 : vector<18x32xf32> to vector<18x32xbf16>
    %c0_129 = arith.constant 0 : index
    %c0_130 = arith.constant 0 : index
    %340 = vector.load %arg12[%c0_129, %c0_130] : memref<32x128xbf16, #tpu.memory_space<vmem>>, vector<32x128xbf16>
    %cst_131 = arith.constant dense<0.000000e+00> : vector<18x128xf32>
    %341 = tpu.matmul %339, %340, %cst_131 {dimension_numbers = #tpu.dot_dimension_numbers<[1], [0], [0], [1], [0, 0, 1, 1], [], []>} : vector<18x32xbf16>, vector<32x128xbf16>, vector<18x128xf32> -> vector<18x128xf32>
    %c0_132 = arith.constant 0 : index
    %c0_133 = arith.constant 0 : index
    %342 = vector.load %arg14[%c0_132, %c0_133] : memref<18x128xf32, #tpu.memory_space<vmem>>, vector<18x128xf32>
    tpu.vector_store %arg14[%c0_132, %c0_133], %341 {strides = array<i32>} : memref<18x128xf32, #tpu.memory_space<vmem>>, vector<18x128xf32>,
    %343 = tpu.iota {dimensions = array<i32: 1>} : vector<18x128xi32>
    %c64_i32 = arith.constant 64 : i32
    %344 = vector.broadcast %c64_i32 : i32 to vector<18x128xi32>
    %345 = arith.cmpi slt, %343, %344 : vector<18x128xi32>
    %cst_134 = arith.constant -1.000000e+30 : f32
    %346 = vector.broadcast %cst_134 : f32 to vector<18x128xf32>
    %347 = arith.select %345, %341, %346 : vector<18x128xi1>, vector<18x128xf32>
    %cst_135 = arith.constant dense<0xFF800000> : vector<18xf32>
    %348 = vector.multi_reduction <maximumf>, %347, %cst_135 [1] : vector<18x128xf32> to vector<18xf32>
    %349 = vector.shape_cast %348 : vector<18xf32> to vector<18x1xf32>
    %350 = vector.broadcast %349 : vector<18x1xf32> to vector<18x128xf32>
    %351 = arith.subf %347, %350 : vector<18x128xf32>
    %352 = math.exp %351 : vector<18x128xf32>
    %cst_136 = arith.constant dense<0.000000e+00> : vector<18xf32>
    %353 = vector.multi_reduction <add>, %352, %cst_136 [1] : vector<18x128xf32> to vector<18xf32>
    %354 = vector.shape_cast %353 : vector<18xf32> to vector<18x1xf32>
    %355 = math.log %354 : vector<18x1xf32>
    %356 = arith.addf %355, %349 : vector<18x1xf32>
    %c0_137 = arith.constant 0 : index
    %c0_138 = arith.constant 0 : index
    %357 = vector.load %arg13[%c0_137, %c0_138] : memref<18x1xi32, #tpu.memory_space<vmem>>, vector<18x1xi32>
    %358 = vector.broadcast %357 : vector<18x1xi32> to vector<18x128xi32>
    %359 = arith.cmpi eq, %343, %358 : vector<18x128xi32>
    %cst_139 = arith.constant 0.000000e+00 : f32
    %360 = vector.broadcast %cst_139 : f32 to vector<18x128xf32>
    %361 = arith.select %359, %341, %360 : vector<18x128xi1>, vector<18x128xf32>
    %cst_140 = arith.constant dense<0.000000e+00> : vector<18xf32>
    %362 = vector.multi_reduction <add>, %361, %cst_140 [1] : vector<18x128xf32> to vector<18xf32>
    %363 = vector.shape_cast %362 : vector<18xf32> to vector<18x1xf32>
    %364 = arith.subf %356, %363 : vector<18x1xf32>
    %c-100_i32 = arith.constant -100 : i32
    %365 = vector.broadcast %c-100_i32 : i32 to vector<18x1xi32>
    %366 = arith.cmpi ne, %357, %365 : vector<18x1xi32>
    %367 = arith.extui %366 : vector<18x1xi1> to vector<18x1xi32>
    %368 = arith.sitofp %367 : vector<18x1xi32> to vector<18x1xf32>
    %369 = arith.mulf %364, %368 : vector<18x1xf32>
    %cst_141 = arith.constant dense<0.000000e+00> : vector<1xf32>
    %370 = vector.multi_reduction <add>, %369, %cst_141 [0] : vector<18x1xf32> to vector<1xf32>
    %371 = vector.shape_cast %370 : vector<1xf32> to vector<1x1xf32>
    %cst_142 = arith.constant dense<0.000000e+00> : vector<1xf32>
    %372 = vector.multi_reduction <add>, %368, %cst_142 [0] : vector<18x1xf32> to vector<1xf32>
    %373 = vector.shape_cast %372 : vector<1xf32> to vector<1x1xf32>
    %374 = tpu.iota {dimensions = array<i32: 1>} : vector<1x128xi32>
    %c0_i32 = arith.constant 0 : i32
    %375 = vector.broadcast %c0_i32 : i32 to vector<1x128xi32>
    %376 = arith.cmpi eq, %374, %375 : vector<1x128xi32>
    %cst_143 = arith.constant 0.000000e+00 : f32
    %377 = vector.shape_cast %371 : vector<1x1xf32> to vector<1x1xf32>
    %378 = vector.broadcast %377 : vector<1x1xf32> to vector<1x128xf32>
    %379 = vector.broadcast %cst_143 : f32 to vector<1x128xf32>
    %380 = arith.select %376, %378, %379 : vector<1x128xi1>, vector<1x128xf32>
    %c1_i32 = arith.constant 1 : i32
    %381 = vector.broadcast %c1_i32 : i32 to vector<1x128xi32>
    %382 = arith.cmpi eq, %374, %381 : vector<1x128xi32>
    %cst_144 = arith.constant 0.000000e+00 : f32
    %383 = vector.shape_cast %373 : vector<1x1xf32> to vector<1x1xf32>
    %384 = vector.broadcast %383 : vector<1x1xf32> to vector<1x128xf32>
    %385 = vector.broadcast %cst_144 : f32 to vector<1x128xf32>
    %386 = arith.select %382, %384, %385 : vector<1x128xi1>, vector<1x128xf32>
    %387 = arith.addf %380, %386 : vector<1x128xf32>
    %c0_145 = arith.constant 0 : index
    %c0_146 = arith.constant 0 : index
    %388 = vector.load %arg15[%c0_145, %c0_146] : memref<1x128xf32, #tpu.memory_space<vmem>>, vector<1x128xf32>
    tpu.vector_store %arg15[%c0_145, %c0_146], %387 {strides = array<i32>} : memref<1x128xf32, #tpu.memory_space<vmem>>, vector<1x128xf32>,
    return
  }
  func.func @transform_0(%arg0: i32) -> (i32, i32) {
    %c0_i32 = arith.constant 0 : i32
    %c0_i32_0 = arith.constant 0 : i32
    %c0_i32_1 = arith.constant 0 : i32
    return %c0_i32, %c0_i32_0 : i32, i32
  }
  func.func @transform_1(%arg0: i32) -> (i32, i32, i32) {
    %c0_i32 = arith.constant 0 : i32
    %c0_i32_0 = arith.constant 0 : i32
    %c0_i32_1 = arith.constant 0 : i32
    %c0_i32_2 = arith.constant 0 : i32
    return %c0_i32, %c0_i32_0, %c0_i32_1 : i32, i32, i32
  }
  func.func @transform_2(%arg0: i32) -> (i32, i32, i32) {
    %c0_i32 = arith.constant 0 : i32
    %c0_i32_0 = arith.constant 0 : i32
    %c0_i32_1 = arith.constant 0 : i32
    %c0_i32_2 = arith.constant 0 : i32
    return %c0_i32, %c0_i32_0, %c0_i32_1 : i32, i32, i32
  }
  func.func @transform_3(%arg0: i32) -> (i32, i32, i32) {
    %c0_i32 = arith.constant 0 : i32
    %c0_i32_0 = arith.constant 0 : i32
    %c0_i32_1 = arith.constant 0 : i32
    %c0_i32_2 = arith.constant 0 : i32
    return %c0_i32, %c0_i32_0, %c0_i32_1 : i32, i32, i32
  }
  func.func @transform_4(%arg0: i32) -> (i32, i32, i32) {
    %c0_i32 = arith.constant 0 : i32
    %c0_i32_0 = arith.constant 0 : i32
    %c0_i32_1 = arith.constant 0 : i32
    %c0_i32_2 = arith.constant 0 : i32
    return %c0_i32, %c0_i32_0, %c0_i32_1 : i32, i32, i32
  }
  func.func @transform_5(%arg0: i32) -> (i32, i32, i32) {
    %c0_i32 = arith.constant 0 : i32
    %c0_i32_0 = arith.constant 0 : i32
    %c0_i32_1 = arith.constant 0 : i32
    %c0_i32_2 = arith.constant 0 : i32
    return %c0_i32, %c0_i32_0, %c0_i32_1 : i32, i32, i32
  }
  func.func @transform_6(%arg0: i32) -> (i32, i32, i32) {
    %c0_i32 = arith.constant 0 : i32
    %c0_i32_0 = arith.constant 0 : i32
    %c0_i32_1 = arith.constant 0 : i32
    %c0_i32_2 = arith.constant 0 : i32
    return %c0_i32, %c0_i32_0, %c0_i32_1 : i32, i32, i32
  }
  func.func @transform_7(%arg0: i32) -> (i32, i32) {
    %c0_i32 = arith.constant 0 : i32
    %c0_i32_0 = arith.constant 0 : i32
    %c0_i32_1 = arith.constant 0 : i32
    return %c0_i32, %c0_i32_0 : i32, i32
  }
  func.func @transform_8(%arg0: i32) -> (i32, i32) {
    %c0_i32 = arith.constant 0 : i32
    %c0_i32_0 = arith.constant 0 : i32
    %c0_i32_1 = arith.constant 0 : i32
    return %c0_i32, %c0_i32_0 : i32, i32
  }
  func.func @transform_9(%arg0: i32) -> (i32, i32) {
    %c0_i32 = arith.constant 0 : i32
    %c0_i32_0 = arith.constant 0 : i32
    %c0_i32_1 = arith.constant 0 : i32
    return %c0_i32, %c0_i32_0 : i32, i32
  }
  func.func @transform_10(%arg0: i32) -> (i32, i32) {
    %c0_i32 = arith.constant 0 : i32
    %c0_i32_0 = arith.constant 0 : i32
    %c0_i32_1 = arith.constant 0 : i32
    return %c0_i32, %c0_i32_0 : i32, i32
  }
  func.func @transform_11(%arg0: i32) -> (i32, i32) {
    %c0_i32 = arith.constant 0 : i32
    %c0_i32_0 = arith.constant 0 : i32
    %c0_i32_1 = arith.constant 0 : i32
    return %c0_i32, %c0_i32_0 : i32, i32
  }
  func.func @transform_12(%arg0: i32) -> (i32, i32) {
    %c0_i32 = arith.constant 0 : i32
    %c0_i32_0 = arith.constant 0 : i32
    %c0_i32_1 = arith.constant 0 : i32
    return %c0_i32, %c0_i32_0 : i32, i32
  }
  func.func @transform_13(%arg0: i32) -> (i32, i32) {
    %c0_i32 = arith.constant 0 : i32
    %c0_i32_0 = arith.constant 0 : i32
    %c0_i32_1 = arith.constant 0 : i32
    return %c0_i32, %c0_i32_0 : i32, i32
  }
  func.func @transform_14(%arg0: i32) -> (i32, i32) {
    %c0_i32 = arith.constant 0 : i32
    %c0_i32_0 = arith.constant 0 : i32
    %c0_i32_1 = arith.constant 0 : i32
    return %c0_i32, %c0_i32_0 : i32, i32
  }
}

</mosaic_0001>

<bundles_post_ra>
// kernel: tile.35
= control target key start
LH: loop header
LB: loop body
LE: loop exit
PB: predicated region body
PF: predicated region fallthrough
CT: control target
= control target key end

     0   :  { %vm3_vm0 = vcmask 261120   ;;  %s6_s6 = smov 3  ;;  %s48_s0 = inlined_call_operand.vmem [shape: f32[2,9,32], index: 0, kind: input, shape index: {}]   ;;  %s49_s1 = inlined_call_operand.vmem [shape: f32[18,32], index: 1, kind: output, shape index: {}]  }
   0x1   :  { %v2_v0 = vld [vmem:[%s48_s0] sm:$0xff]   ;;  %v18_v2 = vld [vmem:[%s48_s0 + $0x11] sm:$0xff]  }
   0x2   :  { %v16_v1 = vld [vmem:[%s48_s0 + $0x8] ss:$8 sm:%s6_s6]   ;;  %4 = vst.msk [vmem:[%s49_s1] sm:$0xff] %vm3_vm0, %v2_v0   ;;  %19 = vst.msk [vmem:[%s49_s1 + $0xa] sm:$0xff] %vm3_vm0, %v18_v2  }
   0x3   :  { %17 = vst.msk [vmem:[%s49_s1 + $0x8] sm:$0x3] %vm3_vm0, %v16_v1  }

// kernel: decoder_forward.1
= control target key start
LH: loop header
LB: loop body
LE: loop exit
PB: predicated region body
PF: predicated region fallthrough
CT: control target
= control target key end

     0   :  { %vm63_vm0 = vcmask 261120   ;;  %vm70_vm1 = vcmask 254976   ;;  %v3401_v10 = vmov 0   ;;  %s3402_s29 = smov 96   ;;  %s3403_s20 = smov 32   ;;  %vm257_vm2 = vcmask 64512   ;;  %s4216_s0 = inlined_call_operand.vmem [shape: f32[18,32], index: 0, kind: input, shape index: {}]   ;;  %s4217_s3 = inlined_call_operand.vmem [shape: bf16[2,32,160], index: 3, kind: input, shape index: {}]   ;;  %s4218_s8 = inlined_call_operand.vmem [shape: f32[18,32], index: 8, kind: input, shape index: {}]   ;;  %s4219_s7 = inlined_call_operand.vmem [shape: f32[18,32], index: 7, kind: input, shape index: {}]   ;;  %s4220_s1 = inlined_call_operand.vmem [shape: f32[2,1,32], index: 1, kind: input, shape index: {}]   ;;  %s4221_s9 = inlined_call_operand.vmem [shape: f32[18,18], index: 9, kind: input, shape index: {}]   ;;  %s4222_s4 = inlined_call_operand.vmem [shape: bf16[2,32,32], index: 4, kind: input, shape index: {}]   ;;  %s4223_s5 = inlined_call_operand.vmem [shape: bf16[2,32,128], index: 5, kind: input, shape index: {}]   ;;  %s4224_s2 = inlined_call_operand.vmem [shape: f32[2,1,32], index: 2, kind: input, shape index: {}]   ;;  %s4225_s6 = inlined_call_operand.vmem [shape: bf16[2,64,32], index: 6, kind: input, shape index: {}]   ;;  %s4226_s11 = inlined_call_operand.vmem [shape: bf16[32,128], index: 11, kind: input, shape index: {}]   ;;  %s4227_s10 = inlined_call_operand.vmem [shape: f32[1,32], index: 10, kind: input, shape index: {}]   ;;  %s4228_s13 = inlined_call_operand.vmem [shape: f32[18,128], index: 13, kind: output, shape index: {0}]   ;;  %s4229_s12 = inlined_call_operand.vmem [shape: s32[18,1], index: 12, kind: input, shape index: {}]   ;;  %s4230_s14 = inlined_call_operand.vmem [shape: f32[1,128], index: 14, kind: output, shape index: {1}]  }
   0x1   :  { %v47_v0 = vld [vmem:[%s4216_s0] sm:$0xff]  ;;  %v48_v1 = vld [vmem:[%s4216_s0 + $0x8] sm:$0xff]  ;;  %v49_v2 = vld [vmem:[%s4216_s0 + $0x10] sm:$0x3]  ;;  %160 = vmatprep.mubr.bf16.mxu0 %v3401_v10  ;;  %3196 = vset.pattern.permute.xlu1 %v3401_v10  ;;  %s3404_s27 = smov 88   ;;  %s3405_s28 = smov 120  }
   0x2   :  { %v60_v3 = vmul.f32 %v47_v0, %v47_v0  ;;  %v61_v4 = vmul.f32 %v48_v1, %v48_v1  ;;  %v62_v5 = vmul.f32 %v49_v2, %v49_v2  ;;  %v3197_v9 = vld [vmem:[%s4217_s3 + $0x4] ss:$8 sps:$4 sm:$0xff]   ;;  %v3199_v11 = vld [vmem:[%s4217_s3] ss:$8 sps:$4 sm:$0xff]   ;;  %3195 = vset.pattern.permute.xlu0 %v3401_v10  ;;  %v3200_v12 = vld [vmem:[%s4217_s3 + $0x14] ss:$8 sps:$4 sm:$0xff]  }
   0x3   :  { %128 = vmatprep.subr.bf16.mxu0 %v3197_v9  ;;  %v3202_v13 = vld [vmem:[%s4217_s3 + $0x10] ss:$8 sps:$4 sm:$0xff]   ;;  %v53_v14 = vld [vmem:[%s4218_s8] sm:$0xff]  ;;  %v54_v15 = vld [vmem:[%s4218_s8 + $0x8] sm:$0xff]  ;;  %vm324_vm3 = vcmask 146432   ;;  %vm331_vm4 = vcmask 140288  }
   0x4   :  { %v64_v6 = vsel %vm63_vm0, %v60_v3, 0.0  ;;  %v71_v7 = vsel %vm70_vm1, %v62_v5, 0.0  ;;  %v67_v8 = vsel %vm63_vm0, %v61_v4, 0.0  ;;  %129 = vmatpush1.bf16.msra.mxu0 %v3199_v11  ;;  %v55_v16 = vld [vmem:[%s4218_s8 + $0x10] sm:$0x3]  ;;  %v3535_v17 = vld [vmem:[%s4219_s7] sm:$0xff] }
   0x5   :  { %65 = vadd.xlane.f32.xlu0 %v64_v6  ;;  %72 = vadd.xlane.f32.xlu1 %v71_v7  ;;  %v3542_v18 = vld [vmem:[%s4219_s7 + $0x8] sm:$0xff]  ;;  %v2760_v32 = vld [vmem:[%s4220_s1] ss:$0 sm:$0xff]  ;;  %v52_v47 = vld [vmem:[%s4219_s7 + $0x10] sm:$0x3]  ;;  %s3406_s21 = smov 64  }
   0x6   :  { %130 = vmatprep.subr.bf16.mxu0 %v3200_v12  ;;  %s3407_s22 = smov 56   ;;  %s3408_s23 = smov 80   ;;  %vm374_vm5 = vcmask 1040384   ;;  %vm428_vm6 = vcmask 58368   ;;  %vm615_vm7 = vcmask 130112   ;;  %vm618_vm8 = vcmask 123968  }
   0x7   :  { %s3409_s24 = smov 112   ;;  %s3410_s25 = smov 48   ;;  %vm803_vm9 = vcmask 195712   ;;  %vm806_vm10 = vcmask 189568   ;;  %vm991_vm11 = vcmask 261312   ;;  %vm994_vm12 = vcmask 255168  }
   0x8   :  { %131 = vmatpush1.bf16.msra.mxu0 %v3202_v13  ;;  %s4241_s26 = smov 72   ;;  %s4239_s30 = smov 104   ;;  %vm1250_vm13 = vcmask 523264   ;;  %vm2643_vm15 = vcmask 1041408  }
   0x9   :  { %68 = vadd.xlane.f32.xlu0 %v67_v8  ;;  %s4235_s15 = smov 40   ;;  %s4233_s16 = smov 8  }
   0xa   :  { %s4231_s17 = smov 16  }
  0x16   :  { %185 = vrot.lane.b32.xlu1 %v53_v14, %s3402_s29 }
  0x1a   :  { %189 = vrot.lane.b32.xlu1 %v55_v16, %s3402_s29 }
  0x1e   :  { %215 = vrot.lane.b32.xlu1 %v3535_v17, %s3403_s20 }
  0x1f   :  { %187 = vrot.lane.b32.xlu0 %v54_v15, %s3402_s29 }
  0x22   :  { %217 = vrot.lane.b32.xlu1 %v3542_v18, %s3403_s20 }
  0x92   :  { %v66_v19 = vpop.xlane.xlu0 %65  ;;  %v73_v20 = vpop.xlane.xlu1 %72 }
  0x93   :  { %v75_v21 = vmul.f32 0.03125, %v66_v19  ;;  %v77_v22 = vmul.f32 0.03125, %v73_v20 }
  0x95   :  { %v78_v23 = vadd.f32 1e-06, %v75_v21  ;;  %v80_v25 = vadd.f32 1e-06, %v77_v22 }
  0x96   :  { %v69_v24 = vpop.xlane.xlu0 %68  ;;  %v3559_v48 = vpop.permute.xlu1 %185 }
  0x97   :  { %3227 = vrsqrt.f32 %v78_v23  ;;  %v76_v26 = vmul.f32 0.03125, %v69_v24 }
  0x98   :  { %3229 = vrsqrt.f32 %v80_v25 }
  0x99   :  { %v79_v27 = vadd.f32 1e-06, %v76_v26 }
  0x9a   :  { %v3565_v54 = vpop.permute.xlu0 %187  ;;  %v3569_v56 = vpop.permute.xlu1 %189 }
  0x9b   :  { %3231 = vrsqrt.f32 %v79_v27 }
  0x9e   :  { %v3576_v59 = vpop.permute.xlu1 %215 }
  0xa1   :  { %v3228_v28 = vpop.eup %3227 }
  0xa2   :  { %v3230_v29 = vpop.eup %3229  ;;  %v84_v30 = vmul.f32 %v3228_v28, %v47_v0  ;;  %v3578_v60 = vpop.permute.xlu1 %217 }
  0xa3   :  { %v86_v36 = vmul.f32 %v3230_v29, %v49_v2 }
  0xa4   :  { %v93_v34 = vmul.f32 %v2760_v32, %v84_v30 }
  0xa5   :  { %v3232_v31 = vpop.eup %3231  ;;  %v95_v38 = vmul.f32 %v2760_v32, %v86_v36 }
  0xa6   :  { %v85_v33 = vmul.f32 %v3232_v31, %v48_v1 }
  0xa7   :  { %v97_v39 = vpack.c.bf16 %v95_v38, %v95_v38 }
  0xa8   :  { %v94_v35 = vmul.f32 %v2760_v32, %v85_v33  ;;  %v3626_v33 = vld [vmem:[%s4221_s9] sm:$0xff] }
  0xaa   :  { %v96_v37 = vpack.c.bf16 %v94_v35, %v93_v34 }
  0xac   :  { %2765 = vmatmul.mubr.msk.bf16.vlgmr.msra.gmra.mrb[0].mxu0 %vm63_vm0, %v96_v37  ;;  %v3631_v37 = vld [vmem:[%s4221_s9 + $0x8] sm:$0xff] }
  0xad   :  { %170 = vmatprep.mubr.bf16.mxu0 %v3401_v10 }
  0xb4   :  { %2766 = vmatmul.mubr.msk.bf16.gmra.mrb[4].mxu0 %vm63_vm0, %v97_v39 }
 0x17f   :  { %v162_v40 = vpop.f32.mrb[0].mxu0 }
 0x180   :  { %v164_v41 = vpop.f32.mrb[1].mxu0  ;;  %v194_v53 = vmul.f32 %v3559_v48, %v162_v40  ;;  %v224_v62 = vmul.f32 %v3576_v59, %v162_v40  ;;  %v179_v11 = vmul.f32 %v162_v40, %v3535_v17 }
 0x181   :  { %v227_v42 = vmul.f32 %v164_v41, %v53_v14  ;;  %v166_v43 = vpop.f32.mrb[2].mxu0  ;;  %v3637_v41 = vld [vmem:[%s4221_s9 + $0x10] sm:$0x3] }
 0x182   :  { %v3552_v44 = vpack.c.bf16 %v166_v43, %v162_v40  ;;  %v168_v45 = vpop.f32.mrb[3].mxu0  ;;  %v195_v57 = vmul.f32 %v3565_v54, %v166_v43  ;;  %v225_v63 = vmul.f32 %v3578_v60, %v166_v43  ;;  %v180_v12 = vmul.f32 %v166_v43, %v3542_v18 }
 0x183   :  { %v228_v46 = vmul.f32 %v168_v45, %v54_v15  ;;  %233 = vrot.lane.b32.xlu0 %v227_v42, %s3403_s20 }
 0x185   :  { %235 = vrot.lane.b32.xlu1 %v228_v46, %s3403_s20 }
 0x187   :  { %219 = vrot.lane.b32.xlu0 %v52_v47, %s3403_s20  ;;  %v3562_v49 = vpop.f32.mrb[4].mxu0 }
 0x188   :  { %v174_v50 = vpop.f32.mrb[5].mxu0  ;;  %v196_v58 = vmul.f32 %v3569_v56, %v3562_v49  ;;  %v181_v19 = vmul.f32 %v3562_v49, %v52_v47 }
 0x189   :  { %v229_v51 = vmul.f32 %v174_v50, %v55_v16  ;;  %v176_v52 = vpop.f32.mrb[6].mxu0 }
 0x18a   :  { %v177_v55 = vpop.f32.mrb[7].mxu0 }
 0x18b   :  { %200 = vrot.lane.b32.xlu0 %v194_v53, %s3403_s20  ;;  %237 = vrot.lane.b32.xlu1 %v229_v51, %s3403_s20 }
 0x18f   :  { %204 = vrot.lane.b32.xlu0 %v196_v58, %s3403_s20  ;;  %202 = vrot.lane.b32.xlu1 %v195_v57, %s3403_s20 }
 0x1f5   :  { %v234_v61 = vpop.permute.xlu0 %233 }
 0x1f6   :  { %v242_v1 = vadd.f32 %v234_v61, %v224_v62 }
 0x1f7   :  { %v236_v0 = vpop.permute.xlu1 %235 }
 0x1f8   :  { %v243_v2 = vadd.f32 %v236_v0, %v225_v63 }
 0x1f9   :  { %v3582_v3 = vpop.permute.xlu0 %219 }
 0x1fa   :  { %v3584_v4 = vpack.c.bf16 %v243_v2, %v242_v1  ;;  %v226_v5 = vmul.f32 %v3582_v3, %v3562_v49 }
 0x1fc   :  { %253 = vrot.lane.b32.xlu1 %v3584_v4, %s3402_s29 }
 0x1fd   :  { %v238_v6 = vpop.permute.xlu1 %237  ;;  %v201_v7 = vpop.permute.xlu0 %200 }
 0x1fe   :  { %v244_v8 = vadd.f32 %v238_v6, %v226_v5  ;;  %v209_v15 = vadd.f32 %v201_v7, %v179_v11 }
 0x200   :  { %v3590_v9 = vpack.c.bf16 %v244_v8, %v244_v8  ;;  %436 = vrot.lane.b32.xlu1 %v3584_v4, %s3404_s27 }
 0x201   :  { %v203_v13 = vpop.permute.xlu1 %202  ;;  %v205_v14 = vpop.permute.xlu0 %204 }
 0x202   :  { %v210_v16 = vadd.f32 %v203_v13, %v180_v12  ;;  %255 = vrot.lane.b32.xlu0 %v3590_v9, %s3402_s29  ;;  %v211_v21 = vadd.f32 %v205_v14, %v181_v19 }
 0x204   :  { %v3599_v20 = vpack.c.bf16 %v210_v16, %v209_v15  ;;  %v3607_v17 = vpack.c.bf16 %v211_v21, %v211_v21 }
 0x206   :  { %438 = vrot.lane.b32.xlu0 %v3590_v9, %s3404_s27  ;;  %432 = vrot.lane.b32.xlu1 %v3599_v20, %s3405_s28 }
 0x207   :  { %2966 = vmatprep.mubr.msk.bf16.mxu1 %vm257_vm2, %v3599_v20 }
 0x20a   :  { %434 = vrot.lane.b32.xlu0 %v3607_v17, %s3405_s28 }
 0x26e   :  { %v254_v18 = vpop.permute.xlu1 %253 }
 0x26f   :  { %3154 = vmatprep.subr.msk.bf16.mxu1 %vm257_vm2, %v254_v18  ;;  %v265_v22 = vsel %vm257_vm2, %v254_v18, 0 }
 0x270   :  { %2963 = vmatpush3.bf16.xpose.msra.mxu1 %v265_v22 }
 0x272   :  { %v437_v25 = vpop.permute.xlu1 %436 }
 0x273   :  { %v447_v27 = vsel %vm257_vm2, %v437_v25, 0 }
 0x274   :  { %v256_v23 = vpop.permute.xlu0 %255 }
 0x275   :  { %3155 = vmatprep.subr.msk.bf16.mxu1 %vm257_vm2, %v256_v23  ;;  %v268_v24 = vsel %vm257_vm2, %v256_v23, 0 }
 0x278   :  { %2965 = vmatpush3.bf16.xpose.msra.mxu1 %v268_v24  ;;  %v433_v26 = vpop.permute.xlu1 %432  ;;  %v439_v28 = vpop.permute.xlu0 %438 }
 0x279   :  { %3157 = vmatprep.subr.msk.bf16.mxu1 %vm257_vm2, %v437_v25  ;;  %v450_v29 = vsel %vm257_vm2, %v439_v28, 0 }
 0x27c   :  { %v435_v30 = vpop.permute.xlu0 %434 }
 0x27f   :  { %2967 = vmatmul.mubr.msk.bf16.vlgmr.msra.gmra.mrb[0].mxu1 %vm257_vm2, %v3607_v17 }
 0x280   :  { %2979 = vmatpush3.bf16.xpose.msra.mxu1 %v447_v27  ;;  %2982 = vmatprep.mubr.msk.bf16.mxu1 %vm257_vm2, %v433_v26 }
 0x281   :  { %3158 = vmatprep.subr.msk.bf16.mxu1 %vm257_vm2, %v439_v28 }
 0x288   :  { %2981 = vmatpush3.bf16.xpose.msra.mxu1 %v450_v29 }
 0x28f   :  { %2983 = vmatmul.mubr.msk.bf16.vlgmr.msra.gmra.mrb[4].mxu1 %vm257_vm2, %v435_v30 }
 0x352   :  { %v2968_v31 = vpop.f32.mrb[0].mxu1 }
 0x353   :  { %v304_v32 = vpop.f32.mrb[1].mxu1  ;;  %v320_v38 = vmul.f32 0.35355338, %v2968_v31 }
 0x354   :  { %v318_v34 = vmul.f32 0.35355338, %v304_v32  ;;  %v2969_v35 = vpop.f32.mrb[2].mxu1 }
 0x355   :  { %v307_v36 = vpop.f32.mrb[3].mxu1  ;;  %v323_v46 = vadd.f32 %v320_v38, %v3637_v41  ;;  %v3661_v38 = vpack.c.bf16 %v3562_v49, %v3562_v49 }
 0x356   :  { %v319_v39 = vmul.f32 0.35355338, %v307_v36  ;;  %v321_v40 = vadd.f32 %v318_v34, %v3626_v33 }
 0x357   :  { %v332_v47 = vsel %vm331_vm4, %v323_v46, -inf }
 0x358   :  { %v325_v42 = vsel %vm324_vm3, %v321_v40, -inf  ;;  %v322_v43 = vadd.f32 %v319_v39, %v3631_v37 }
 0x359   :  { %326 = vmax.xlane.f32.xlu1 %v325_v42 }
 0x35a   :  { %v328_v45 = vsel %vm324_vm3, %v322_v43, -inf }
 0x35b   :  { %329 = vmax.xlane.f32.xlu0 %v328_v45 }
 0x35f   :  { %333 = vmax.xlane.f32.xlu0 %v332_v47 }
 0x362   :  { %v2984_v50 = vpop.f32.mrb[4].mxu1 }
 0x363   :  { %v486_v51 = vpop.f32.mrb[5].mxu1  ;;  %v502_v52 = vmul.f32 0.35355338, %v2984_v50 }
 0x364   :  { %v500_v53 = vmul.f32 0.35355338, %v486_v51  ;;  %v2985_v55 = vpop.f32.mrb[6].mxu1 }
 0x365   :  { %v489_v57 = vpop.f32.mrb[7].mxu1  ;;  %v505_v0 = vadd.f32 %v502_v52, %v3637_v41 }
 0x366   :  { %v501_v58 = vmul.f32 0.35355338, %v489_v57  ;;  %v503_v61 = vadd.f32 %v500_v53, %v3626_v33 }
 0x367   :  { %v512_v2 = vsel %vm331_vm4, %v505_v0, -inf }
 0x368   :  { %v506_v62 = vsel %vm324_vm3, %v503_v61, -inf  ;;  %v504_v63 = vadd.f32 %v501_v58, %v3631_v37 }
 0x369   :  { %507 = vmax.xlane.f32.xlu0 %v506_v62 }
 0x36a   :  { %v509_v1 = vsel %vm324_vm3, %v504_v63, -inf }
 0x36b   :  { %510 = vmax.xlane.f32.xlu1 %v509_v1 }
 0x36d   :  { %513 = vmax.xlane.f32.xlu0 %v512_v2 }
 0x37c   :  { %363 = vrot.lane.b32.xlu1 %v3552_v44, %s3406_s21 }
 0x3e6   :  { %v327_v5 = vpop.xlane.xlu1 %326 }
 0x3e7   :  { %v335_v8 = vsub.f32 %v321_v40, %v327_v5 }
 0x3e8   :  { %v330_v6 = vpop.xlane.xlu0 %329 }
 0x3e9   :  { %v336_v7 = vsub.f32 %v322_v43, %v330_v6  ;;  %v338_v14 = vmul.f32 1.442695, %v335_v8 }
 0x3eb   :  { %v340_v11 = vmul.f32 1.442695, %v336_v7 }
 0x3ec   :  { %v334_v12 = vpop.xlane.xlu0 %333 }
 0x3ed   :  { %3233 = vpow2.f32 %v340_v11  ;;  %v337_v13 = vsub.f32 %v323_v46, %v334_v12 }
 0x3ef   :  { %v342_v15 = vmul.f32 1.442695, %v337_v13 }
 0x3f1   :  { %3235 = vpow2.f32 %v342_v15 }
 0x3f2   :  { %3237 = vpow2.f32 %v338_v14 }
 0x3f6   :  { %v508_v16 = vpop.xlane.xlu0 %507 }
 0x3f7   :  { %v3234_v19 = vpop.eup %3233  ;;  %v515_v22 = vsub.f32 %v503_v61, %v508_v16 }
 0x3f8   :  { %v511_v21 = vpop.xlane.xlu1 %510  ;;  %v347_v18 = vsel %vm324_vm3, %v3234_v19, 0.0 }
 0x3f9   :  { %348 = vadd.xlane.f32.xlu0 %v347_v18  ;;  %v518_v29 = vmul.f32 1.442695, %v515_v22  ;;  %v516_v39 = vsub.f32 %v504_v63, %v511_v21 }
 0x3fa   :  { %v514_v23 = vpop.xlane.xlu0 %513 }
 0x3fb   :  { %v3236_v24 = vpop.eup %3235  ;;  %v517_v25 = vsub.f32 %v505_v0, %v514_v23  ;;  %v520_v40 = vmul.f32 1.442695, %v516_v39 }
 0x3fc   :  { %v364_v26 = vpop.permute.xlu1 %363  ;;  %v350_v27 = vsel %vm331_vm4, %v3236_v24, 0.0  ;;  %v3238_v28 = vpop.eup %3237 }
 0x3fd   :  { %v522_v30 = vmul.f32 1.442695, %v517_v25  ;;  %2970 = vmatprep.subr.bf16.mxu0 %v364_v26  ;;  %351 = vadd.xlane.f32.xlu1 %v350_v27  ;;  %v344_v31 = vsel %vm324_vm3, %v3238_v28, 0.0 }
 0x3fe   :  { %2971 = vmatpush3.bf16.msra.mxu0 %v364_v26 }
 0x3ff   :  { %3239 = vpow2.f32 %v522_v30 }
 0x400   :  { %3241 = vpow2.f32 %v518_v29 }
 0x401   :  { %345 = vadd.xlane.f32.xlu1 %v344_v31  ;;  %3243 = vpow2.f32 %v520_v40 }
 0x409   :  { %v3240_v32 = vpop.eup %3239 }
 0x40a   :  { %v530_v34 = vsel %vm331_vm4, %v3240_v32, 0.0  ;;  %v3242_v35 = vpop.eup %3241 }
 0x40b   :  { %531 = vadd.xlane.f32.xlu0 %v530_v34  ;;  %v524_v36 = vsel %vm324_vm3, %v3242_v35, 0.0  ;;  %v3244_v42 = vpop.eup %3243 }
 0x40c   :  { %v527_v49 = vsel %vm324_vm3, %v3244_v42, 0.0 }
 0x40f   :  { %525 = vadd.xlane.f32.xlu0 %v524_v36 }
 0x412   :  { %541 = vrot.lane.b32.xlu1 %v3552_v44, %s3407_s22 }
 0x416   :  { %543 = vrot.lane.b32.xlu1 %v3661_v38, %s3407_s22 }
 0x425   :  { %365 = vrot.lane.b32.xlu0 %v3661_v38, %s3406_s21 }
 0x429   :  { %626 = vrot.lane.b32.xlu0 %v3590_v9, %s3408_s23 }
 0x42d   :  { %622 = vrot.lane.b32.xlu0 %v3607_v17, %s3409_s24 }
 0x43a   :  { %528 = vadd.xlane.f32.xlu1 %v527_v49 }
 0x44b   :  { %624 = vrot.lane.b32.xlu1 %v3584_v4, %s3408_s23 }
 0x44f   :  { %620 = vrot.lane.b32.xlu1 %v3599_v20, %s3409_s24 }
 0x486   :  { %v349_v43 = vpop.xlane.xlu0 %348 }
 0x487   :  { %3245 = vrcp.f32 %v349_v43 }
 0x48a   :  { %v352_v45 = vpop.xlane.xlu1 %351 }
 0x48e   :  { %v346_v46 = vpop.xlane.xlu1 %345 }
 0x48f   :  { %3247 = vrcp.f32 %v346_v46 }
 0x490   :  { %3249 = vrcp.f32 %v352_v45 }
 0x491   :  { %v3246_v47 = vpop.eup %3245 }
 0x492   :  { %v357_v53 = vmul.f32 %v3246_v47, %v3234_v19  ;;  %v542_v62 = vpop.permute.xlu1 %541 }
 0x496   :  { %v544_v2 = vpop.permute.xlu1 %543 }
 0x497   :  { %v553_v5 = vsel %vm374_vm5, %v544_v2, 0 }
 0x498   :  { %v532_v50 = vpop.xlane.xlu0 %531 }
 0x499   :  { %v3248_v51 = vpop.eup %3247  ;;  %3251 = vrcp.f32 %v532_v50 }
 0x49a   :  { %v356_v52 = vmul.f32 %v3248_v51, %v3238_v28  ;;  %v3250_v55 = vpop.eup %3249 }
 0x49b   :  { %v358_v61 = vmul.f32 %v3250_v55, %v3236_v24 }
 0x49c   :  { %v526_v57 = vpop.xlane.xlu0 %525  ;;  %v359_v58 = vpack.c.bf16 %v357_v53, %v356_v52 }
 0x49d   :  { %v360_v1 = vpack.c.bf16 %v358_v61, %v358_v61  ;;  %3253 = vrcp.f32 %v526_v57 }
 0x49e   :  { %2974 = vmatprep.mubr.msk.bf16.mxu0 %vm324_vm3, %v359_v58 }
 0x4a0   :  { %v366_v63 = vpop.permute.xlu0 %365 }
 0x4a1   :  { %3156 = vmatprep.subr.msk.bf16.mxu0 %vm374_vm5, %v366_v63  ;;  %v376_v0 = vsel %vm374_vm5, %v366_v63, 0 }
 0x4a2   :  { %2973 = vmatpush3.bf16.msra.mxu0 %v376_v0 }
 0x4a3   :  { %2986 = vmatprep.subr.bf16.mxu0 %v542_v62  ;;  %v3252_v8 = vpop.eup %3251 }
 0x4a4   :  { %v538_v13 = vmul.f32 %v3252_v8, %v3240_v32  ;;  %v627_v22 = vpop.permute.xlu0 %626 }
 0x4a5   :  { %2975 = vmatmul.mubr.msk.bf16.vlgmr.msra.gmra.mrb[8].mxu0 %vm324_vm3, %v360_v1  ;;  %v638_v23 = vsel %vm257_vm2, %v627_v22, 0 }
 0x4a6   :  { %2987 = vmatpush3.bf16.msra.mxu0 %v542_v62  ;;  %v540_v19 = vpack.c.bf16 %v538_v13, %v538_v13 }
 0x4a7   :  { %3159 = vmatprep.subr.msk.bf16.mxu0 %vm374_vm5, %v544_v2  ;;  %v3254_v11 = vpop.eup %3253 }
 0x4a8   :  { %v536_v14 = vmul.f32 %v3254_v11, %v3242_v35  ;;  %v623_v24 = vpop.permute.xlu0 %622 }
 0x4aa   :  { %2989 = vmatpush3.bf16.msra.mxu0 %v553_v5 }
 0x4c7   :  { %v529_v6 = vpop.xlane.xlu1 %528 }
 0x4c8   :  { %3255 = vrcp.f32 %v529_v6 }
 0x4cb   :  { %v625_v7 = vpop.permute.xlu1 %624 }
 0x4cc   :  { %3160 = vmatprep.subr.msk.bf16.mxu0 %vm257_vm2, %v625_v7  ;;  %v635_v18 = vsel %vm257_vm2, %v625_v7, 0 }
 0x4cf   :  { %v621_v21 = vpop.permute.xlu1 %620 }
 0x4d2   :  { %v3256_v12 = vpop.eup %3255 }
 0x4d3   :  { %v537_v15 = vmul.f32 %v3256_v12, %v3244_v42 }
 0x4d5   :  { %v539_v16 = vpack.c.bf16 %v537_v15, %v536_v14 }
 0x4d7   :  { %2990 = vmatprep.mubr.msk.bf16.mxu0 %vm324_vm3, %v539_v16 }
 0x4d8   :  { %2991 = vmatmul.mubr.msk.bf16.vlgmr.msra.gmra.mrb[12].mxu0 %vm324_vm3, %v540_v19 }
 0x4d9   :  { %2995 = vmatpush3.bf16.xpose.msra.mxu0 %v635_v18  ;;  %2998 = vmatprep.mubr.msk.bf16.mxu0 %vm257_vm2, %v621_v21 }
 0x4da   :  { %3161 = vmatprep.subr.msk.bf16.mxu0 %vm257_vm2, %v627_v22 }
 0x4e1   :  { %2997 = vmatpush3.bf16.xpose.msra.mxu0 %v638_v23 }
 0x4e8   :  { %2999 = vmatmul.mubr.msk.bf16.vlgmr.msra.gmra.mrb[16].mxu0 %vm257_vm2, %v623_v24 }
 0x578   :  { %v2976_v25 = vpop.f32.mrb[8].mxu0 }
 0x579   :  { %429 = vst.msk [vmem:[#allocation2 + $0x10] sm:$0x3] %vm428_vm6, %v2976_v25  ;;  %v412_v26 = vpop.f32.mrb[9].mxu0 }
 0x57a   :  { %426 = vst.msk [vmem:[#allocation2] sm:$0xff] %vm257_vm2, %v412_v26  ;;  %v2977_v27 = vpop.f32.mrb[10].mxu0 }
 0x57b   :  { %v415_v28 = vpop.f32.mrb[11].mxu0 }
 0x57c   :  { %427 = vst.msk [vmem:[#allocation2 + $0x8] sm:$0xff] %vm257_vm2, %v415_v28 }
 0x5ab   :  { %v3693_v29 = vpop.f32.mrb[12].mxu0 }
 0x5ac   :  { %v3695_v30 = vpop.f32.mrb[13].mxu0 }
 0x5ad   :  { %v2993_v31 = vpop.f32.mrb[14].mxu0 }
 0x5ae   :  { %v3697_v32 = vpop.f32.mrb[15].mxu0 }
 0x5bb   :  { %v3000_v34 = vpop.f32.mrb[16].mxu0 }
 0x5bc   :  { %v674_v35 = vpop.f32.mrb[17].mxu0  ;;  %v690_v42 = vmul.f32 0.35355338, %v3000_v34 }
 0x5bd   :  { %v688_v36 = vmul.f32 0.35355338, %v674_v35  ;;  %v3001_v39 = vpop.f32.mrb[18].mxu0 }
 0x5be   :  { %v677_v40 = vpop.f32.mrb[19].mxu0  ;;  %v693_v50 = vadd.f32 %v690_v42, %v3637_v41 }
 0x5bf   :  { %v689_v49 = vmul.f32 0.35355338, %v677_v40  ;;  %v691_v43 = vadd.f32 %v688_v36, %v3626_v33 }
 0x5c0   :  { %v700_v51 = vsel %vm331_vm4, %v693_v50, -inf }
 0x5c1   :  { %v694_v45 = vsel %vm324_vm3, %v691_v43, -inf  ;;  %v692_v46 = vadd.f32 %v689_v49, %v3631_v37 }
 0x5c2   :  { %695 = vmax.xlane.f32.xlu1 %v694_v45 }
 0x5c3   :  { %v697_v47 = vsel %vm324_vm3, %v692_v46, -inf }
 0x5c4   :  { %698 = vmax.xlane.f32.xlu0 %v697_v47 }
 0x5c8   :  { %701 = vmax.xlane.f32.xlu0 %v700_v51 }
 0x5d3   :  { %729 = vrot.lane.b32.xlu1 %v3552_v44, %s3410_s25 }
 0x64f   :  { %v696_v52 = vpop.xlane.xlu1 %695 }
 0x650   :  { %v703_v58 = vsub.f32 %v691_v43, %v696_v52 }
 0x651   :  { %v699_v53 = vpop.xlane.xlu0 %698 }
 0x652   :  { %v704_v55 = vsub.f32 %v692_v46, %v699_v53  ;;  %v706_v0 = vmul.f32 1.442695, %v703_v58 }
 0x653   :  { %v730_v57 = vpop.permute.xlu1 %729 }
 0x654   :  { %v708_v61 = vmul.f32 1.442695, %v704_v55  ;;  %3002 = vmatprep.subr.bf16.mxu1 %v730_v57 }
 0x655   :  { %3003 = vmatpush3.bf16.msra.mxu1 %v730_v57  ;;  %v702_v62 = vpop.xlane.xlu0 %701 }
 0x656   :  { %3257 = vpow2.f32 %v708_v61  ;;  %v705_v63 = vsub.f32 %v693_v50, %v702_v62 }
 0x658   :  { %v710_v1 = vmul.f32 1.442695, %v705_v63 }
 0x65a   :  { %3259 = vpow2.f32 %v710_v1 }
 0x65b   :  { %3261 = vpow2.f32 %v706_v0 }
 0x660   :  { %v3258_v2 = vpop.eup %3257 }
 0x661   :  { %v715_v5 = vsel %vm324_vm3, %v3258_v2, 0.0 }
 0x662   :  { %716 = vadd.xlane.f32.xlu1 %v715_v5 }
 0x664   :  { %v3260_v6 = vpop.eup %3259 }
 0x665   :  { %v718_v7 = vsel %vm331_vm4, %v3260_v6, 0.0  ;;  %v3262_v8 = vpop.eup %3261 }
 0x666   :  { %719 = vadd.xlane.f32.xlu0 %v718_v7  ;;  %v712_v11 = vsel %vm324_vm3, %v3262_v8, 0.0 }
 0x66a   :  { %713 = vadd.xlane.f32.xlu0 %v712_v11 }
 0x673   :  { %812 = vrot.lane.b32.xlu1 %v3584_v4, %s4241_s26 }
 0x677   :  { %814 = vrot.lane.b32.xlu1 %v3590_v9, %s4241_s26 }
 0x67b   :  { %808 = vrot.lane.b32.xlu1 %v3599_v20, %s4239_s30 }
 0x680   :  { %731 = vrot.lane.b32.xlu0 %v3661_v38, %s3410_s25 }
 0x684   :  { %810 = vrot.lane.b32.xlu0 %v3607_v17, %s4239_s30 }
 0x6ef   :  { %v717_v12 = vpop.xlane.xlu1 %716 }
 0x6f3   :  { %v720_v13 = vpop.xlane.xlu0 %719  ;;  %v813_v15 = vpop.permute.xlu1 %812 }
 0x6f4   :  { %3263 = vrcp.f32 %v720_v13  ;;  %v823_v26 = vsel %vm257_vm2, %v813_v15, 0 }
 0x6f5   :  { %3265 = vrcp.f32 %v717_v12 }
 0x6f7   :  { %v714_v14 = vpop.xlane.xlu0 %713  ;;  %v815_v21 = vpop.permute.xlu1 %814 }
 0x6f8   :  { %3267 = vrcp.f32 %v714_v14  ;;  %v826_v27 = vsel %vm257_vm2, %v815_v21, 0 }
 0x6fb   :  { %v732_v4 = vpop.permute.xlu0 %731  ;;  %v809_v25 = vpop.permute.xlu1 %808 }
 0x6fc   :  { %3162 = vmatprep.subr.msk.bf16.mxu1 %vm374_vm5, %v732_v4  ;;  %v741_v9 = vsel %vm374_vm5, %v732_v4, 0 }
 0x6fd   :  { %3005 = vmatpush3.bf16.msra.mxu1 %v741_v9 }
 0x6fe   :  { %3163 = vmatprep.subr.msk.bf16.mxu1 %vm257_vm2, %v813_v15  ;;  %v3264_v20 = vpop.eup %3263 }
 0x6ff   :  { %v3266_v16 = vpop.eup %3265  ;;  %v726_v17 = vmul.f32 %v3264_v20, %v3260_v6  ;;  %v811_v28 = vpop.permute.xlu0 %810 }
 0x700   :  { %v725_v22 = vmul.f32 %v3266_v16, %v3258_v2 }
 0x701   :  { %v728_v24 = vpack.c.bf16 %v726_v17, %v726_v17 }
 0x702   :  { %v3268_v19 = vpop.eup %3267 }
 0x703   :  { %v724_v18 = vmul.f32 %v3268_v19, %v3262_v8 }
 0x705   :  { %v727_v23 = vpack.c.bf16 %v725_v22, %v724_v18 }
 0x707   :  { %3006 = vmatprep.mubr.msk.bf16.mxu1 %vm324_vm3, %v727_v23 }
 0x708   :  { %3007 = vmatmul.mubr.msk.bf16.vlgmr.msra.gmra.mrb[8].mxu1 %vm324_vm3, %v728_v24  ;;  %v3203_v24 = vld [vmem:[%s4222_s4] sm:$0xff]  }
 0x709   :  { %3011 = vmatpush3.bf16.xpose.msra.mxu1 %v823_v26  ;;  %3014 = vmatprep.mubr.msk.bf16.mxu1 %vm257_vm2, %v809_v25  ;;  %v3204_v25 = vld [vmem:[%s4222_s4 + $0x8] sm:$0xff]  }
 0x70a   :  { %3164 = vmatprep.subr.msk.bf16.mxu1 %vm257_vm2, %v815_v21 }
 0x711   :  { %3013 = vmatpush3.bf16.xpose.msra.mxu1 %v826_v27 }
 0x718   :  { %3015 = vmatmul.mubr.msk.bf16.vlgmr.msra.gmra.mrb[12].mxu1 %vm257_vm2, %v811_v28 }
 0x7db   :  { %v3008_v31 = vpop.f32.mrb[8].mxu1 }
 0x7dc   :  { %v777_v34 = vpop.f32.mrb[9].mxu1 }
 0x7dd   :  { %v3009_v35 = vpop.f32.mrb[10].mxu1 }
 0x7de   :  { %v780_v36 = vpop.f32.mrb[11].mxu1 }
 0x7eb   :  { %v3016_v39 = vpop.f32.mrb[12].mxu1 }
 0x7ec   :  { %v862_v40 = vpop.f32.mrb[13].mxu1  ;;  %v878_v45 = vmul.f32 0.35355338, %v3016_v39 }
 0x7ed   :  { %v876_v42 = vmul.f32 0.35355338, %v862_v40  ;;  %v3017_v49 = vpop.f32.mrb[14].mxu1 }
 0x7ee   :  { %v865_v43 = vpop.f32.mrb[15].mxu1  ;;  %v881_v53 = vadd.f32 %v878_v45, %v3637_v41 }
 0x7ef   :  { %v877_v46 = vmul.f32 0.35355338, %v865_v43  ;;  %v879_v47 = vadd.f32 %v876_v42, %v3626_v33 }
 0x7f0   :  { %v888_v55 = vsel %vm331_vm4, %v881_v53, -inf }
 0x7f1   :  { %v882_v50 = vsel %vm324_vm3, %v879_v47, -inf  ;;  %v880_v51 = vadd.f32 %v877_v46, %v3631_v37 }
 0x7f2   :  { %883 = vmax.xlane.f32.xlu1 %v882_v50 }
 0x7f3   :  { %v885_v52 = vsel %vm324_vm3, %v880_v51, -inf }
 0x7f4   :  { %886 = vmax.xlane.f32.xlu0 %v885_v52 }
 0x7f8   :  { %889 = vmax.xlane.f32.xlu0 %v888_v55 }
 0x87f   :  { %v884_v57 = vpop.xlane.xlu1 %883 }
 0x880   :  { %v891_v62 = vsub.f32 %v879_v47, %v884_v57  ;;  %v3389_v47 = vld [vmem:[%s4216_s0 + $0x10] sm:$0x3]  ;;  %v3391_v57 = vld [vmem:[%s4216_s0 + $0x8] sm:$0xff] }
 0x881   :  { %v887_v58 = vpop.xlane.xlu0 %886 }
 0x882   :  { %v892_v61 = vsub.f32 %v880_v51, %v887_v58  ;;  %v894_v1 = vmul.f32 1.442695, %v891_v62  ;;  %v3390_v51 = vld [vmem:[%s4216_s0] sm:$0xff] }
 0x884   :  { %v896_v63 = vmul.f32 1.442695, %v892_v61 }
 0x885   :  { %v890_v0 = vpop.xlane.xlu0 %889 }
 0x886   :  { %3269 = vpow2.f32 %v896_v63  ;;  %v893_v33 = vsub.f32 %v881_v53, %v890_v0 }
 0x888   :  { %v898_v2 = vmul.f32 1.442695, %v893_v33 }
 0x88a   :  { %3271 = vpow2.f32 %v898_v2  ;;  %v3205_v2 = vld [vmem:[%s4223_s5] sm:$0xff]  }
 0x88b   :  { %3273 = vpow2.f32 %v894_v1  ;;  %3034 = vmatprep.subr.bf16.mxu1 %v3205_v2 }
 0x88c   :  { %3035 = vmatpush3.bf16.msra.mxu1 %v3205_v2 }
 0x890   :  { %v3270_v37 = vpop.eup %3269 }
 0x891   :  { %v903_v5 = vsel %vm324_vm3, %v3270_v37, 0.0 }
 0x892   :  { %904 = vadd.xlane.f32.xlu1 %v903_v5 }
 0x894   :  { %v3272_v41 = vpop.eup %3271 }
 0x895   :  { %v906_v6 = vsel %vm331_vm4, %v3272_v41, 0.0  ;;  %v3274_v7 = vpop.eup %3273 }
 0x896   :  { %907 = vadd.xlane.f32.xlu0 %v906_v6  ;;  %v900_v8 = vsel %vm324_vm3, %v3274_v7, 0.0 }
 0x89a   :  { %901 = vadd.xlane.f32.xlu0 %v900_v8 }
 0x8a3   :  { %917 = vrot.lane.b32.xlu1 %v3552_v44, %s4235_s15 }
 0x8a7   :  { %606 = vrot.lane.b32.xlu1 %v3695_v30, %s4233_s16 }
 0x8ab   :  { %608 = vrot.lane.b32.xlu1 %v3697_v32, %s4233_s16 }
 0x8af   :  { %610 = vrot.lane.b32.xlu1 %v3693_v29, %s4233_s16 }
 0x8b0   :  { %919 = vrot.lane.b32.xlu0 %v3661_v38, %s4235_s15  ;;  %s4237_s15 = smov 24  }
 0x8b3   :  { %796 = vrot.lane.b32.xlu1 %v780_v36, %s4231_s17 }
 0x8b4   :  { %794 = vrot.lane.b32.xlu0 %v777_v34, %s4231_s17 }
 0x8b8   :  { %798 = vrot.lane.b32.xlu0 %v3008_v31, %s4231_s17 }
 0x91f   :  { %v905_v44 = vpop.xlane.xlu1 %904 }
 0x923   :  { %v918_v11 = vpop.permute.xlu1 %917  ;;  %v908_v12 = vpop.xlane.xlu0 %907 }
 0x924   :  { %3018 = vmatprep.subr.bf16.mxu0 %v918_v11  ;;  %3275 = vrcp.f32 %v908_v12 }
 0x925   :  { %3019 = vmatpush3.bf16.msra.mxu0 %v918_v11  ;;  %3277 = vrcp.f32 %v905_v44 }
 0x927   :  { %v607_v30 = vpop.permute.xlu1 %606  ;;  %v902_v29 = vpop.xlane.xlu0 %901 }
 0x928   :  { %616 = vst.msk [vmem:[#allocation2] sm:$0xff] %vm615_vm7, %v607_v30  ;;  %3279 = vrcp.f32 %v902_v29 }
 0x92b   :  { %v609_v38 = vpop.permute.xlu1 %608  ;;  %v920_v32 = vpop.permute.xlu0 %919 }
 0x92c   :  { %617 = vst.msk [vmem:[#allocation2 + $0x8] sm:$0xff] %vm615_vm7, %v609_v38  ;;  %v929_v13 = vsel %vm374_vm5, %v920_v32, 0  ;;  %3165 = vmatprep.subr.msk.bf16.mxu0 %vm374_vm5, %v920_v32 }
 0x92d   :  { %3021 = vmatpush3.bf16.msra.mxu0 %v929_v13  ;;  %v2787_v13 = vld [vmem:[%s4224_s2] ss:$0 sm:$0xff] }
 0x92e   :  { %v3276_v14 = vpop.eup %3275  ;;  %3026 = vmatprep.subr.bf16.mxu0 %v3203_v24 }
 0x92f   :  { %v611_v4 = vpop.permute.xlu1 %610  ;;  %v795_v15 = vpop.permute.xlu0 %794  ;;  %v914_v16 = vmul.f32 %v3276_v14, %v3272_v41 }
 0x930   :  { %v3278_v9 = vpop.eup %3277  ;;  %619 = vst.msk [vmem:[#allocation2 + $0x10] sm:$0x3] %vm618_vm8, %v611_v4 }
 0x931   :  { %804 = vst.msk [vmem:[#allocation2] sm:$0xff] %vm803_vm9, %v795_v15  ;;  %v913_v18 = vmul.f32 %v3278_v9, %v3270_v37  ;;  %v916_v23 = vpack.c.bf16 %v914_v16, %v914_v16  ;;  %v3206_v37 = vld [vmem:[%s4223_s5 + $0x8] sm:$0xff]  }
 0x932   :  { %v3280_v20 = vpop.eup %3279  ;;  %3036 = vmatprep.subr.bf16.mxu1 %v3206_v37 }
 0x933   :  { %v797_v19 = vpop.permute.xlu1 %796  ;;  %v799_v21 = vpop.permute.xlu0 %798  ;;  %v912_v17 = vmul.f32 %v3280_v20, %v3274_v7  ;;  %3037 = vmatpush3.bf16.msra.mxu1 %v3206_v37 }
 0x934   :  { %805 = vst.msk [vmem:[#allocation2 + $0x8] sm:$0xff] %vm803_vm9, %v797_v19 }
 0x935   :  { %807 = vst.msk [vmem:[#allocation2 + $0x10] sm:$0x3] %vm806_vm10, %v799_v21  ;;  %v915_v22 = vpack.c.bf16 %v913_v18, %v912_v17  ;;  %v3207_v17 = vld [vmem:[%s4225_s6] sm:$0xff]   ;;  %v3208_v18 = vld [vmem:[%s4225_s6 + $0x8] sm:$0xff]  }
 0x937   :  { %3022 = vmatprep.mubr.msk.bf16.mxu0 %vm324_vm3, %v915_v22  ;;  %v3209_v22 = vld [vmem:[%s4225_s6 + $0x10] sm:$0xff]  }
 0x938   :  { %3023 = vmatmul.mubr.msk.bf16.vlgmr.msra.gmra.mrb[20].mxu0 %vm324_vm3, %v916_v23  ;;  %v3210_v23 = vld [vmem:[%s4225_s6 + $0x18] sm:$0xff]  }
 0x939   :  { %3027 = vmatpush3.bf16.msra.mxu0 %v3203_v24 }
 0x93a   :  { %3028 = vmatprep.subr.bf16.mxu0 %v3204_v25 }
 0x93d   :  { %3029 = vmatpush3.bf16.msra.mxu0 %v3204_v25 }
 0x93e   :  { %3042 = vmatprep.subr.bf16.mxu0 %v3207_v17 }
 0xa0b   :  { %v3024_v26 = vpop.f32.mrb[20].mxu0 }
 0xa0c   :  { %v965_v27 = vpop.f32.mrb[21].mxu0 }
 0xa0d   :  { %982 = vrot.lane.b32.xlu1 %v965_v27, %s4237_s15  ;;  %v3025_v28 = vpop.f32.mrb[22].mxu0 }
 0xa0e   :  { %v968_v31 = vpop.f32.mrb[23].mxu0 }
 0xa0f   :  { %984 = vrot.lane.b32.xlu0 %v968_v31, %s4237_s15 }
 0xa11   :  { %986 = vrot.lane.b32.xlu1 %v3024_v26, %s4237_s15 }
 0xa7f   :  { %v983_v34 = vpop.permute.xlu1 %982 }
 0xa80   :  { %992 = vst.msk [vmem:[#allocation2] sm:$0xff] %vm991_vm11, %v983_v34 }
 0xa81   :  { %v985_v35 = vpop.permute.xlu0 %984 }
 0xa82   :  { %993 = vst.msk [vmem:[#allocation2 + $0x8] sm:$0xff] %vm991_vm11, %v985_v35 }
 0xa83   :  { %v987_v36 = vpop.permute.xlu1 %986 }
 0xa84   :  { %995 = vst.msk [vmem:[#allocation2 + $0x10] sm:$0x3] %vm994_vm12, %v987_v36 }
 0xa87   :  { %v996_v39 = vld [vmem:[#allocation2] sm:$0xff] }
 0xa89   :  { %v997_v40 = vld [vmem:[#allocation2 + $0x8] sm:$0xff] }
 0xa8a   :  { %v999_v42 = vpack.c.bf16 %v997_v40, %v996_v39 }
 0xa8b   :  { %v998_v49 = vld [vmem:[#allocation2 + $0x10] sm:$0x3] }
 0xa8c   :  { %3030 = vmatprep.mubr.msk.bf16.mxu0 %vm63_vm0, %v999_v42  ;;  %v1000_v43 = vpack.c.bf16 %v998_v49, %v998_v49 }
 0xa8e   :  { %3031 = vmatmul.mubr.msk.bf16.vlgmr.msra.gmra.mrb[24].mxu0 %vm63_vm0, %v1000_v43 }
 0xa8f   :  { %3043 = vmatpush3.bf16.msra.mxu0 %v3207_v17 }
 0xa90   :  { %3044 = vmatprep.subr.bf16.mxu0 %v3208_v18 }
 0xa93   :  { %3045 = vmatpush3.bf16.msra.mxu0 %v3208_v18 }
 0xa94   :  { %3046 = vmatprep.subr.bf16.mxu0 %v3209_v22 }
 0xa97   :  { %3047 = vmatpush3.bf16.msra.mxu0 %v3209_v22 }
 0xa98   :  { %3048 = vmatprep.subr.bf16.mxu0 %v3210_v23 }
 0xa9b   :  { %3049 = vmatpush3.bf16.msra.mxu0 %v3210_v23 }
 0xb61   :  { %v3032_v45 = vpop.f32.mrb[24].mxu0 }
 0xb62   :  { %v1057_v46 = vpop.f32.mrb[25].mxu0  ;;  %v3779_v50 = vadd.f32 %v3389_v47, %v3032_v45 }
 0xb63   :  { %v3784_v52 = vadd.f32 %v3390_v51, %v1057_v46  ;;  %v3033_v53 = vpop.f32.mrb[26].mxu0 }
 0xb64   :  { %v1060_v55 = vpop.f32.mrb[27].mxu0  ;;  %v1077_v0 = vmul.f32 %v3779_v50, %v3779_v50 }
 0xb65   :  { %v3789_v58 = vadd.f32 %v3391_v57, %v1060_v55  ;;  %v1075_v61 = vmul.f32 %v3784_v52, %v3784_v52 }
 0xb66   :  { %v1084_v1 = vsel %vm70_vm1, %v1077_v0, 0.0 }
 0xb67   :  { %v1078_v62 = vsel %vm63_vm0, %v1075_v61, 0.0  ;;  %v1076_v63 = vmul.f32 %v3789_v58, %v3789_v58 }
 0xb68   :  { %1079 = vadd.xlane.f32.xlu0 %v1078_v62 }
 0xb69   :  { %v1081_v33 = vsel %vm63_vm0, %v1076_v63, 0.0 }
 0xb6a   :  { %1082 = vadd.xlane.f32.xlu1 %v1081_v33 }
 0xb6c   :  { %1085 = vadd.xlane.f32.xlu0 %v1084_v1 }
 0xbf5   :  { %v1080_v5 = vpop.xlane.xlu0 %1079 }
 0xbf6   :  { %v1087_v41 = vmul.f32 0.03125, %v1080_v5 }
 0xbf7   :  { %v1083_v6 = vpop.xlane.xlu1 %1082 }
 0xbf8   :  { %v1090_v7 = vadd.f32 1e-06, %v1087_v41  ;;  %v1088_v8 = vmul.f32 0.03125, %v1083_v6 }
 0xbf9   :  { %v1086_v44 = vpop.xlane.xlu0 %1085 }
 0xbfa   :  { %3281 = vrsqrt.f32 %v1090_v7  ;;  %v1091_v11 = vadd.f32 1e-06, %v1088_v8  ;;  %v1089_v12 = vmul.f32 0.03125, %v1086_v44 }
 0xbfc   :  { %3283 = vrsqrt.f32 %v1091_v11  ;;  %v1092_v30 = vadd.f32 1e-06, %v1089_v12 }
 0xbfe   :  { %3285 = vrsqrt.f32 %v1092_v30 }
 0xc04   :  { %v3282_v29 = vpop.eup %3281 }
 0xc05   :  { %v1096_v38 = vmul.f32 %v3282_v29, %v3784_v52 }
 0xc06   :  { %v3284_v32 = vpop.eup %3283 }
 0xc07   :  { %v1097_v14 = vmul.f32 %v3284_v32, %v3789_v58  ;;  %v1105_v9 = vmul.f32 %v2787_v13, %v1096_v38 }
 0xc08   :  { %v3286_v4 = vpop.eup %3285 }
 0xc09   :  { %v1098_v15 = vmul.f32 %v3286_v4, %v3779_v50  ;;  %v1106_v20 = vmul.f32 %v2787_v13, %v1097_v14  ;;  %v3214_v14 = vld [vmem:[%s4217_s3 + $0x30] ss:$8 sps:$4 sm:$0xff]   ;;  %v3216_v4 = vld [vmem:[%s4217_s3 + $0x34] ss:$8 sps:$4 sm:$0xff]  }
 0xc0b   :  { %v1108_v16 = vpack.c.bf16 %v1106_v20, %v1105_v9  ;;  %v1107_v19 = vmul.f32 %v2787_v13, %v1098_v15  ;;  %v3211_v13 = vld [vmem:[%s4217_s3 + $0x20] ss:$8 sps:$4 sm:$0xff]  }
 0xc0d   :  { %3038 = vmatprep.mubr.msk.bf16.mxu1 %vm63_vm0, %v1108_v16  ;;  %v1109_v21 = vpack.c.bf16 %v1107_v19, %v1107_v19 }
 0xc0f   :  { %3039 = vmatmul.mubr.msk.bf16.vlgmr.msra.gmra.mrb[16].mxu1 %vm63_vm0, %v1109_v21 }
 0xc10   :  { %1408 = vmatprep.mubr.bf16.mxu1 %v3401_v10 }
 0xce2   :  { %v3040_v24 = vpop.f32.mrb[16].mxu1 }
 0xce3   :  { %v1166_v25 = vpop.f32.mrb[17].mxu1  ;;  %v1182_v35 = vsub.f32 0.0, %v3040_v24 }
 0xce4   :  { %1204 = vrot.lane.b32.xlu0 %v1166_v25, %s3406_s21  ;;  %v3041_v26 = vpop.f32.mrb[18].mxu1  ;;  %v1180_v28 = vsub.f32 0.0, %v1166_v25 }
 0xce5   :  { %v1169_v27 = vpop.f32.mrb[19].mxu1  ;;  %v1187_v39 = vmul.f32 1.442695, %v1182_v35  ;;  %v2799_v26 = vld [vmem:[%s4220_s1 + $0x1] ss:$0 sm:$0xff] }
 0xce6   :  { %1206 = vrot.lane.b32.xlu1 %v1169_v27, %s3406_s21  ;;  %v1181_v31 = vsub.f32 0.0, %v1169_v27  ;;  %v1183_v34 = vmul.f32 1.442695, %v1180_v28 }
 0xce8   :  { %v1185_v36 = vmul.f32 1.442695, %v1181_v31  ;;  %3287 = vpow2.f32 %v1183_v34 }
 0xcea   :  { %1208 = vrot.lane.b32.xlu1 %v3040_v24, %s3406_s21  ;;  %3289 = vpow2.f32 %v1185_v36 }
 0xceb   :  { %3291 = vpow2.f32 %v1187_v39 }
 0xcf2   :  { %v3288_v40 = vpop.eup %3287 }
 0xcf3   :  { %v1189_v49 = vadd.f32 1.0, %v3288_v40 }
 0xcf4   :  { %v3290_v42 = vpop.eup %3289 }
 0xcf5   :  { %v1190_v43 = vadd.f32 1.0, %v3290_v42  ;;  %v3292_v45 = vpop.eup %3291  ;;  %3293 = vrcp.f32 %v1189_v49 }
 0xcf6   :  { %v1191_v46 = vadd.f32 1.0, %v3292_v45 }
 0xcf7   :  { %3295 = vrcp.f32 %v1190_v43  ;;  %v3392_v43 = vld [vmem:[%s4218_s8] sm:$0xff] }
 0xcf8   :  { %3297 = vrcp.f32 %v1191_v46 }
 0xcff   :  { %v3294_v47 = vpop.eup %3293 }
 0xd00   :  { %v1198_v55 = vmul.f32 %v3294_v47, %v1166_v25 }
 0xd01   :  { %v3296_v51 = vpop.eup %3295 }
 0xd02   :  { %v1199_v57 = vmul.f32 %v3296_v51, %v1169_v27  ;;  %v3298_v61 = vpop.eup %3297 }
 0xd03   :  { %v1200_v1 = vmul.f32 %v3298_v61, %v3040_v24  ;;  %v3394_v61 = vld [vmem:[%s4218_s8 + $0x10] sm:$0x3] }
 0xd56   :  { %v1205_v53 = vpop.permute.xlu0 %1204 }
 0xd57   :  { %v1213_v63 = vmul.f32 %v1205_v53, %v1198_v55  ;;  %v3393_v53 = vld [vmem:[%s4218_s8 + $0x8] sm:$0xff]  ;;  %s4248_s8 = smov 24  }
 0xd58   :  { %v1207_v62 = vpop.permute.xlu1 %1206 }
 0xd59   :  { %v1214_v0 = vmul.f32 %v1207_v62, %v1199_v57 }
 0xd5b   :  { %v1216_v33 = vpack.c.bf16 %v1214_v0, %v1213_v63 }
 0xd5c   :  { %v1209_v2 = vpop.permute.xlu1 %1208 }
 0xd5d   :  { %v1215_v37 = vmul.f32 %v1209_v2, %v1200_v1  ;;  %3050 = vmatprep.mubr.msk.bf16.mxu0 %vm1250_vm13, %v1216_v33 }
 0xd5f   :  { %v1217_v5 = vpack.c.bf16 %v1215_v37, %v1215_v37 }
 0xd61   :  { %3051 = vmatmul.mubr.msk.bf16.vlgmr.msra.gmra.mrb[28].mxu0 %vm1250_vm13, %v1217_v5 }
 0xe34   :  { %v3052_v41 = vpop.f32.mrb[28].mxu0 }
 0xe35   :  { %v1291_v6 = vpop.f32.mrb[29].mxu0  ;;  %v3833_v7 = vadd.f32 %v3052_v41, %v3779_v50 }
 0xe36   :  { %v3836_v8 = vadd.f32 %v1291_v6, %v3784_v52  ;;  %v3053_v44 = vpop.f32.mrb[30].mxu0 }
 0xe37   :  { %v1294_v11 = vpop.f32.mrb[31].mxu0  ;;  %v1312_v50 = vmul.f32 %v3833_v7, %v3833_v7 }
 0xe38   :  { %v3839_v12 = vadd.f32 %v1294_v11, %v3789_v58  ;;  %v1310_v30 = vmul.f32 %v3836_v8, %v3836_v8  ;;  %v3213_v58 = vld [vmem:[%s4217_s3 + $0x24] ss:$8 sps:$4 sm:$0xff]  }
 0xe39   :  { %v1319_v32 = vsel %vm70_vm1, %v1312_v50, 0.0  ;;  %1376 = vmatprep.subr.bf16.mxu1 %v3213_v58 }
 0xe3a   :  { %v1313_v29 = vsel %vm63_vm0, %v1310_v30, 0.0  ;;  %v1311_v38 = vmul.f32 %v3839_v12, %v3839_v12  ;;  %1377 = vmatpush1.bf16.msra.mxu1 %v3211_v13  ;;  %v3396_v13 = vld [vmem:[%s4219_s7 + $0x10] sm:$0x3] }
 0xe3b   :  { %1314 = vadd.xlane.f32.xlu0 %v1313_v29  ;;  %1378 = vmatprep.subr.bf16.mxu1 %v3216_v4  ;;  %v3397_v4 = vld [vmem:[%s4219_s7 + $0x8] sm:$0xff] }
 0xe3c   :  { %v1316_v52 = vsel %vm63_vm0, %v1311_v38, 0.0 }
 0xe3d   :  { %1317 = vadd.xlane.f32.xlu1 %v1316_v52 }
 0xe3e   :  { %1379 = vmatpush1.bf16.msra.mxu1 %v3214_v14 }
 0xe3f   :  { %1320 = vadd.xlane.f32.xlu0 %v1319_v32 }
 0xec8   :  { %v1315_v15 = vpop.xlane.xlu0 %1314 }
 0xec9   :  { %v1322_v9 = vmul.f32 0.03125, %v1315_v15 }
 0xeca   :  { %v1318_v20 = vpop.xlane.xlu1 %1317 }
 0xecb   :  { %v1325_v16 = vadd.f32 1e-06, %v1322_v9  ;;  %v1323_v19 = vmul.f32 0.03125, %v1318_v20 }
 0xecc   :  { %v1321_v21 = vpop.xlane.xlu0 %1320 }
 0xecd   :  { %3299 = vrsqrt.f32 %v1325_v16  ;;  %v1326_v17 = vadd.f32 1e-06, %v1323_v19  ;;  %v1324_v18 = vmul.f32 0.03125, %v1321_v21 }
 0xecf   :  { %3301 = vrsqrt.f32 %v1326_v17  ;;  %v1327_v22 = vadd.f32 1e-06, %v1324_v18 }
 0xed1   :  { %3303 = vrsqrt.f32 %v1327_v22 }
 0xed7   :  { %v3300_v23 = vpop.eup %3299 }
 0xed8   :  { %v1331_v24 = vmul.f32 %v3300_v23, %v3836_v8 }
 0xed9   :  { %v3302_v25 = vpop.eup %3301 }
 0xeda   :  { %v1332_v27 = vmul.f32 %v3302_v25, %v3839_v12  ;;  %v1340_v31 = vmul.f32 %v2799_v26, %v1331_v24 }
 0xedb   :  { %v3304_v28 = vpop.eup %3303 }
 0xedc   :  { %v1341_v34 = vmul.f32 %v2799_v26, %v1332_v27  ;;  %v1333_v36 = vmul.f32 %v3304_v28, %v3833_v7  ;;  %v3931_v28 = vld [vmem:[%s4221_s9] sm:$0xff] }
 0xede   :  { %v1343_v35 = vpack.c.bf16 %v1341_v34, %v1340_v31  ;;  %v1342_v39 = vmul.f32 %v2799_v26, %v1333_v36 }
 0xee0   :  { %2808 = vmatmul.mubr.msk.bf16.vlgmr.msra.gmra.mrb[20].mxu1 %vm63_vm0, %v1343_v35  ;;  %v1344_v40 = vpack.c.bf16 %v1342_v39, %v1342_v39  ;;  %v3938_v35 = vld [vmem:[%s4221_s9 + $0x8] sm:$0xff] }
 0xee1   :  { %1418 = vmatprep.mubr.bf16.mxu1 %v3401_v10 }
 0xee8   :  { %2809 = vmatmul.mubr.msk.bf16.gmra.mrb[24].mxu1 %vm63_vm0, %v1344_v40  ;;  %v3945_v40 = vld [vmem:[%s4221_s9 + $0x10] sm:$0x3]  ;;  %s4243_s9 = smov 72  }
 0xfb3   :  { %v1410_v42 = vpop.f32.mrb[20].mxu1 }
 0xfb4   :  { %v1412_v49 = vpop.f32.mrb[21].mxu1  ;;  %v1448_v1 = vmul.f32 %v1410_v42, %v3576_v59  ;;  %v1430_v29 = vmul.f32 %v1410_v42, %v3559_v48 }
 0xfb5   :  { %v1451_v45 = vmul.f32 %v3392_v43, %v1412_v49  ;;  %v1414_v46 = vpop.f32.mrb[22].mxu1 }
 0xfb6   :  { %v3874_v47 = vpack.c.bf16 %v1414_v46, %v1410_v42  ;;  %v1416_v51 = vpop.f32.mrb[23].mxu1  ;;  %v1449_v2 = vmul.f32 %v1414_v46, %v3578_v60  ;;  %v1431_v60 = vmul.f32 %v1414_v46, %v3565_v54  ;;  %v1428_v15 = vmul.f32 %v3397_v4, %v1414_v46 }
 0xfb7   :  { %v1452_v10 = vmul.f32 %v3393_v53, %v1416_v51  ;;  %1457 = vrot.lane.b32.xlu0 %v1451_v45, %s3403_s20 }
 0xfb9   :  { %1459 = vrot.lane.b32.xlu1 %v1452_v10, %s3403_s20 }
 0xfbb   :  { %v3881_v55 = vpop.f32.mrb[24].mxu1 }
 0xfbc   :  { %v1422_v57 = vpop.f32.mrb[25].mxu1  ;;  %v1450_v44 = vmul.f32 %v3881_v55, %v3582_v3  ;;  %v1432_v59 = vmul.f32 %v3881_v55, %v3569_v56  ;;  %v3395_v56 = vld [vmem:[%s4219_s7] sm:$0xff]  ;;  %v1429_v14 = vmul.f32 %v3396_v13, %v3881_v55 }
 0xfbd   :  { %v1453_v62 = vmul.f32 %v3394_v61, %v1422_v57  ;;  %v1424_v63 = vpop.f32.mrb[26].mxu1  ;;  %v1427_v58 = vmul.f32 %v3395_v56, %v1410_v42 }
 0xfbe   :  { %v1425_v0 = vpop.f32.mrb[27].mxu1 }
 0xfbf   :  { %1461 = vrot.lane.b32.xlu1 %v1453_v62, %s3403_s20 }
0x1029   :  { %v1458_v33 = vpop.permute.xlu0 %1457 }
0x102a   :  { %v1466_v5 = vadd.f32 %v1458_v33, %v1448_v1 }
0x102b   :  { %v1460_v37 = vpop.permute.xlu1 %1459 }
0x102c   :  { %v1467_v41 = vadd.f32 %v1460_v37, %v1449_v2 }
0x102e   :  { %v3889_v6 = vpack.c.bf16 %v1467_v41, %v1466_v5  ;;  %v3962_v41 = vpack.c.bf16 %v3881_v55, %v3881_v55 }
0x1030   :  { %1477 = vrot.lane.b32.xlu0 %v3889_v6, %s3402_s29 }
0x1031   :  { %v1462_v11 = vpop.permute.xlu1 %1461 }
0x1032   :  { %v1468_v30 = vadd.f32 %v1462_v11, %v1450_v44 }
0x1034   :  { %v3896_v38 = vpack.c.bf16 %v1468_v30, %v1468_v30  ;;  %1436 = vrot.lane.b32.xlu0 %v1430_v29, %s3403_s20 }
0x1036   :  { %1479 = vrot.lane.b32.xlu1 %v3896_v38, %s3402_s29 }
0x1038   :  { %1440 = vrot.lane.b32.xlu0 %v1432_v59, %s3403_s20 }
0x103a   :  { %1438 = vrot.lane.b32.xlu1 %v1431_v60, %s3403_s20 }
0x10a2   :  { %v1478_v3 = vpop.permute.xlu0 %1477 }
0x10a3   :  { %v1488_v50 = vsel %vm257_vm2, %v1478_v3, 0  ;;  %3166 = vmatprep.subr.msk.bf16.mxu1 %vm257_vm2, %v1478_v3 }
0x10a4   :  { %3055 = vmatpush3.bf16.xpose.msra.mxu1 %v1488_v50 }
0x10a6   :  { %v1437_v48 = vpop.permute.xlu0 %1436 }
0x10a7   :  { %v1445_v20 = vadd.f32 %v1437_v48, %v1427_v58 }
0x10a8   :  { %v1480_v52 = vpop.permute.xlu1 %1479 }
0x10a9   :  { %3167 = vmatprep.subr.msk.bf16.mxu1 %vm257_vm2, %v1480_v52  ;;  %v1491_v54 = vsel %vm257_vm2, %v1480_v52, 0 }
0x10aa   :  { %v1441_v32 = vpop.permute.xlu0 %1440 }
0x10ab   :  { %v1447_v16 = vadd.f32 %v1441_v32, %v1429_v14 }
0x10ac   :  { %3057 = vmatpush3.bf16.xpose.msra.mxu1 %v1491_v54  ;;  %v1439_v9 = vpop.permute.xlu1 %1438 }
0x10ad   :  { %v1446_v19 = vadd.f32 %v1439_v9, %v1428_v15  ;;  %v3922_v17 = vpack.c.bf16 %v1447_v16, %v1447_v16 }
0x10af   :  { %v3920_v21 = vpack.c.bf16 %v1446_v19, %v1445_v20 }
0x10b1   :  { %3058 = vmatprep.mubr.msk.bf16.mxu1 %vm257_vm2, %v3920_v21 }
0x10b3   :  { %3059 = vmatmul.mubr.msk.bf16.vlgmr.msra.gmra.mrb[28].mxu1 %vm257_vm2, %v3922_v17 }
0x1186   :  { %v3060_v18 = vpop.f32.mrb[28].mxu1 }
0x1187   :  { %v1527_v22 = vpop.f32.mrb[29].mxu1  ;;  %v1543_v26 = vmul.f32 0.35355338, %v3060_v18 }
0x1188   :  { %v1541_v23 = vmul.f32 0.35355338, %v1527_v22  ;;  %v3061_v24 = vpop.f32.mrb[30].mxu1 }
0x1189   :  { %v1530_v25 = vpop.f32.mrb[31].mxu1  ;;  %v1546_v42 = vadd.f32 %v3945_v40, %v1543_v26 }
0x118a   :  { %v1542_v27 = vmul.f32 0.35355338, %v1530_v25  ;;  %v1544_v31 = vadd.f32 %v3931_v28, %v1541_v23 }
0x118b   :  { %v1553_v49 = vsel %vm331_vm4, %v1546_v42, -inf }
0x118c   :  { %v1547_v34 = vsel %vm324_vm3, %v1544_v31, -inf  ;;  %v1545_v36 = vadd.f32 %v3938_v35, %v1542_v27 }
0x118d   :  { %1548 = vmax.xlane.f32.xlu1 %v1547_v34 }
0x118e   :  { %v1550_v39 = vsel %vm324_vm3, %v1545_v36, -inf }
0x118f   :  { %1551 = vmax.xlane.f32.xlu0 %v1550_v39 }
0x1193   :  { %1554 = vmax.xlane.f32.xlu0 %v1553_v49 }
0x119e   :  { %1584 = vrot.lane.b32.xlu1 %v3874_v47, %s3406_s21 }
0x121a   :  { %v1549_v43 = vpop.xlane.xlu1 %1548 }
0x121b   :  { %v1556_v53 = vsub.f32 %v1544_v31, %v1549_v43 }
0x121c   :  { %v1552_v45 = vpop.xlane.xlu0 %1551 }
0x121d   :  { %v1557_v46 = vsub.f32 %v1545_v36, %v1552_v45  ;;  %v1559_v62 = vmul.f32 1.442695, %v1556_v53 }
0x121e   :  { %v1585_v51 = vpop.permute.xlu1 %1584 }
0x121f   :  { %v1561_v10 = vmul.f32 1.442695, %v1557_v46  ;;  %3062 = vmatprep.subr.bf16.mxu0 %v1585_v51 }
0x1220   :  { %3063 = vmatpush3.bf16.msra.mxu0 %v1585_v51  ;;  %v1555_v57 = vpop.xlane.xlu0 %1554 }
0x1221   :  { %3305 = vpow2.f32 %v1561_v10  ;;  %v1558_v61 = vsub.f32 %v1546_v42, %v1555_v57 }
0x1223   :  { %v1563_v63 = vmul.f32 1.442695, %v1558_v61 }
0x1225   :  { %3307 = vpow2.f32 %v1563_v63 }
0x1226   :  { %3309 = vpow2.f32 %v1559_v62 }
0x122b   :  { %v3306_v0 = vpop.eup %3305 }
0x122c   :  { %v1568_v33 = vsel %vm324_vm3, %v3306_v0, 0.0 }
0x122d   :  { %1569 = vadd.xlane.f32.xlu1 %v1568_v33 }
0x122f   :  { %v3308_v1 = vpop.eup %3307 }
0x1230   :  { %v1571_v2 = vsel %vm331_vm4, %v3308_v1, 0.0  ;;  %v3310_v37 = vpop.eup %3309 }
0x1231   :  { %1572 = vadd.xlane.f32.xlu0 %v1571_v2  ;;  %v1565_v5 = vsel %vm324_vm3, %v3310_v37, 0.0 }
0x1235   :  { %1566 = vadd.xlane.f32.xlu0 %v1565_v5 }
0x123e   :  { %1655 = vrot.lane.b32.xlu1 %v3889_v6, %s3404_s27 }
0x1242   :  { %1657 = vrot.lane.b32.xlu1 %v3896_v38, %s3404_s27  ;;  %s4244_s27 = smov 104  }
0x1246   :  { %1651 = vrot.lane.b32.xlu1 %v3920_v21, %s3405_s28 }
0x124b   :  { %1586 = vrot.lane.b32.xlu0 %v3962_v41, %s3406_s21 }
0x124f   :  { %1653 = vrot.lane.b32.xlu0 %v3922_v17, %s3405_s28  ;;  %s4245_s28 = smov 40  }
0x12ba   :  { %v1570_v44 = vpop.xlane.xlu1 %1569 }
0x12be   :  { %v1573_v11 = vpop.xlane.xlu0 %1572  ;;  %v1656_v59 = vpop.permute.xlu1 %1655 }
0x12bf   :  { %3311 = vrcp.f32 %v1573_v11  ;;  %v1666_v13 = vsel %vm257_vm2, %v1656_v59, 0 }
0x12c0   :  { %3313 = vrcp.f32 %v1570_v44 }
0x12c2   :  { %v1567_v30 = vpop.xlane.xlu0 %1566  ;;  %v1658_v52 = vpop.permute.xlu1 %1657 }
0x12c3   :  { %3315 = vrcp.f32 %v1567_v30  ;;  %v1669_v4 = vsel %vm257_vm2, %v1658_v52, 0 }
0x12c6   :  { %v1587_v29 = vpop.permute.xlu0 %1586  ;;  %v1652_v14 = vpop.permute.xlu1 %1651 }
0x12c7   :  { %v1596_v60 = vsel %vm374_vm5, %v1587_v29, 0  ;;  %3168 = vmatprep.subr.msk.bf16.mxu0 %vm374_vm5, %v1587_v29 }
0x12c8   :  { %3065 = vmatpush3.bf16.msra.mxu0 %v1596_v60 }
0x12c9   :  { %3169 = vmatprep.subr.msk.bf16.mxu0 %vm257_vm2, %v1656_v59  ;;  %v3312_v55 = vpop.eup %3311 }
0x12ca   :  { %v3314_v3 = vpop.eup %3313  ;;  %v1579_v48 = vmul.f32 %v3312_v55, %v3308_v1  ;;  %v1654_v15 = vpop.permute.xlu0 %1653 }
0x12cb   :  { %v1578_v56 = vmul.f32 %v3314_v3, %v3306_v0 }
0x12cc   :  { %v1581_v54 = vpack.c.bf16 %v1579_v48, %v1579_v48 }
0x12cd   :  { %v3316_v50 = vpop.eup %3315 }
0x12ce   :  { %v1577_v32 = vmul.f32 %v3316_v50, %v3310_v37 }
0x12d0   :  { %v1580_v58 = vpack.c.bf16 %v1578_v56, %v1577_v32 }
0x12d2   :  { %3066 = vmatprep.mubr.msk.bf16.mxu0 %vm324_vm3, %v1580_v58 }
0x12d3   :  { %3067 = vmatmul.mubr.msk.bf16.vlgmr.msra.gmra.mrb[32].mxu0 %vm324_vm3, %v1581_v54 }
0x12d4   :  { %3071 = vmatpush3.bf16.xpose.msra.mxu0 %v1666_v13  ;;  %3074 = vmatprep.mubr.msk.bf16.mxu0 %vm257_vm2, %v1652_v14 }
0x12d5   :  { %3170 = vmatprep.subr.msk.bf16.mxu0 %vm257_vm2, %v1658_v52 }
0x12dc   :  { %3073 = vmatpush3.bf16.xpose.msra.mxu0 %v1669_v4 }
0x12e3   :  { %3075 = vmatmul.mubr.msk.bf16.vlgmr.msra.gmra.mrb[36].mxu0 %vm257_vm2, %v1654_v15 }
0x13a6   :  { %v3068_v9 = vpop.f32.mrb[32].mxu0 }
0x13a7   :  { %1648 = vst.msk [vmem:[#allocation2 + $0x10] sm:$0x3] %vm428_vm6, %v3068_v9  ;;  %v1632_v20 = vpop.f32.mrb[33].mxu0 }
0x13a8   :  { %1646 = vst.msk [vmem:[#allocation2] sm:$0xff] %vm257_vm2, %v1632_v20  ;;  %v3069_v16 = vpop.f32.mrb[34].mxu0 }
0x13a9   :  { %v1635_v19 = vpop.f32.mrb[35].mxu0 }
0x13aa   :  { %1647 = vst.msk [vmem:[#allocation2 + $0x8] sm:$0xff] %vm257_vm2, %v1635_v19 }
0x13b6   :  { %v3076_v18 = vpop.f32.mrb[36].mxu0 }
0x13b7   :  { %v1705_v22 = vpop.f32.mrb[37].mxu0  ;;  %v1721_v26 = vmul.f32 0.35355338, %v3076_v18 }
0x13b8   :  { %v1719_v23 = vmul.f32 0.35355338, %v1705_v22  ;;  %v3077_v24 = vpop.f32.mrb[38].mxu0 }
0x13b9   :  { %v1708_v25 = vpop.f32.mrb[39].mxu0  ;;  %v1724_v39 = vadd.f32 %v3945_v40, %v1721_v26 }
0x13ba   :  { %v1722_v27 = vadd.f32 %v3931_v28, %v1719_v23  ;;  %v1720_v31 = vmul.f32 0.35355338, %v1708_v25 }
0x13bb   :  { %v1731_v49 = vsel %vm331_vm4, %v1724_v39, -inf }
0x13bc   :  { %v1723_v34 = vadd.f32 %v3938_v35, %v1720_v31  ;;  %v1725_v36 = vsel %vm324_vm3, %v1722_v27, -inf }
0x13bd   :  { %1726 = vmax.xlane.f32.xlu1 %v1725_v36 }
0x13be   :  { %v1728_v42 = vsel %vm324_vm3, %v1723_v34, -inf }
0x13bf   :  { %1729 = vmax.xlane.f32.xlu0 %v1728_v42 }
0x13c3   :  { %1732 = vmax.xlane.f32.xlu0 %v1731_v49 }
0x13ce   :  { %1760 = vrot.lane.b32.xlu1 %v3874_v47, %s3407_s22 }
0x144a   :  { %v1727_v43 = vpop.xlane.xlu1 %1726 }
0x144b   :  { %v1734_v53 = vsub.f32 %v1722_v27, %v1727_v43 }
0x144c   :  { %v1730_v45 = vpop.xlane.xlu0 %1729 }
0x144d   :  { %v1735_v46 = vsub.f32 %v1723_v34, %v1730_v45  ;;  %v1737_v62 = vmul.f32 1.442695, %v1734_v53 }
0x144e   :  { %v1761_v51 = vpop.permute.xlu1 %1760 }
0x144f   :  { %v1739_v10 = vmul.f32 1.442695, %v1735_v46  ;;  %3078 = vmatprep.subr.bf16.mxu1 %v1761_v51 }
0x1450   :  { %3079 = vmatpush3.bf16.msra.mxu1 %v1761_v51  ;;  %v1733_v57 = vpop.xlane.xlu0 %1732 }
0x1451   :  { %3317 = vpow2.f32 %v1739_v10  ;;  %v1736_v61 = vsub.f32 %v1724_v39, %v1733_v57 }
0x1453   :  { %v1741_v63 = vmul.f32 1.442695, %v1736_v61 }
0x1455   :  { %3319 = vpow2.f32 %v1741_v63 }
0x1456   :  { %3321 = vpow2.f32 %v1737_v62 }
0x145b   :  { %v3318_v0 = vpop.eup %3317 }
0x145c   :  { %v1746_v33 = vsel %vm324_vm3, %v3318_v0, 0.0 }
0x145d   :  { %1747 = vadd.xlane.f32.xlu1 %v1746_v33 }
0x145f   :  { %v3320_v1 = vpop.eup %3319 }
0x1460   :  { %v1749_v2 = vsel %vm331_vm4, %v3320_v1, 0.0  ;;  %v3322_v37 = vpop.eup %3321 }
0x1461   :  { %1750 = vadd.xlane.f32.xlu0 %v1749_v2  ;;  %v1743_v5 = vsel %vm324_vm3, %v3322_v37, 0.0 }
0x1465   :  { %1744 = vadd.xlane.f32.xlu0 %v1743_v5 }
0x146e   :  { %1841 = vrot.lane.b32.xlu1 %v3889_v6, %s3408_s23 }
0x1472   :  { %1843 = vrot.lane.b32.xlu1 %v3896_v38, %s3408_s23  ;;  %s4247_s23 = smov 16  }
0x1476   :  { %1837 = vrot.lane.b32.xlu1 %v3920_v21, %s3409_s24 }
0x147b   :  { %1762 = vrot.lane.b32.xlu0 %v3962_v41, %s3407_s22  ;;  %s4246_s22 = smov 8  }
0x147f   :  { %1839 = vrot.lane.b32.xlu0 %v3922_v17, %s3409_s24 }
0x14ea   :  { %v1748_v44 = vpop.xlane.xlu1 %1747 }
0x14ee   :  { %v1751_v11 = vpop.xlane.xlu0 %1750  ;;  %v1842_v59 = vpop.permute.xlu1 %1841 }
0x14ef   :  { %3323 = vrcp.f32 %v1751_v11  ;;  %v1852_v13 = vsel %vm257_vm2, %v1842_v59, 0 }
0x14f0   :  { %3325 = vrcp.f32 %v1748_v44 }
0x14f2   :  { %v1745_v30 = vpop.xlane.xlu0 %1744  ;;  %v1844_v52 = vpop.permute.xlu1 %1843 }
0x14f3   :  { %3327 = vrcp.f32 %v1745_v30  ;;  %v1855_v4 = vsel %vm257_vm2, %v1844_v52, 0 }
0x14f6   :  { %v1763_v29 = vpop.permute.xlu0 %1762  ;;  %v1838_v14 = vpop.permute.xlu1 %1837 }
0x14f7   :  { %v1772_v60 = vsel %vm374_vm5, %v1763_v29, 0  ;;  %3171 = vmatprep.subr.msk.bf16.mxu1 %vm374_vm5, %v1763_v29 }
0x14f8   :  { %3081 = vmatpush3.bf16.msra.mxu1 %v1772_v60 }
0x14f9   :  { %3172 = vmatprep.subr.msk.bf16.mxu1 %vm257_vm2, %v1842_v59  ;;  %v3324_v55 = vpop.eup %3323 }
0x14fa   :  { %v3326_v3 = vpop.eup %3325  ;;  %v1757_v48 = vmul.f32 %v3324_v55, %v3320_v1  ;;  %v1840_v15 = vpop.permute.xlu0 %1839 }
0x14fb   :  { %v1756_v56 = vmul.f32 %v3326_v3, %v3318_v0 }
0x14fc   :  { %v1759_v54 = vpack.c.bf16 %v1757_v48, %v1757_v48 }
0x14fd   :  { %v3328_v50 = vpop.eup %3327 }
0x14fe   :  { %v1755_v32 = vmul.f32 %v3328_v50, %v3322_v37 }
0x1500   :  { %v1758_v58 = vpack.c.bf16 %v1756_v56, %v1755_v32 }
0x1502   :  { %3082 = vmatprep.mubr.msk.bf16.mxu1 %vm324_vm3, %v1758_v58 }
0x1503   :  { %3083 = vmatmul.mubr.msk.bf16.vlgmr.msra.gmra.mrb[32].mxu1 %vm324_vm3, %v1759_v54 }
0x1504   :  { %3087 = vmatpush3.bf16.xpose.msra.mxu1 %v1852_v13  ;;  %3090 = vmatprep.mubr.msk.bf16.mxu1 %vm257_vm2, %v1838_v14 }
0x1505   :  { %3173 = vmatprep.subr.msk.bf16.mxu1 %vm257_vm2, %v1844_v52 }
0x150c   :  { %3089 = vmatpush3.bf16.xpose.msra.mxu1 %v1855_v4 }
0x1513   :  { %3091 = vmatmul.mubr.msk.bf16.vlgmr.msra.gmra.mrb[36].mxu1 %vm257_vm2, %v1840_v15 }
0x15d6   :  { %v4012_v9 = vpop.f32.mrb[32].mxu1 }
0x15d7   :  { %v4014_v20 = vpop.f32.mrb[33].mxu1 }
0x15d8   :  { %v3085_v16 = vpop.f32.mrb[34].mxu1 }
0x15d9   :  { %v4016_v19 = vpop.f32.mrb[35].mxu1 }
0x15e6   :  { %v3092_v18 = vpop.f32.mrb[36].mxu1 }
0x15e7   :  { %v1891_v22 = vpop.f32.mrb[37].mxu1  ;;  %v1907_v26 = vmul.f32 0.35355338, %v3092_v18 }
0x15e8   :  { %v1905_v23 = vmul.f32 0.35355338, %v1891_v22  ;;  %v3093_v24 = vpop.f32.mrb[38].mxu1 }
0x15e9   :  { %v1894_v25 = vpop.f32.mrb[39].mxu1  ;;  %v1910_v39 = vadd.f32 %v3945_v40, %v1907_v26 }
0x15ea   :  { %v1908_v27 = vadd.f32 %v3931_v28, %v1905_v23  ;;  %v1906_v31 = vmul.f32 0.35355338, %v1894_v25 }
0x15eb   :  { %v1917_v49 = vsel %vm331_vm4, %v1910_v39, -inf }
0x15ec   :  { %v1909_v34 = vadd.f32 %v3938_v35, %v1906_v31  ;;  %v1911_v36 = vsel %vm324_vm3, %v1908_v27, -inf }
0x15ed   :  { %1912 = vmax.xlane.f32.xlu1 %v1911_v36 }
0x15ee   :  { %v1914_v42 = vsel %vm324_vm3, %v1909_v34, -inf }
0x15ef   :  { %1915 = vmax.xlane.f32.xlu0 %v1914_v42 }
0x15f3   :  { %1918 = vmax.xlane.f32.xlu0 %v1917_v49 }
0x15fe   :  { %1946 = vrot.lane.b32.xlu1 %v3874_v47, %s3410_s25 }
0x167a   :  { %v1913_v43 = vpop.xlane.xlu1 %1912 }
0x167b   :  { %v1920_v53 = vsub.f32 %v1908_v27, %v1913_v43 }
0x167c   :  { %v1916_v45 = vpop.xlane.xlu0 %1915 }
0x167d   :  { %v1921_v46 = vsub.f32 %v1909_v34, %v1916_v45  ;;  %v1923_v62 = vmul.f32 1.442695, %v1920_v53 }
0x167e   :  { %v1947_v51 = vpop.permute.xlu1 %1946 }
0x167f   :  { %v1925_v10 = vmul.f32 1.442695, %v1921_v46  ;;  %3094 = vmatprep.subr.bf16.mxu0 %v1947_v51 }
0x1680   :  { %3095 = vmatpush3.bf16.msra.mxu0 %v1947_v51  ;;  %v1919_v57 = vpop.xlane.xlu0 %1918 }
0x1681   :  { %3329 = vpow2.f32 %v1925_v10  ;;  %v1922_v61 = vsub.f32 %v1910_v39, %v1919_v57 }
0x1683   :  { %v1927_v63 = vmul.f32 1.442695, %v1922_v61 }
0x1685   :  { %3331 = vpow2.f32 %v1927_v63 }
0x1686   :  { %3333 = vpow2.f32 %v1923_v62 }
0x168b   :  { %v3330_v0 = vpop.eup %3329 }
0x168c   :  { %v1932_v33 = vsel %vm324_vm3, %v3330_v0, 0.0 }
0x168d   :  { %1933 = vadd.xlane.f32.xlu1 %v1932_v33 }
0x168f   :  { %v3332_v1 = vpop.eup %3331 }
0x1690   :  { %v1935_v2 = vsel %vm331_vm4, %v3332_v1, 0.0  ;;  %v3334_v37 = vpop.eup %3333 }
0x1691   :  { %1936 = vadd.xlane.f32.xlu0 %v1935_v2  ;;  %v1929_v5 = vsel %vm324_vm3, %v3334_v37, 0.0 }
0x1695   :  { %1930 = vadd.xlane.f32.xlu0 %v1929_v5 }
0x169e   :  { %2027 = vrot.lane.b32.xlu1 %v3889_v6, %s4243_s9 }
0x16a2   :  { %2029 = vrot.lane.b32.xlu1 %v3896_v38, %s4243_s9 }
0x16a6   :  { %2023 = vrot.lane.b32.xlu1 %v3920_v21, %s4244_s27 }
0x16ab   :  { %1948 = vrot.lane.b32.xlu0 %v3962_v41, %s3410_s25 }
0x16af   :  { %2025 = vrot.lane.b32.xlu0 %v3922_v17, %s4244_s27 }
0x171a   :  { %v1934_v44 = vpop.xlane.xlu1 %1933 }
0x171e   :  { %v1937_v11 = vpop.xlane.xlu0 %1936  ;;  %v2028_v6 = vpop.permute.xlu1 %2027 }
0x171f   :  { %3335 = vrcp.f32 %v1937_v11  ;;  %v2038_v32 = vsel %vm257_vm2, %v2028_v6, 0 }
0x1720   :  { %3337 = vrcp.f32 %v1934_v44 }
0x1722   :  { %v1931_v30 = vpop.xlane.xlu0 %1930  ;;  %v2030_v17 = vpop.permute.xlu1 %2029 }
0x1723   :  { %3339 = vrcp.f32 %v1931_v30  ;;  %v2041_v58 = vsel %vm257_vm2, %v2030_v17, 0 }
0x1726   :  { %v1949_v29 = vpop.permute.xlu0 %1948  ;;  %v2024_v56 = vpop.permute.xlu1 %2023 }
0x1727   :  { %v1958_v59 = vsel %vm374_vm5, %v1949_v29, 0  ;;  %3174 = vmatprep.subr.msk.bf16.mxu0 %vm374_vm5, %v1949_v29 }
0x1728   :  { %3097 = vmatpush3.bf16.msra.mxu0 %v1958_v59 }
0x1729   :  { %3175 = vmatprep.subr.msk.bf16.mxu0 %vm257_vm2, %v2028_v6  ;;  %v3336_v38 = vpop.eup %3335 }
0x172a   :  { %v3338_v21 = vpop.eup %3337  ;;  %v1943_v55 = vmul.f32 %v3336_v38, %v3332_v1  ;;  %v2026_v54 = vpop.permute.xlu0 %2025 }
0x172b   :  { %v1942_v50 = vmul.f32 %v3338_v21, %v3330_v0 }
0x172c   :  { %v1945_v52 = vpack.c.bf16 %v1943_v55, %v1943_v55 }
0x172d   :  { %v3340_v60 = vpop.eup %3339 }
0x172e   :  { %v1941_v3 = vmul.f32 %v3340_v60, %v3334_v37 }
0x1730   :  { %v1944_v48 = vpack.c.bf16 %v1942_v50, %v1941_v3  ;;  %v3218_v3 = vld [vmem:[%s4222_s4 + $0x18] sm:$0xff]  }
0x1732   :  { %3098 = vmatprep.mubr.msk.bf16.mxu0 %vm324_vm3, %v1944_v48 }
0x1733   :  { %3099 = vmatmul.mubr.msk.bf16.vlgmr.msra.gmra.mrb[40].mxu0 %vm324_vm3, %v1945_v52 }
0x1734   :  { %3103 = vmatpush3.bf16.xpose.msra.mxu0 %v2038_v32  ;;  %3106 = vmatprep.mubr.msk.bf16.mxu0 %vm257_vm2, %v2024_v56 }
0x1735   :  { %3176 = vmatprep.subr.msk.bf16.mxu0 %vm257_vm2, %v2030_v17  ;;  %v3217_v17 = vld [vmem:[%s4222_s4 + $0x10] sm:$0xff]  }
0x173c   :  { %3105 = vmatpush3.bf16.xpose.msra.mxu0 %v2041_v58 }
0x1743   :  { %3107 = vmatmul.mubr.msk.bf16.vlgmr.msra.gmra.mrb[44].mxu0 %vm257_vm2, %v2026_v54  ;;  %vm2712_vm2 = vcmask 7168  }
0x1806   :  { %v3100_v13 = vpop.f32.mrb[40].mxu0 }
0x1807   :  { %v1994_v14 = vpop.f32.mrb[41].mxu0 }
0x1808   :  { %v3101_v4 = vpop.f32.mrb[42].mxu0 }
0x1809   :  { %v1997_v15 = vpop.f32.mrb[43].mxu0 }
0x1816   :  { %v3108_v16 = vpop.f32.mrb[44].mxu0 }
0x1817   :  { %v2077_v18 = vpop.f32.mrb[45].mxu0  ;;  %v2093_v25 = vmul.f32 0.35355338, %v3108_v16 }
0x1818   :  { %v2091_v22 = vmul.f32 0.35355338, %v2077_v18  ;;  %v3109_v23 = vpop.f32.mrb[46].mxu0 }
0x1819   :  { %v2080_v24 = vpop.f32.mrb[47].mxu0  ;;  %v2096_v36 = vadd.f32 %v3945_v40, %v2093_v25 }
0x181a   :  { %v2094_v26 = vadd.f32 %v3931_v28, %v2091_v22  ;;  %v2092_v27 = vmul.f32 0.35355338, %v2080_v24 }
0x181b   :  { %v2103_v42 = vsel %vm331_vm4, %v2096_v36, -inf }
0x181c   :  { %v2095_v31 = vadd.f32 %v3938_v35, %v2092_v27  ;;  %v2097_v34 = vsel %vm324_vm3, %v2094_v26, -inf }
0x181d   :  { %2098 = vmax.xlane.f32.xlu1 %v2097_v34 }
0x181e   :  { %v2100_v39 = vsel %vm324_vm3, %v2095_v31, -inf }
0x181f   :  { %2101 = vmax.xlane.f32.xlu0 %v2100_v39 }
0x1823   :  { %2104 = vmax.xlane.f32.xlu0 %v2103_v42  ;;  %v3220_v42 = vld [vmem:[%s4223_s5 + $0x18] sm:$0xff]  }
0x18aa   :  { %v2099_v49 = vpop.xlane.xlu1 %2098 }
0x18ab   :  { %v2106_v46 = vsub.f32 %v2094_v26, %v2099_v49 }
0x18ac   :  { %v2102_v43 = vpop.xlane.xlu0 %2101 }
0x18ad   :  { %v2107_v45 = vsub.f32 %v2095_v31, %v2102_v43  ;;  %v2109_v35 = vmul.f32 1.442695, %v2106_v46 }
0x18af   :  { %v2111_v51 = vmul.f32 1.442695, %v2107_v45 }
0x18b0   :  { %v2105_v28 = vpop.xlane.xlu0 %2104 }
0x18b1   :  { %3341 = vpow2.f32 %v2111_v51  ;;  %v2108_v53 = vsub.f32 %v2096_v36, %v2105_v28 }
0x18b3   :  { %v2113_v10 = vmul.f32 1.442695, %v2108_v53 }
0x18b5   :  { %3343 = vpow2.f32 %v2113_v10 }
0x18b6   :  { %3345 = vpow2.f32 %v2109_v35 }
0x18bb   :  { %v3342_v57 = vpop.eup %3341 }
0x18bc   :  { %v2118_v40 = vsel %vm324_vm3, %v3342_v57, 0.0 }
0x18bd   :  { %2119 = vadd.xlane.f32.xlu1 %v2118_v40 }
0x18bf   :  { %v3344_v61 = vpop.eup %3343 }
0x18c0   :  { %v2121_v62 = vsel %vm331_vm4, %v3344_v61, 0.0  ;;  %v3346_v63 = vpop.eup %3345  ;;  %vm2716_vm4 = vcmask 1024  }
0x18c1   :  { %2122 = vadd.xlane.f32.xlu0 %v2121_v62  ;;  %v2115_v0 = vsel %vm324_vm3, %v3346_v63, 0.0  ;;  %v2835_v62 = vld [vmem:[%s4224_s2 + $0x1] ss:$0 sm:$0xff] }
0x18c5   :  { %2116 = vadd.xlane.f32.xlu0 %v2115_v0 }
0x18ce   :  { %2132 = vrot.lane.b32.xlu1 %v3874_v47, %s4245_s28 }
0x18d2   :  { %1825 = vrot.lane.b32.xlu1 %v4014_v20, %s4246_s22 }
0x18d6   :  { %1827 = vrot.lane.b32.xlu1 %v4016_v19, %s4246_s22 }
0x18da   :  { %1829 = vrot.lane.b32.xlu1 %v4012_v9, %s4246_s22 }
0x18db   :  { %2134 = vrot.lane.b32.xlu0 %v3962_v41, %s4245_s28 }
0x18de   :  { %2013 = vrot.lane.b32.xlu1 %v1997_v15, %s4247_s23 }
0x18df   :  { %2011 = vrot.lane.b32.xlu0 %v1994_v14, %s4247_s23 }
0x18e3   :  { %2015 = vrot.lane.b32.xlu0 %v3100_v13, %s4247_s23 }
0x194a   :  { %v2120_v33 = vpop.xlane.xlu1 %2119 }
0x194e   :  { %v2133_v47 = vpop.permute.xlu1 %2132  ;;  %v2123_v1 = vpop.xlane.xlu0 %2122 }
0x194f   :  { %3110 = vmatprep.subr.bf16.mxu1 %v2133_v47  ;;  %3347 = vrcp.f32 %v2123_v1 }
0x1950   :  { %3111 = vmatpush3.bf16.msra.mxu1 %v2133_v47  ;;  %3349 = vrcp.f32 %v2120_v33 }
0x1952   :  { %v1826_v20 = vpop.permute.xlu1 %1825  ;;  %v2117_v19 = vpop.xlane.xlu0 %2116 }
0x1953   :  { %1834 = vst.msk [vmem:[#allocation2] sm:$0xff] %vm615_vm7, %v1826_v20  ;;  %3351 = vrcp.f32 %v2117_v19 }
0x1956   :  { %v1828_v9 = vpop.permute.xlu1 %1827  ;;  %v2135_v41 = vpop.permute.xlu0 %2134 }
0x1957   :  { %1835 = vst.msk [vmem:[#allocation2 + $0x8] sm:$0xff] %vm615_vm7, %v1828_v9  ;;  %v2144_v2 = vsel %vm374_vm5, %v2135_v41, 0  ;;  %3177 = vmatprep.subr.msk.bf16.mxu1 %vm374_vm5, %v2135_v41  ;;  %v3221_v41 = vld [vmem:[%s4225_s6 + $0x20] sm:$0xff]  }
0x1958   :  { %3113 = vmatpush3.bf16.msra.mxu1 %v2144_v2  ;;  %v3222_v2 = vld [vmem:[%s4225_s6 + $0x28] sm:$0xff]  }
0x1959   :  { %v3348_v37 = vpop.eup %3347  ;;  %3118 = vmatprep.subr.bf16.mxu1 %v3217_v17 }
0x195a   :  { %v1830_v5 = vpop.permute.xlu1 %1829  ;;  %v2012_v44 = vpop.permute.xlu0 %2011  ;;  %v2129_v29 = vmul.f32 %v3348_v37, %v3344_v61  ;;  %v3223_v37 = vld [vmem:[%s4225_s6 + $0x30] sm:$0xff]  }
0x195b   :  { %v3350_v11 = vpop.eup %3349  ;;  %1836 = vst.msk [vmem:[#allocation2 + $0x10] sm:$0x3] %vm618_vm8, %v1830_v5  ;;  %v3224_v5 = vld [vmem:[%s4225_s6 + $0x38] sm:$0xff]  }
0x195c   :  { %2020 = vst.msk [vmem:[#allocation2] sm:$0xff] %vm803_vm9, %v2012_v44  ;;  %v2128_v21 = vmul.f32 %v3350_v11, %v3342_v57  ;;  %v2131_v55 = vpack.c.bf16 %v2129_v29, %v2129_v29 }
0x195d   :  { %v3352_v30 = vpop.eup %3351 }
0x195e   :  { %v2014_v6 = vpop.permute.xlu1 %2013  ;;  %v2016_v59 = vpop.permute.xlu0 %2015  ;;  %v2127_v38 = vmul.f32 %v3352_v30, %v3346_v63 }
0x195f   :  { %2021 = vst.msk [vmem:[#allocation2 + $0x8] sm:$0xff] %vm803_vm9, %v2014_v6 }
0x1960   :  { %2022 = vst.msk [vmem:[#allocation2 + $0x10] sm:$0x3] %vm806_vm10, %v2016_v59  ;;  %v2130_v60 = vpack.c.bf16 %v2128_v21, %v2127_v38 }
0x1962   :  { %3114 = vmatprep.mubr.msk.bf16.mxu1 %vm324_vm3, %v2130_v60 }
0x1963   :  { %3115 = vmatmul.mubr.msk.bf16.vlgmr.msra.gmra.mrb[40].mxu1 %vm324_vm3, %v2131_v55 }
0x1964   :  { %3119 = vmatpush3.bf16.msra.mxu1 %v3217_v17 }
0x1965   :  { %3120 = vmatprep.subr.bf16.mxu1 %v3218_v3 }
0x1968   :  { %3121 = vmatpush3.bf16.msra.mxu1 %v3218_v3 }
0x1969   :  { %3134 = vmatprep.subr.bf16.mxu1 %v3221_v41 }
0x1a36   :  { %v3116_v50 = vpop.f32.mrb[40].mxu1 }
0x1a37   :  { %v2180_v48 = vpop.f32.mrb[41].mxu1 }
0x1a38   :  { %2197 = vrot.lane.b32.xlu1 %v2180_v48, %s4248_s8  ;;  %v3117_v52 = vpop.f32.mrb[42].mxu1 }
0x1a39   :  { %v2183_v32 = vpop.f32.mrb[43].mxu1 }
0x1a3a   :  { %2199 = vrot.lane.b32.xlu0 %v2183_v32, %s4248_s8 }
0x1a3c   :  { %2201 = vrot.lane.b32.xlu1 %v3116_v50, %s4248_s8 }
0x1aaa   :  { %v2198_v56 = vpop.permute.xlu1 %2197 }
0x1aab   :  { %2206 = vst.msk [vmem:[#allocation2] sm:$0xff] %vm991_vm11, %v2198_v56 }
0x1aac   :  { %v2200_v58 = vpop.permute.xlu0 %2199 }
0x1aad   :  { %2207 = vst.msk [vmem:[#allocation2 + $0x8] sm:$0xff] %vm991_vm11, %v2200_v58 }
0x1aae   :  { %v2202_v54 = vpop.permute.xlu1 %2201 }
0x1aaf   :  { %2208 = vst.msk [vmem:[#allocation2 + $0x10] sm:$0x3] %vm994_vm12, %v2202_v54 }
0x1ab2   :  { %v2209_v13 = vld [vmem:[#allocation2] sm:$0xff] }
0x1ab4   :  { %v2210_v14 = vld [vmem:[#allocation2 + $0x8] sm:$0xff] }
0x1ab5   :  { %v2212_v4 = vpack.c.bf16 %v2210_v14, %v2209_v13 }
0x1ab6   :  { %v2211_v15 = vld [vmem:[#allocation2 + $0x10] sm:$0x3] }
0x1ab7   :  { %3122 = vmatprep.mubr.msk.bf16.mxu1 %vm63_vm0, %v2212_v4  ;;  %v2213_v16 = vpack.c.bf16 %v2211_v15, %v2211_v15 }
0x1ab9   :  { %3123 = vmatmul.mubr.msk.bf16.vlgmr.msra.gmra.mrb[44].mxu1 %vm63_vm0, %v2213_v16 }
0x1aba   :  { %3135 = vmatpush3.bf16.msra.mxu1 %v3221_v41 }
0x1abb   :  { %3136 = vmatprep.subr.bf16.mxu1 %v3222_v2 }
0x1abe   :  { %3137 = vmatpush3.bf16.msra.mxu1 %v3222_v2 }
0x1abf   :  { %3138 = vmatprep.subr.bf16.mxu1 %v3223_v37 }
0x1ac2   :  { %3139 = vmatpush3.bf16.msra.mxu1 %v3223_v37 }
0x1ac3   :  { %3140 = vmatprep.subr.bf16.mxu1 %v3224_v5 }
0x1ac6   :  { %3141 = vmatpush3.bf16.msra.mxu1 %v3224_v5 }
0x1b8c   :  { %v3124_v18 = vpop.f32.mrb[44].mxu1 }
0x1b8d   :  { %v2271_v22 = vpop.f32.mrb[45].mxu1  ;;  %v4096_v23 = vadd.f32 %v3124_v18, %v3833_v7 }
0x1b8e   :  { %v4099_v24 = vadd.f32 %v2271_v22, %v3836_v8  ;;  %v3125_v25 = vpop.f32.mrb[46].mxu1 }
0x1b8f   :  { %v2274_v26 = vpop.f32.mrb[47].mxu1  ;;  %v2292_v7 = vmul.f32 %v4096_v23, %v4096_v23 }
0x1b90   :  { %v4102_v27 = vadd.f32 %v2274_v26, %v3839_v12  ;;  %v2290_v31 = vmul.f32 %v4099_v24, %v4099_v24  ;;  %v3219_v12 = vld [vmem:[%s4223_s5 + $0x10] sm:$0xff]  }
0x1b91   :  { %v2299_v39 = vsel %vm70_vm1, %v2292_v7, 0.0  ;;  %3126 = vmatprep.subr.bf16.mxu0 %v3219_v12 }
0x1b92   :  { %v2293_v34 = vsel %vm63_vm0, %v2290_v31, 0.0  ;;  %v2291_v36 = vmul.f32 %v4102_v27, %v4102_v27  ;;  %3127 = vmatpush3.bf16.msra.mxu0 %v3219_v12 }
0x1b93   :  { %2294 = vadd.xlane.f32.xlu0 %v2293_v34  ;;  %3128 = vmatprep.subr.bf16.mxu0 %v3220_v42 }
0x1b94   :  { %v2296_v8 = vsel %vm63_vm0, %v2291_v36, 0.0 }
0x1b95   :  { %2297 = vadd.xlane.f32.xlu1 %v2296_v8 }
0x1b96   :  { %3129 = vmatpush3.bf16.msra.mxu0 %v3220_v42 }
0x1b97   :  { %2300 = vadd.xlane.f32.xlu0 %v2299_v39 }
0x1c20   :  { %v2295_v49 = vpop.xlane.xlu0 %2294 }
0x1c21   :  { %v2302_v43 = vmul.f32 0.03125, %v2295_v49 }
0x1c22   :  { %v2298_v45 = vpop.xlane.xlu1 %2297 }
0x1c23   :  { %v2305_v46 = vadd.f32 1e-06, %v2302_v43  ;;  %v2303_v51 = vmul.f32 0.03125, %v2298_v45 }
0x1c24   :  { %v2301_v28 = vpop.xlane.xlu0 %2300 }
0x1c25   :  { %3353 = vrsqrt.f32 %v2305_v46  ;;  %v2306_v53 = vadd.f32 1e-06, %v2303_v51  ;;  %v2304_v35 = vmul.f32 0.03125, %v2301_v28 }
0x1c27   :  { %3355 = vrsqrt.f32 %v2306_v53  ;;  %v2307_v10 = vadd.f32 1e-06, %v2304_v35 }
0x1c29   :  { %3357 = vrsqrt.f32 %v2307_v10 }
0x1c2f   :  { %v3354_v57 = vpop.eup %3353 }
0x1c30   :  { %v2311_v40 = vmul.f32 %v3354_v57, %v4099_v24 }
0x1c31   :  { %v3356_v61 = vpop.eup %3355 }
0x1c32   :  { %v2312_v63 = vmul.f32 %v3356_v61, %v4102_v27  ;;  %v2320_v47 = vmul.f32 %v2835_v62, %v2311_v40 }
0x1c33   :  { %v3358_v0 = vpop.eup %3357 }
0x1c34   :  { %v2313_v33 = vmul.f32 %v3358_v0, %v4096_v23  ;;  %v2321_v1 = vmul.f32 %v2835_v62, %v2312_v63 }
0x1c36   :  { %v2323_v20 = vpack.c.bf16 %v2321_v1, %v2320_v47  ;;  %v2322_v19 = vmul.f32 %v2835_v62, %v2313_v33 }
0x1c38   :  { %3130 = vmatprep.mubr.msk.bf16.mxu0 %vm63_vm0, %v2323_v20  ;;  %v2324_v9 = vpack.c.bf16 %v2322_v19, %v2322_v19  ;;  %v2858_v20 = vld [vmem:[%s4227_s10] ss:$0 sm:$0xff] }
0x1c3a   :  { %3131 = vmatmul.mubr.msk.bf16.vlgmr.msra.gmra.mrb[48].mxu0 %vm63_vm0, %v2324_v9 }
0x1d0d   :  { %v3132_v44 = vpop.f32.mrb[48].mxu0 }
0x1d0e   :  { %v2382_v11 = vpop.f32.mrb[49].mxu0  ;;  %v2398_v21 = vsub.f32 0.0, %v3132_v44 }
0x1d0f   :  { %2420 = vrot.lane.b32.xlu0 %v2382_v11, %s3406_s21  ;;  %v3133_v30 = vpop.f32.mrb[50].mxu0  ;;  %v2396_v6 = vsub.f32 0.0, %v2382_v11 }
0x1d10   :  { %v2385_v29 = vpop.f32.mrb[51].mxu0  ;;  %v2403_v55 = vmul.f32 1.442695, %v2398_v21  ;;  %v2633_v30 = vlaneseq }
0x1d11   :  { %2422 = vrot.lane.b32.xlu1 %v2385_v29, %s3406_s21  ;;  %v2397_v59 = vsub.f32 0.0, %v2385_v29  ;;  %v2399_v38 = vmul.f32 1.442695, %v2396_v6 }
0x1d13   :  { %v2401_v60 = vmul.f32 1.442695, %v2397_v59  ;;  %3359 = vpow2.f32 %v2399_v38 }
0x1d15   :  { %2424 = vrot.lane.b32.xlu1 %v3132_v44, %s3406_s21  ;;  %3361 = vpow2.f32 %v2401_v60 }
0x1d16   :  { %3363 = vpow2.f32 %v2403_v55 }
0x1d1d   :  { %v3360_v17 = vpop.eup %3359 }
0x1d1e   :  { %v2405_v50 = vadd.f32 1.0, %v3360_v17 }
0x1d1f   :  { %v3362_v3 = vpop.eup %3361 }
0x1d20   :  { %v2406_v48 = vadd.f32 1.0, %v3362_v3  ;;  %v3364_v52 = vpop.eup %3363  ;;  %3365 = vrcp.f32 %v2405_v50  ;;  %v2673_v50 = vld [vmem:[%s4229_s12 + $0x8] sm:$0xff] }
0x1d21   :  { %v2407_v32 = vadd.f32 1.0, %v3364_v52  ;;  %v2672_v52 = vld [vmem:[%s4229_s12] sm:$0xff] }
0x1d22   :  { %3367 = vrcp.f32 %v2406_v48  ;;  %v2674_v48 = vld [vmem:[%s4229_s12 + $0x10] sm:$0x3] }
0x1d23   :  { %3369 = vrcp.f32 %v2407_v32  ;;  %vm2702_vm3 = vcmp.ne.s32.totalorder %v2674_v48, 4294967196 }
0x1d2a   :  { %v3366_v56 = vpop.eup %3365 }
0x1d2b   :  { %v2414_v13 = vmul.f32 %v3366_v56, %v2382_v11 }
0x1d2c   :  { %v3368_v58 = vpop.eup %3367 }
0x1d2d   :  { %v2415_v14 = vmul.f32 %v3368_v58, %v2385_v29  ;;  %v3370_v4 = vpop.eup %3369  ;;  %v4161_v29 = vand.u32 127, %v2633_v30 }
0x1d2e   :  { %v2416_v25 = vmul.f32 %v3370_v4, %v3132_v44  ;;  %v3417_v4 = vmov 0.0  }
0x1d2f   :  { %vm2635_vm14 = vcmp.lt.s32.totalorder %v4161_v29, 64  ;;  %vm2743_vm8 = vcmp.eq.s32.totalorder %v4161_v29, 1  ;;  %vm2736_vm9 = vcmp.eq.s32.totalorder %v4161_v29, 0 }
0x1d81   :  { %v2421_v54 = vpop.permute.xlu0 %2420 }
0x1d82   :  { %v2429_v16 = vmul.f32 %v2421_v54, %v2414_v13 }
0x1d83   :  { %v2423_v15 = vpop.permute.xlu1 %2422 }
0x1d84   :  { %v2430_v18 = vmul.f32 %v2423_v15, %v2415_v14 }
0x1d86   :  { %v2432_v22 = vpack.c.bf16 %v2430_v18, %v2429_v16 }
0x1d87   :  { %v2425_v26 = vpop.permute.xlu1 %2424 }
0x1d88   :  { %v2431_v31 = vmul.f32 %v2425_v26, %v2416_v25  ;;  %3142 = vmatprep.mubr.msk.bf16.mxu1 %vm1250_vm13, %v2432_v22 }
0x1d8a   :  { %v2433_v34 = vpack.c.bf16 %v2431_v31, %v2431_v31 }
0x1d8c   :  { %3143 = vmatmul.mubr.msk.bf16.vlgmr.msra.gmra.mrb[48].mxu1 %vm1250_vm13, %v2433_v34  ;;  %v2865_v34 = vsel %vm2702_vm3, 1.0, %v3417_v4 }
0x1e5f   :  { %v3144_v36 = vpop.f32.mrb[48].mxu1 }
0x1e60   :  { %v2507_v7 = vpop.f32.mrb[49].mxu1  ;;  %v2523_v8 = vadd.f32 %v3144_v36, %v4096_v23  ;;  %v3225_v23 = vld [vmem:[%s4226_s11] sm:$0xff]  }
0x1e61   :  { %v2521_v39 = vadd.f32 %v2507_v7, %v4099_v24  ;;  %v3145_v12 = vpop.f32.mrb[50].mxu1  ;;  %3146 = vmatprep.subr.bf16.mxu0 %v3225_v23  ;;  %v3226_v24 = vld [vmem:[%s4226_s11 + $0x8] sm:$0xff]   ;;  %v2728_v7 = vsel %vm2716_vm4, %v2865_v34, 0.0 }
0x1e62   :  { %v2510_v42 = vpop.f32.mrb[51].mxu1  ;;  %v2527_v45 = vmul.f32 %v2523_v8, %v2523_v8  ;;  %3147 = vmatpush3.bf16.msra.mxu0 %v3225_v23 }
0x1e63   :  { %v2525_v49 = vmul.f32 %v2521_v39, %v2521_v39  ;;  %v2522_v43 = vadd.f32 %v2510_v42, %v4102_v27  ;;  %3148 = vmatprep.subr.bf16.mxu0 %v3226_v24 }
0x1e64   :  { %v2534_v53 = vsel %vm70_vm1, %v2527_v45, 0.0  ;;  %vm2700_vm1 = vcmp.ne.s32.totalorder %v2672_v52, 4294967196 }
0x1e65   :  { %v2526_v46 = vmul.f32 %v2522_v43, %v2522_v43  ;;  %v2528_v51 = vsel %vm63_vm0, %v2525_v49, 0.0  ;;  %v2863_v16 = vsel %vm2700_vm1, 1.0, %v3417_v4 }
0x1e66   :  { %2529 = vadd.xlane.f32.xlu0 %v2528_v51  ;;  %3149 = vmatpush3.bf16.msra.mxu0 %v3226_v24  ;;  %v2725_v26 = vsel %vm2712_vm2, %v2863_v16, 0.0 }
0x1e67   :  { %v2531_v28 = vsel %vm63_vm0, %v2526_v46, 0.0 }
0x1e68   :  { %2532 = vadd.xlane.f32.xlu1 %v2531_v28 }
0x1e6a   :  { %2535 = vadd.xlane.f32.xlu0 %v2534_v53 }
0x1ef3   :  { %v2530_v27 = vpop.xlane.xlu0 %2529 }
0x1ef4   :  { %v2537_v35 = vmul.f32 0.03125, %v2530_v27 }
0x1ef5   :  { %v2533_v10 = vpop.xlane.xlu1 %2532 }
0x1ef6   :  { %v2540_v57 = vadd.f32 1e-06, %v2537_v35  ;;  %v2538_v40 = vmul.f32 0.03125, %v2533_v10 }
0x1ef7   :  { %v2536_v61 = vpop.xlane.xlu0 %2535 }
0x1ef8   :  { %3371 = vrsqrt.f32 %v2540_v57  ;;  %v2541_v62 = vadd.f32 1e-06, %v2538_v40  ;;  %v2539_v63 = vmul.f32 0.03125, %v2536_v61 }
0x1efa   :  { %3373 = vrsqrt.f32 %v2541_v62  ;;  %v2542_v0 = vadd.f32 1e-06, %v2539_v63 }
0x1efc   :  { %3375 = vrsqrt.f32 %v2542_v0 }
0x1f02   :  { %v3372_v33 = vpop.eup %3371 }
0x1f03   :  { %v2546_v47 = vmul.f32 %v3372_v33, %v2521_v39 }
0x1f04   :  { %v3374_v1 = vpop.eup %3373 }
0x1f05   :  { %v2547_v19 = vmul.f32 %v3374_v1, %v2522_v43  ;;  %v2555_v2 = vmul.f32 %v2858_v20, %v2546_v47 }
0x1f06   :  { %v3376_v9 = vpop.eup %3375 }
0x1f07   :  { %v2548_v41 = vmul.f32 %v3376_v9, %v2523_v8  ;;  %v2556_v37 = vmul.f32 %v2858_v20, %v2547_v19 }
0x1f09   :  { %v2558_v5 = vpack.c.bf16 %v2556_v37, %v2555_v2  ;;  %v2557_v44 = vmul.f32 %v2858_v20, %v2548_v41 }
0x1f0b   :  { %3150 = vmatprep.mubr.msk.bf16.mxu0 %vm63_vm0, %v2558_v5  ;;  %v2559_v11 = vpack.c.bf16 %v2557_v44, %v2557_v44 }
0x1f0d   :  { %3151 = vmatmul.mubr.msk.bf16.vlgmr.msra.gmra.mrb[52].mxu0 %vm63_vm0, %v2559_v11  ;;  %vm2701_vm0 = vcmp.ne.s32.totalorder %v2673_v50, 4294967196 }
0x1f0e   :  { %v4193_v15 = vsel %vm2701_vm0, 1.0, %v3417_v4 }
0x1f0f   :  { %v2726_v25 = vsel %vm2712_vm2, %v4193_v15, 0.0 }
0x1f10   :  { %v2727_v36 = vadd.f32 %v2726_v25, %v2725_v26 }
0x1f12   :  { %v2729_v8 = vadd.f32 %v2728_v7, %v2727_v36 }
0x1f14   :  { %v2730_v49 = vrot.slane %v2729_v8, 4 }
0x1f16   :  { %v2731_v51 = vadd.f32 %v2730_v49, %v2729_v8 }
0x1f18   :  { %v2732_v23 = vrot.slane %v2731_v51, 2 }
0x1f1a   :  { %v2733_v35 = vadd.f32 %v2732_v23, %v2731_v51 }
0x1f1c   :  { %v2734_v57 = vrot.slane %v2733_v35, 1 }
0x1f1e   :  { %v2735_v40 = vadd.f32 %v2734_v57, %v2733_v35 }
0x1fe0   :  { %v4164_v6 = vpop.f32.mrb[52].mxu0 }
0x1fe1   :  { %2632 = vst [vmem:[%s4228_s13 + $0x10] sm:$0x3] %v4164_v6  ;;  %v2616_v59 = vpop.f32.mrb[53].mxu0  ;;  %v2638_v38 = vsel %vm2635_vm14, %v4164_v6, -1e+30 }
0x1fe2   :  { %2630 = vst [vmem:[%s4228_s13] sm:$0xff] %v2616_v59  ;;  %v3153_v21 = vpop.f32.mrb[54].mxu0  ;;  %v2644_v60 = vsel %vm2643_vm15, %v2638_v38, -inf  ;;  %v2636_v55 = vsel %vm2635_vm14, %v2616_v59, -1e+30 }
0x1fe3   :  { %2645 = vmax.xlane.f32.xlu1 %v2644_v60  ;;  %2639 = vmax.xlane.f32.xlu0 %v2636_v55  ;;  %v2619_v17 = vpop.f32.mrb[55].mxu0 }
0x1fe4   :  { %2631 = vst [vmem:[%s4228_s13 + $0x8] sm:$0xff] %v2619_v17  ;;  %v2637_v3 = vsel %vm2635_vm14, %v2619_v17, -1e+30 }
0x1fe7   :  { %2641 = vmax.xlane.f32.xlu0 %v2637_v3 }
0x1ff4   :  { %2679 = vperm.xlu1 %3196, %v2673_v50  }
0x1ff8   :  { %2682 = vperm.xlu1 %3196, %v2674_v48  }
0x1ffd   :  { %2676 = vperm.xlu0 %3195, %v2672_v52  }
0x2070   :  { %v4187_v32 = vpop.xlane.xlu1 %2645  ;;  %v4189_v56 = vpop.xlane.xlu0 %2639 }
0x2071   :  { %v2649_v58 = vsub.f32 %v2638_v38, %v4187_v32  ;;  %v2647_v54 = vsub.f32 %v2636_v55, %v4189_v56 }
0x2073   :  { %v2654_v13 = vmul.f32 1.442695, %v2649_v58  ;;  %v2650_v14 = vmul.f32 1.442695, %v2647_v54 }
0x2074   :  { %v2642_v18 = vpop.xlane.xlu0 %2641  ;;  %v2680_v42 = vpop.permute.xlu1 %2679 }
0x2075   :  { %v2648_v22 = vsub.f32 %v2637_v3, %v2642_v18  ;;  %3377 = vpow2.f32 %v2650_v14  ;;  %vm2685_vm6 = vcmp.eq.s32.totalorder %v4161_v29, %v2680_v42 }
0x2076   :  { %3379 = vpow2.f32 %v2654_v13  ;;  %v2688_v24 = vsel %vm2685_vm6, %v2619_v17, 0.0 }
0x2077   :  { %v2652_v31 = vmul.f32 1.442695, %v2648_v22 }
0x2078   :  { %v2683_v28 = vpop.permute.xlu1 %2682 }
0x2079   :  { %3381 = vpow2.f32 %v2652_v31  ;;  %vm2686_vm7 = vcmp.eq.s32.totalorder %v4161_v29, %v2683_v28 }
0x207a   :  { %v2689_v27 = vsel %vm2686_vm7, %v4164_v6, 0.0 }
0x207b   :  { %v2694_v10 = vsel %vm2643_vm15, %v2689_v27, 0.0 }
0x207c   :  { %v2677_v43 = vpop.permute.xlu0 %2676 }
0x207d   :  { %vm2684_vm5 = vcmp.eq.s32.totalorder %v4161_v29, %v2677_v43 }
0x207e   :  { %v2687_v53 = vsel %vm2684_vm5, %v2616_v59, 0.0 }
0x207f   :  { %v3378_v39 = vpop.eup %3377 }
0x2080   :  { %v3380_v12 = vpop.eup %3379  ;;  %2656 = vadd.xlane.f32.xlu1 %v3378_v39 }
0x2081   :  { %v2660_v46 = vsel %vm2643_vm15, %v3380_v12, 0.0 }
0x2083   :  { %v3382_v45 = vpop.eup %3381 }
0x2084   :  { %2658 = vadd.xlane.f32.xlu0 %v3382_v45  ;;  %2661 = vadd.xlane.f32.xlu1 %v2660_v46 }
0x2088   :  { %2690 = vadd.xlane.f32.xlu1 %v2687_v53 }
0x208c   :  { %2692 = vadd.xlane.f32.xlu1 %v2688_v24 }
0x2090   :  { %2695 = vadd.xlane.f32.xlu1 %v2694_v10 }
0x209a   :  { %2746 = vperm.xlu0 %3195, %v2735_v40  }
0x210d   :  { %v2657_v61 = vpop.xlane.xlu1 %2656 }
0x210e   :  { %3383 = vlog2.f32 %v2657_v61 }
0x2111   :  { %v2659_v62 = vpop.xlane.xlu0 %2658  ;;  %v2662_v63 = vpop.xlane.xlu1 %2661 }
0x2112   :  { %3385 = vlog2.f32 %v2659_v62 }
0x2113   :  { %3387 = vlog2.f32 %v2662_v63 }
0x2115   :  { %v2691_v0 = vpop.xlane.xlu1 %2690 }
0x2118   :  { %v3384_v33 = vpop.eup %3383 }
0x2119   :  { %v2664_v47 = vmul.f32 0.6931472, %v3384_v33  ;;  %v2693_v1 = vpop.xlane.xlu1 %2692  ;;  %v2747_v13 = vpop.permute.xlu0 %2746 }
0x211a   :  { %v2749_v4 = vsel %vm2743_vm8, %v2747_v13, 0.0 }
0x211b   :  { %v2669_v19 = vadd.f32 %v2664_v47, %v4189_v56 }
0x211c   :  { %v3386_v20 = vpop.eup %3385 }
0x211d   :  { %v3388_v9 = vpop.eup %3387  ;;  %v2666_v41 = vmul.f32 0.6931472, %v3386_v20  ;;  %v2697_v37 = vsub.f32 %v2669_v19, %v2691_v0  ;;  %v2696_v6 = vpop.xlane.xlu1 %2695 }
0x211e   :  { %v2668_v2 = vmul.f32 0.6931472, %v3388_v9 }
0x211f   :  { %v2670_v5 = vadd.f32 %v2666_v41, %v2642_v18  ;;  %v2709_v11 = vmul.f32 %v2863_v16, %v2697_v37 }
0x2120   :  { %v2671_v44 = vadd.f32 %v2668_v2, %v4187_v32 }
0x2121   :  { %v2698_v30 = vsub.f32 %v2670_v5, %v2693_v1  ;;  %v2713_v60 = vsel %vm2712_vm2, %v2709_v11, 0.0 }
0x2122   :  { %v2699_v59 = vsub.f32 %v2671_v44, %v2696_v6 }
0x2123   :  { %v2710_v38 = vmul.f32 %v4193_v15, %v2698_v30 }
0x2124   :  { %v2711_v21 = vmul.f32 %v2865_v34, %v2699_v59 }
0x2125   :  { %v2714_v55 = vsel %vm2712_vm2, %v2710_v38, 0.0 }
0x2126   :  { %v2715_v17 = vadd.f32 %v2714_v55, %v2713_v60  ;;  %v2717_v3 = vsel %vm2716_vm4, %v2711_v21, 0.0 }
0x2128   :  { %v2718_v50 = vadd.f32 %v2717_v3, %v2715_v17 }
0x212a   :  { %v2719_v48 = vrot.slane %v2718_v50, 4 }
0x212c   :  { %v2720_v52 = vadd.f32 %v2719_v48, %v2718_v50 }
0x212e   :  { %v2721_v56 = vrot.slane %v2720_v52, 2 }
0x2130   :  { %v2722_v58 = vadd.f32 %v2721_v56, %v2720_v52 }
0x2132   :  { %v2723_v32 = vrot.slane %v2722_v58, 1 }
0x2134   :  { %v2724_v54 = vadd.f32 %v2723_v32, %v2722_v58 }
0x2136   :  { %2739 = vperm.xlu1 %3196, %v2724_v54  }
0x21b5   :  { %v2740_v14 = vpop.permute.xlu1 %2739 }
0x21b6   :  { %v2742_v15 = vsel %vm2736_vm9, %v2740_v14, 0.0 }
0x21b7   :  { %v2750_v16 = vadd.f32 %v2749_v4, %v2742_v15 }
0x21b9   :  { %2751 = vst [vmem:[%s4230_s14] sm:$0x1] %v2750_v16 }

</bundles_post_ra>
